<compile_context>
chip_gen: v7x
topology: tpu7x:2x2x1
jax: 0.10.0
libtpu: 0.0.40
codegen_flags: <defaults>
</compile_context>

<pallas_src>
import jax
import jax.numpy as jnp
from jax import lax
from jax.experimental import pallas as pl
from jax.experimental.pallas import tpu as pltpu

KSIZE = 7                     # depthwise (separable) conv kernel size
PAD7 = (KSIZE - 1) // 2       # = 3
POOL = 3                      # max-pool kernel size
PADP = (POOL - 1) // 2        # = 1
BN_EPS = 1e-5


def _layer_kernel(x_ref, w_ref, b_ref, out_ref, acv_ref, acp_ref):
    """All cells of the layer, for one packed batch group.

    x_ref   : (1, H, W, C)              raw (lane-packed) input
    w_ref   : (num_cells, 7, 7, C)      depthwise filters with BN scale folded in
    b_ref   : (num_cells, C)            folded BN bias
    out_ref : (1, H, W, C)
    acv_ref : (H+6, W+6, C) f32 scratch zero-padded resident activation
    acp_ref : (H+2, W+2, C) f32 scratch -inf-padded input (first cell's pool only)
    """
    _, H, W, C = out_ref.shape
    num_cells = w_ref.shape[0]

    x0 = x_ref[0].astype(jnp.float32)

    # Zero-padded resident buffer: conv input for every cell; also the pool
    # input for cells >= 1 (post-ReLU activations are >= 0, so a 0-pad ring is
    # equivalent to PyTorch's -inf pad for max_pool2d).
    acv_ref[...] = jnp.zeros((H + 2 * PAD7, W + 2 * PAD7, C), jnp.float32)
    acv_ref[PAD7:PAD7 + H, PAD7:PAD7 + W, :] = x0

    # -inf-padded buffer: only the first cell's max-pool needs it (raw input may
    # be negative).  Written once, never updated.
    acp_ref[...] = jnp.full((H + 2 * PADP, W + 2 * PADP, C), -jnp.inf, jnp.float32)
    acp_ref[PADP:PADP + H, PADP:PADP + W, :] = x0

    for cell in range(num_cells):
        wc = w_ref[cell]                                  # (7, 7, C)

        # ---- depthwise 7x7 conv (BN scale folded into the weights) ----
        # One sublane-shifted strip load per kw, reused across the 7 kh offsets
        # (kh slices are along the untiled leading dim -> free vreg selection).
        acc = None
        mp = None
        for kw in range(KSIZE):
            strip = acv_ref[:, kw:kw + W, :]              # (H+6, W, C)
            for kh in range(KSIZE):
                wk = wc[kh, kw, :].reshape(1, 1, C)
                term = strip[kh:kh + H] * wk
                acc = term if acc is None else acc + term
            # ---- 3x3 max-pool (cells >= 1) reuses conv strips at kw = 2..4 ----
            if cell > 0 and 2 <= kw <= 4:
                for dh in range(POOL):
                    v = strip[dh + 2:dh + 2 + H]          # (H, W, C)
                    mp = v if mp is None else jnp.maximum(mp, v)

        y1 = acc + b_ref[cell, :].reshape(1, 1, C)

        # ---- first cell: true -inf-padded 3x3 max-pool of the raw input ----
        if cell == 0:
            for dw in range(POOL):
                pstrip = acp_ref[:, dw:dw + W, :]         # (H+2, W, C)
                for dh in range(POOL):
                    v = pstrip[dh:dh + H]
                    mp = v if mp is None else jnp.maximum(mp, v)

        out = jnp.maximum(y1 + mp, 0.0)

        if cell == num_cells - 1:
            out_ref[0] = out.astype(out_ref.dtype)
        else:
            # Write the new activation into the resident padded buffer; the
            # zero pad ring is untouched.
            acv_ref[PAD7:PAD7 + H, PAD7:PAD7 + W, :] = out


def pnas_make_layer_6_forward(x_nchw, params):
    """Full module forward. x_nchw: (N, 44, H, W) -> (N, 44, H, W)."""
    N, C, H, W = x_nchw.shape
    num_cells = len(params)

    # Lane packing: C=44 would occupy only 44 of the 128 lanes, so pack `pack`
    # batch elements side-by-side along the channel/lane axis (pack*C <= 128).
    pack = max(1, 128 // C)
    n_pad = (-N) % pack
    if n_pad:
        x_nchw = jnp.concatenate(
            [x_nchw, jnp.zeros((n_pad, C, H, W), x_nchw.dtype)], axis=0)
    Np = N + n_pad
    G = Np // pack
    Cp = pack * C

    # NCHW -> (G, H, W, pack*C) with packed-channel index p*C + c.
    x_packed = (x_nchw.reshape(G, pack, C, H, W)
                .transpose(0, 3, 4, 1, 2)
                .reshape(G, H, W, Cp))

    w_list, b_list = [], []
    for (w, gamma, beta, mean, var) in params:
        scale = gamma / jnp.sqrt(var + BN_EPS)             # (C,)
        bias = beta - mean * scale                         # (C,)
        w_hwc = jnp.transpose(w[:, 0, :, :], (1, 2, 0))    # (C,1,7,7) -> (7,7,C)
        w_hwc = w_hwc * scale.reshape(1, 1, C)             # fold BN scale
        w_list.append(jnp.tile(w_hwc, (1, 1, pack)))       # (7, 7, pack*C)
        b_list.append(jnp.tile(bias, pack))                 # (pack*C,)
    w_stack = jnp.stack(w_list)                            # (num_cells, 7, 7, Cp)
    b_stack = jnp.stack(b_list)                            # (num_cells, Cp)

    grid_spec = pltpu.PrefetchScalarGridSpec(
        num_scalar_prefetch=0,
        grid=(G,),
        in_specs=[
            pl.BlockSpec((1, H, W, Cp), lambda n: (n, 0, 0, 0)),
            pl.BlockSpec((num_cells, KSIZE, KSIZE, Cp), lambda n: (0, 0, 0, 0)),
            pl.BlockSpec((num_cells, Cp), lambda n: (0, 0)),
        ],
        out_specs=pl.BlockSpec((1, H, W, Cp), lambda n: (n, 0, 0, 0)),
        scratch_shapes=[
            pltpu.VMEM((H + 2 * PAD7, W + 2 * PAD7, Cp), jnp.float32),
            pltpu.VMEM((H + 2 * PADP, W + 2 * PADP, Cp), jnp.float32),
        ],
    )
    out_packed = pl.pallas_call(
        _layer_kernel,
        out_shape=jax.ShapeDtypeStruct((G, H, W, Cp), x_nchw.dtype),
        grid_spec=grid_spec,
        compiler_params=pltpu.CompilerParams(dimension_semantics=("parallel",)),
    )(x_packed, w_stack, b_stack)

    out = (out_packed.reshape(G, H, W, pack, C)
           .transpose(0, 3, 4, 1, 2)                       # (G, pack, C, H, W)
           .reshape(Np, C, H, W))
    return out[:N]


def init_params(key, num_cells, planes):
    """Deterministic per-cell params: depthwise conv weight (OIHW) + BN stats."""
    params = []
    for _ in range(num_cells):
        key, k1, k2, k3, k4, k5 = jax.random.split(key, 6)
        w = 0.1 * jax.random.normal(k1, (planes, 1, KSIZE, KSIZE), jnp.float32)
        gamma = 1.0 + 0.1 * jax.random.normal(k2, (planes,), jnp.float32)
        beta = 0.1 * jax.random.normal(k3, (planes,), jnp.float32)
        r_mean = 0.1 * jax.random.normal(k4, (planes,), jnp.float32)
        r_var = 1.0 + 0.5 * jax.random.uniform(k5, (planes,), jnp.float32)
        params.append((w, gamma, beta, r_mean, r_var))
    return params


def reference_forward(x_nchw, params):
    """Pure-JAX reference (NCHW), mirrors the PyTorch forward."""
    x = x_nchw
    for (w, gamma, beta, mean, var) in params:
        C = x.shape[1]
        y1 = lax.conv_general_dilated(
            x, w, window_strides=(1, 1), padding=((3, 3), (3, 3)),
            feature_group_count=C,
            dimension_numbers=("NCHW", "OIHW", "NCHW"))
        scale = (gamma / jnp.sqrt(var + BN_EPS)).reshape(1, C, 1, 1)
        bias = (beta - mean * gamma / jnp.sqrt(var + BN_EPS)).reshape(1, C, 1, 1)
        y1 = y1 * scale + bias
        y2 = lax.reduce_window(x, -jnp.inf, lax.max, (1, 1, 3, 3), (1, 1, 1, 1),
                               padding=((0, 0), (0, 0), (1, 1), (1, 1)))
        x = jnp.maximum(y1 + y2, 0.0)
    return x


if __name__ == "__main__":
    planes = 44        # forced by CellA_6(44, planes) + (y1 + y2) shape match
    num_cells = 2
    N, H, W = 2, 8, 8

    key = jax.random.PRNGKey(0)
    kx, kp = jax.random.split(key)
    x = jax.random.normal(kx, (N, planes, H, W), jnp.float32)
    params = init_params(kp, num_cells, planes)

    out = jax.block_until_ready(pnas_make_layer_6_forward(x, params))
    ref = jax.block_until_ready(reference_forward(x, params))

    assert out.shape == (N, planes, H, W)
    assert jnp.allclose(out, ref, atol=1e-4, rtol=1e-4), (
        f"max abs diff {float(jnp.max(jnp.abs(out - ref)))}")
    print("KERNEL_OK")
</pallas_src>

<mosaic_0001>
module attributes {stable_mosaic.version = 11 : i64} {
  func.func @_layer_kernel(%arg0: i32, %arg1: memref<1x8x8x88xf32, #tpu.memory_space<vmem>>, %arg2: memref<2x7x7x88xf32, #tpu.memory_space<vmem>>, %arg3: memref<2x88xf32, #tpu.memory_space<vmem>>, %arg4: memref<1x8x8x88xf32, #tpu.memory_space<vmem>>, %arg5: memref<14x14x88xf32, #tpu.memory_space<vmem>>, %arg6: memref<10x10x88xf32, #tpu.memory_space<vmem>>) attributes {dimension_semantics = [#tpu.dimension_semantics<parallel>], iteration_bounds = array<i64: 1>, scalar_prefetch = 0 : i64, scratch_operands = 2 : i64, tpu.core_type = #tpu.core_type<tc>, window_params = [{transform_indices = @transform_0, window_bounds = array<i64: 1, 8, 8, 88>}, {pipeline_mode = #tpu.pipeline_mode<synchronous>, transform_indices = @transform_1, window_bounds = array<i64: 2, 7, 7, 88>}, {pipeline_mode = #tpu.pipeline_mode<synchronous>, transform_indices = @transform_2, window_bounds = array<i64: 2, 88>}, {transform_indices = @transform_3, window_bounds = array<i64: 1, 8, 8, 88>}]} {
    %c0 = arith.constant 0 : index
    %c0_0 = arith.constant 0 : index
    %c0_1 = arith.constant 0 : index
    %c0_2 = arith.constant 0 : index
    %0 = vector.load %arg1[%c0, %c0_0, %c0_1, %c0_2] : memref<1x8x8x88xf32, #tpu.memory_space<vmem>>, vector<1x8x8x88xf32>
    %1 = vector.shape_cast %0 : vector<1x8x8x88xf32> to vector<8x8x88xf32>
    %cst = arith.constant 0.000000e+00 : f32
    %2 = vector.broadcast %cst : f32 to vector<14x14x88xf32>
    %c0_3 = arith.constant 0 : index
    %c0_4 = arith.constant 0 : index
    %c0_5 = arith.constant 0 : index
    %3 = vector.load %arg5[%c0_3, %c0_4, %c0_5] : memref<14x14x88xf32, #tpu.memory_space<vmem>>, vector<14x14x88xf32>
    tpu.vector_store %arg5[%c0_3, %c0_4, %c0_5], %2 {strides = array<i32>} : memref<14x14x88xf32, #tpu.memory_space<vmem>>, vector<14x14x88xf32>,
    %c3 = arith.constant 3 : index
    %c3_6 = arith.constant 3 : index
    %c0_7 = arith.constant 0 : index
    %4 = vector.load %arg5[%c3, %c3_6, %c0_7] : memref<14x14x88xf32, #tpu.memory_space<vmem>>, vector<8x8x88xf32>
    tpu.vector_store %arg5[%c3, %c3_6, %c0_7], %1 {strides = array<i32>} : memref<14x14x88xf32, #tpu.memory_space<vmem>>, vector<8x8x88xf32>,
    %cst_8 = arith.constant 0xFF800000 : f32
    %5 = vector.broadcast %cst_8 : f32 to vector<10x10x88xf32>
    %c0_9 = arith.constant 0 : index
    %c0_10 = arith.constant 0 : index
    %c0_11 = arith.constant 0 : index
    %6 = vector.load %arg6[%c0_9, %c0_10, %c0_11] : memref<10x10x88xf32, #tpu.memory_space<vmem>>, vector<10x10x88xf32>
    tpu.vector_store %arg6[%c0_9, %c0_10, %c0_11], %5 {strides = array<i32>} : memref<10x10x88xf32, #tpu.memory_space<vmem>>, vector<10x10x88xf32>,
    %c1 = arith.constant 1 : index
    %c1_12 = arith.constant 1 : index
    %c0_13 = arith.constant 0 : index
    %7 = vector.load %arg6[%c1, %c1_12, %c0_13] : memref<10x10x88xf32, #tpu.memory_space<vmem>>, vector<8x8x88xf32>
    tpu.vector_store %arg6[%c1, %c1_12, %c0_13], %1 {strides = array<i32>} : memref<10x10x88xf32, #tpu.memory_space<vmem>>, vector<8x8x88xf32>,
    %c0_14 = arith.constant 0 : index
    %c0_15 = arith.constant 0 : index
    %c0_16 = arith.constant 0 : index
    %c0_17 = arith.constant 0 : index
    %8 = vector.load %arg2[%c0_14, %c0_15, %c0_16, %c0_17] : memref<2x7x7x88xf32, #tpu.memory_space<vmem>>, vector<1x7x7x88xf32>
    %9 = vector.shape_cast %8 : vector<1x7x7x88xf32> to vector<7x7x88xf32>
    %c0_18 = arith.constant 0 : index
    %c0_19 = arith.constant 0 : index
    %c0_20 = arith.constant 0 : index
    %10 = vector.load %arg5[%c0_18, %c0_19, %c0_20] : memref<14x14x88xf32, #tpu.memory_space<vmem>>, vector<14x8x88xf32>
    %11 = vector.extract_strided_slice %9 {offsets = [0, 0, 0], sizes = [1, 1, 88], strides = [1, 1, 1]} : vector<7x7x88xf32> to vector<1x1x88xf32>
    %12 = vector.shape_cast %11 : vector<1x1x88xf32> to vector<88xf32>
    %13 = vector.shape_cast %12 : vector<88xf32> to vector<1x1x88xf32>
    %14 = vector.extract_strided_slice %10 {offsets = [0, 0, 0], sizes = [8, 8, 88], strides = [1, 1, 1]} : vector<14x8x88xf32> to vector<8x8x88xf32>
    %15 = vector.broadcast %13 : vector<1x1x88xf32> to vector<8x8x88xf32>
    %16 = arith.mulf %14, %15 : vector<8x8x88xf32>
    %17 = vector.extract_strided_slice %9 {offsets = [1, 0, 0], sizes = [1, 1, 88], strides = [1, 1, 1]} : vector<7x7x88xf32> to vector<1x1x88xf32>
    %18 = vector.shape_cast %17 : vector<1x1x88xf32> to vector<88xf32>
    %19 = vector.shape_cast %18 : vector<88xf32> to vector<1x1x88xf32>
    %20 = vector.extract_strided_slice %10 {offsets = [1, 0, 0], sizes = [8, 8, 88], strides = [1, 1, 1]} : vector<14x8x88xf32> to vector<8x8x88xf32>
    %21 = vector.broadcast %19 : vector<1x1x88xf32> to vector<8x8x88xf32>
    %22 = arith.mulf %20, %21 : vector<8x8x88xf32>
    %23 = arith.addf %16, %22 : vector<8x8x88xf32>
    %24 = vector.extract_strided_slice %9 {offsets = [2, 0, 0], sizes = [1, 1, 88], strides = [1, 1, 1]} : vector<7x7x88xf32> to vector<1x1x88xf32>
    %25 = vector.shape_cast %24 : vector<1x1x88xf32> to vector<88xf32>
    %26 = vector.shape_cast %25 : vector<88xf32> to vector<1x1x88xf32>
    %27 = vector.extract_strided_slice %10 {offsets = [2, 0, 0], sizes = [8, 8, 88], strides = [1, 1, 1]} : vector<14x8x88xf32> to vector<8x8x88xf32>
    %28 = vector.broadcast %26 : vector<1x1x88xf32> to vector<8x8x88xf32>
    %29 = arith.mulf %27, %28 : vector<8x8x88xf32>
    %30 = arith.addf %23, %29 : vector<8x8x88xf32>
    %31 = vector.extract_strided_slice %9 {offsets = [3, 0, 0], sizes = [1, 1, 88], strides = [1, 1, 1]} : vector<7x7x88xf32> to vector<1x1x88xf32>
    %32 = vector.shape_cast %31 : vector<1x1x88xf32> to vector<88xf32>
    %33 = vector.shape_cast %32 : vector<88xf32> to vector<1x1x88xf32>
    %34 = vector.extract_strided_slice %10 {offsets = [3, 0, 0], sizes = [8, 8, 88], strides = [1, 1, 1]} : vector<14x8x88xf32> to vector<8x8x88xf32>
    %35 = vector.broadcast %33 : vector<1x1x88xf32> to vector<8x8x88xf32>
    %36 = arith.mulf %34, %35 : vector<8x8x88xf32>
    %37 = arith.addf %30, %36 : vector<8x8x88xf32>
    %38 = vector.extract_strided_slice %9 {offsets = [4, 0, 0], sizes = [1, 1, 88], strides = [1, 1, 1]} : vector<7x7x88xf32> to vector<1x1x88xf32>
    %39 = vector.shape_cast %38 : vector<1x1x88xf32> to vector<88xf32>
    %40 = vector.shape_cast %39 : vector<88xf32> to vector<1x1x88xf32>
    %41 = vector.extract_strided_slice %10 {offsets = [4, 0, 0], sizes = [8, 8, 88], strides = [1, 1, 1]} : vector<14x8x88xf32> to vector<8x8x88xf32>
    %42 = vector.broadcast %40 : vector<1x1x88xf32> to vector<8x8x88xf32>
    %43 = arith.mulf %41, %42 : vector<8x8x88xf32>
    %44 = arith.addf %37, %43 : vector<8x8x88xf32>
    %45 = vector.extract_strided_slice %9 {offsets = [5, 0, 0], sizes = [1, 1, 88], strides = [1, 1, 1]} : vector<7x7x88xf32> to vector<1x1x88xf32>
    %46 = vector.shape_cast %45 : vector<1x1x88xf32> to vector<88xf32>
    %47 = vector.shape_cast %46 : vector<88xf32> to vector<1x1x88xf32>
    %48 = vector.extract_strided_slice %10 {offsets = [5, 0, 0], sizes = [8, 8, 88], strides = [1, 1, 1]} : vector<14x8x88xf32> to vector<8x8x88xf32>
    %49 = vector.broadcast %47 : vector<1x1x88xf32> to vector<8x8x88xf32>
    %50 = arith.mulf %48, %49 : vector<8x8x88xf32>
    %51 = arith.addf %44, %50 : vector<8x8x88xf32>
    %52 = vector.extract_strided_slice %9 {offsets = [6, 0, 0], sizes = [1, 1, 88], strides = [1, 1, 1]} : vector<7x7x88xf32> to vector<1x1x88xf32>
    %53 = vector.shape_cast %52 : vector<1x1x88xf32> to vector<88xf32>
    %54 = vector.shape_cast %53 : vector<88xf32> to vector<1x1x88xf32>
    %55 = vector.extract_strided_slice %10 {offsets = [6, 0, 0], sizes = [8, 8, 88], strides = [1, 1, 1]} : vector<14x8x88xf32> to vector<8x8x88xf32>
    %56 = vector.broadcast %54 : vector<1x1x88xf32> to vector<8x8x88xf32>
    %57 = arith.mulf %55, %56 : vector<8x8x88xf32>
    %58 = arith.addf %51, %57 : vector<8x8x88xf32>
    %c0_21 = arith.constant 0 : index
    %c1_22 = arith.constant 1 : index
    %c0_23 = arith.constant 0 : index
    %59 = vector.load %arg5[%c0_21, %c1_22, %c0_23] : memref<14x14x88xf32, #tpu.memory_space<vmem>>, vector<14x8x88xf32>
    %60 = vector.extract_strided_slice %9 {offsets = [0, 1, 0], sizes = [1, 1, 88], strides = [1, 1, 1]} : vector<7x7x88xf32> to vector<1x1x88xf32>
    %61 = vector.shape_cast %60 : vector<1x1x88xf32> to vector<88xf32>
    %62 = vector.shape_cast %61 : vector<88xf32> to vector<1x1x88xf32>
    %63 = vector.extract_strided_slice %59 {offsets = [0, 0, 0], sizes = [8, 8, 88], strides = [1, 1, 1]} : vector<14x8x88xf32> to vector<8x8x88xf32>
    %64 = vector.broadcast %62 : vector<1x1x88xf32> to vector<8x8x88xf32>
    %65 = arith.mulf %63, %64 : vector<8x8x88xf32>
    %66 = arith.addf %58, %65 : vector<8x8x88xf32>
    %67 = vector.extract_strided_slice %9 {offsets = [1, 1, 0], sizes = [1, 1, 88], strides = [1, 1, 1]} : vector<7x7x88xf32> to vector<1x1x88xf32>
    %68 = vector.shape_cast %67 : vector<1x1x88xf32> to vector<88xf32>
    %69 = vector.shape_cast %68 : vector<88xf32> to vector<1x1x88xf32>
    %70 = vector.extract_strided_slice %59 {offsets = [1, 0, 0], sizes = [8, 8, 88], strides = [1, 1, 1]} : vector<14x8x88xf32> to vector<8x8x88xf32>
    %71 = vector.broadcast %69 : vector<1x1x88xf32> to vector<8x8x88xf32>
    %72 = arith.mulf %70, %71 : vector<8x8x88xf32>
    %73 = arith.addf %66, %72 : vector<8x8x88xf32>
    %74 = vector.extract_strided_slice %9 {offsets = [2, 1, 0], sizes = [1, 1, 88], strides = [1, 1, 1]} : vector<7x7x88xf32> to vector<1x1x88xf32>
    %75 = vector.shape_cast %74 : vector<1x1x88xf32> to vector<88xf32>
    %76 = vector.shape_cast %75 : vector<88xf32> to vector<1x1x88xf32>
    %77 = vector.extract_strided_slice %59 {offsets = [2, 0, 0], sizes = [8, 8, 88], strides = [1, 1, 1]} : vector<14x8x88xf32> to vector<8x8x88xf32>
    %78 = vector.broadcast %76 : vector<1x1x88xf32> to vector<8x8x88xf32>
    %79 = arith.mulf %77, %78 : vector<8x8x88xf32>
    %80 = arith.addf %73, %79 : vector<8x8x88xf32>
    %81 = vector.extract_strided_slice %9 {offsets = [3, 1, 0], sizes = [1, 1, 88], strides = [1, 1, 1]} : vector<7x7x88xf32> to vector<1x1x88xf32>
    %82 = vector.shape_cast %81 : vector<1x1x88xf32> to vector<88xf32>
    %83 = vector.shape_cast %82 : vector<88xf32> to vector<1x1x88xf32>
    %84 = vector.extract_strided_slice %59 {offsets = [3, 0, 0], sizes = [8, 8, 88], strides = [1, 1, 1]} : vector<14x8x88xf32> to vector<8x8x88xf32>
    %85 = vector.broadcast %83 : vector<1x1x88xf32> to vector<8x8x88xf32>
    %86 = arith.mulf %84, %85 : vector<8x8x88xf32>
    %87 = arith.addf %80, %86 : vector<8x8x88xf32>
    %88 = vector.extract_strided_slice %9 {offsets = [4, 1, 0], sizes = [1, 1, 88], strides = [1, 1, 1]} : vector<7x7x88xf32> to vector<1x1x88xf32>
    %89 = vector.shape_cast %88 : vector<1x1x88xf32> to vector<88xf32>
    %90 = vector.shape_cast %89 : vector<88xf32> to vector<1x1x88xf32>
    %91 = vector.extract_strided_slice %59 {offsets = [4, 0, 0], sizes = [8, 8, 88], strides = [1, 1, 1]} : vector<14x8x88xf32> to vector<8x8x88xf32>
    %92 = vector.broadcast %90 : vector<1x1x88xf32> to vector<8x8x88xf32>
    %93 = arith.mulf %91, %92 : vector<8x8x88xf32>
    %94 = arith.addf %87, %93 : vector<8x8x88xf32>
    %95 = vector.extract_strided_slice %9 {offsets = [5, 1, 0], sizes = [1, 1, 88], strides = [1, 1, 1]} : vector<7x7x88xf32> to vector<1x1x88xf32>
    %96 = vector.shape_cast %95 : vector<1x1x88xf32> to vector<88xf32>
    %97 = vector.shape_cast %96 : vector<88xf32> to vector<1x1x88xf32>
    %98 = vector.extract_strided_slice %59 {offsets = [5, 0, 0], sizes = [8, 8, 88], strides = [1, 1, 1]} : vector<14x8x88xf32> to vector<8x8x88xf32>
    %99 = vector.broadcast %97 : vector<1x1x88xf32> to vector<8x8x88xf32>
    %100 = arith.mulf %98, %99 : vector<8x8x88xf32>
    %101 = arith.addf %94, %100 : vector<8x8x88xf32>
    %102 = vector.extract_strided_slice %9 {offsets = [6, 1, 0], sizes = [1, 1, 88], strides = [1, 1, 1]} : vector<7x7x88xf32> to vector<1x1x88xf32>
    %103 = vector.shape_cast %102 : vector<1x1x88xf32> to vector<88xf32>
    %104 = vector.shape_cast %103 : vector<88xf32> to vector<1x1x88xf32>
    %105 = vector.extract_strided_slice %59 {offsets = [6, 0, 0], sizes = [8, 8, 88], strides = [1, 1, 1]} : vector<14x8x88xf32> to vector<8x8x88xf32>
    %106 = vector.broadcast %104 : vector<1x1x88xf32> to vector<8x8x88xf32>
    %107 = arith.mulf %105, %106 : vector<8x8x88xf32>
    %108 = arith.addf %101, %107 : vector<8x8x88xf32>
    %c0_24 = arith.constant 0 : index
    %c2 = arith.constant 2 : index
    %c0_25 = arith.constant 0 : index
    %109 = vector.load %arg5[%c0_24, %c2, %c0_25] : memref<14x14x88xf32, #tpu.memory_space<vmem>>, vector<14x8x88xf32>
    %110 = vector.extract_strided_slice %9 {offsets = [0, 2, 0], sizes = [1, 1, 88], strides = [1, 1, 1]} : vector<7x7x88xf32> to vector<1x1x88xf32>
    %111 = vector.shape_cast %110 : vector<1x1x88xf32> to vector<88xf32>
    %112 = vector.shape_cast %111 : vector<88xf32> to vector<1x1x88xf32>
    %113 = vector.extract_strided_slice %109 {offsets = [0, 0, 0], sizes = [8, 8, 88], strides = [1, 1, 1]} : vector<14x8x88xf32> to vector<8x8x88xf32>
    %114 = vector.broadcast %112 : vector<1x1x88xf32> to vector<8x8x88xf32>
    %115 = arith.mulf %113, %114 : vector<8x8x88xf32>
    %116 = arith.addf %108, %115 : vector<8x8x88xf32>
    %117 = vector.extract_strided_slice %9 {offsets = [1, 2, 0], sizes = [1, 1, 88], strides = [1, 1, 1]} : vector<7x7x88xf32> to vector<1x1x88xf32>
    %118 = vector.shape_cast %117 : vector<1x1x88xf32> to vector<88xf32>
    %119 = vector.shape_cast %118 : vector<88xf32> to vector<1x1x88xf32>
    %120 = vector.extract_strided_slice %109 {offsets = [1, 0, 0], sizes = [8, 8, 88], strides = [1, 1, 1]} : vector<14x8x88xf32> to vector<8x8x88xf32>
    %121 = vector.broadcast %119 : vector<1x1x88xf32> to vector<8x8x88xf32>
    %122 = arith.mulf %120, %121 : vector<8x8x88xf32>
    %123 = arith.addf %116, %122 : vector<8x8x88xf32>
    %124 = vector.extract_strided_slice %9 {offsets = [2, 2, 0], sizes = [1, 1, 88], strides = [1, 1, 1]} : vector<7x7x88xf32> to vector<1x1x88xf32>
    %125 = vector.shape_cast %124 : vector<1x1x88xf32> to vector<88xf32>
    %126 = vector.shape_cast %125 : vector<88xf32> to vector<1x1x88xf32>
    %127 = vector.extract_strided_slice %109 {offsets = [2, 0, 0], sizes = [8, 8, 88], strides = [1, 1, 1]} : vector<14x8x88xf32> to vector<8x8x88xf32>
    %128 = vector.broadcast %126 : vector<1x1x88xf32> to vector<8x8x88xf32>
    %129 = arith.mulf %127, %128 : vector<8x8x88xf32>
    %130 = arith.addf %123, %129 : vector<8x8x88xf32>
    %131 = vector.extract_strided_slice %9 {offsets = [3, 2, 0], sizes = [1, 1, 88], strides = [1, 1, 1]} : vector<7x7x88xf32> to vector<1x1x88xf32>
    %132 = vector.shape_cast %131 : vector<1x1x88xf32> to vector<88xf32>
    %133 = vector.shape_cast %132 : vector<88xf32> to vector<1x1x88xf32>
    %134 = vector.extract_strided_slice %109 {offsets = [3, 0, 0], sizes = [8, 8, 88], strides = [1, 1, 1]} : vector<14x8x88xf32> to vector<8x8x88xf32>
    %135 = vector.broadcast %133 : vector<1x1x88xf32> to vector<8x8x88xf32>
    %136 = arith.mulf %134, %135 : vector<8x8x88xf32>
    %137 = arith.addf %130, %136 : vector<8x8x88xf32>
    %138 = vector.extract_strided_slice %9 {offsets = [4, 2, 0], sizes = [1, 1, 88], strides = [1, 1, 1]} : vector<7x7x88xf32> to vector<1x1x88xf32>
    %139 = vector.shape_cast %138 : vector<1x1x88xf32> to vector<88xf32>
    %140 = vector.shape_cast %139 : vector<88xf32> to vector<1x1x88xf32>
    %141 = vector.extract_strided_slice %109 {offsets = [4, 0, 0], sizes = [8, 8, 88], strides = [1, 1, 1]} : vector<14x8x88xf32> to vector<8x8x88xf32>
    %142 = vector.broadcast %140 : vector<1x1x88xf32> to vector<8x8x88xf32>
    %143 = arith.mulf %141, %142 : vector<8x8x88xf32>
    %144 = arith.addf %137, %143 : vector<8x8x88xf32>
    %145 = vector.extract_strided_slice %9 {offsets = [5, 2, 0], sizes = [1, 1, 88], strides = [1, 1, 1]} : vector<7x7x88xf32> to vector<1x1x88xf32>
    %146 = vector.shape_cast %145 : vector<1x1x88xf32> to vector<88xf32>
    %147 = vector.shape_cast %146 : vector<88xf32> to vector<1x1x88xf32>
    %148 = vector.extract_strided_slice %109 {offsets = [5, 0, 0], sizes = [8, 8, 88], strides = [1, 1, 1]} : vector<14x8x88xf32> to vector<8x8x88xf32>
    %149 = vector.broadcast %147 : vector<1x1x88xf32> to vector<8x8x88xf32>
    %150 = arith.mulf %148, %149 : vector<8x8x88xf32>
    %151 = arith.addf %144, %150 : vector<8x8x88xf32>
    %152 = vector.extract_strided_slice %9 {offsets = [6, 2, 0], sizes = [1, 1, 88], strides = [1, 1, 1]} : vector<7x7x88xf32> to vector<1x1x88xf32>
    %153 = vector.shape_cast %152 : vector<1x1x88xf32> to vector<88xf32>
    %154 = vector.shape_cast %153 : vector<88xf32> to vector<1x1x88xf32>
    %155 = vector.extract_strided_slice %109 {offsets = [6, 0, 0], sizes = [8, 8, 88], strides = [1, 1, 1]} : vector<14x8x88xf32> to vector<8x8x88xf32>
    %156 = vector.broadcast %154 : vector<1x1x88xf32> to vector<8x8x88xf32>
    %157 = arith.mulf %155, %156 : vector<8x8x88xf32>
    %158 = arith.addf %151, %157 : vector<8x8x88xf32>
    %c0_26 = arith.constant 0 : index
    %c3_27 = arith.constant 3 : index
    %c0_28 = arith.constant 0 : index
    %159 = vector.load %arg5[%c0_26, %c3_27, %c0_28] : memref<14x14x88xf32, #tpu.memory_space<vmem>>, vector<14x8x88xf32>
    %160 = vector.extract_strided_slice %9 {offsets = [0, 3, 0], sizes = [1, 1, 88], strides = [1, 1, 1]} : vector<7x7x88xf32> to vector<1x1x88xf32>
    %161 = vector.shape_cast %160 : vector<1x1x88xf32> to vector<88xf32>
    %162 = vector.shape_cast %161 : vector<88xf32> to vector<1x1x88xf32>
    %163 = vector.extract_strided_slice %159 {offsets = [0, 0, 0], sizes = [8, 8, 88], strides = [1, 1, 1]} : vector<14x8x88xf32> to vector<8x8x88xf32>
    %164 = vector.broadcast %162 : vector<1x1x88xf32> to vector<8x8x88xf32>
    %165 = arith.mulf %163, %164 : vector<8x8x88xf32>
    %166 = arith.addf %158, %165 : vector<8x8x88xf32>
    %167 = vector.extract_strided_slice %9 {offsets = [1, 3, 0], sizes = [1, 1, 88], strides = [1, 1, 1]} : vector<7x7x88xf32> to vector<1x1x88xf32>
    %168 = vector.shape_cast %167 : vector<1x1x88xf32> to vector<88xf32>
    %169 = vector.shape_cast %168 : vector<88xf32> to vector<1x1x88xf32>
    %170 = vector.extract_strided_slice %159 {offsets = [1, 0, 0], sizes = [8, 8, 88], strides = [1, 1, 1]} : vector<14x8x88xf32> to vector<8x8x88xf32>
    %171 = vector.broadcast %169 : vector<1x1x88xf32> to vector<8x8x88xf32>
    %172 = arith.mulf %170, %171 : vector<8x8x88xf32>
    %173 = arith.addf %166, %172 : vector<8x8x88xf32>
    %174 = vector.extract_strided_slice %9 {offsets = [2, 3, 0], sizes = [1, 1, 88], strides = [1, 1, 1]} : vector<7x7x88xf32> to vector<1x1x88xf32>
    %175 = vector.shape_cast %174 : vector<1x1x88xf32> to vector<88xf32>
    %176 = vector.shape_cast %175 : vector<88xf32> to vector<1x1x88xf32>
    %177 = vector.extract_strided_slice %159 {offsets = [2, 0, 0], sizes = [8, 8, 88], strides = [1, 1, 1]} : vector<14x8x88xf32> to vector<8x8x88xf32>
    %178 = vector.broadcast %176 : vector<1x1x88xf32> to vector<8x8x88xf32>
    %179 = arith.mulf %177, %178 : vector<8x8x88xf32>
    %180 = arith.addf %173, %179 : vector<8x8x88xf32>
    %181 = vector.extract_strided_slice %9 {offsets = [3, 3, 0], sizes = [1, 1, 88], strides = [1, 1, 1]} : vector<7x7x88xf32> to vector<1x1x88xf32>
    %182 = vector.shape_cast %181 : vector<1x1x88xf32> to vector<88xf32>
    %183 = vector.shape_cast %182 : vector<88xf32> to vector<1x1x88xf32>
    %184 = vector.extract_strided_slice %159 {offsets = [3, 0, 0], sizes = [8, 8, 88], strides = [1, 1, 1]} : vector<14x8x88xf32> to vector<8x8x88xf32>
    %185 = vector.broadcast %183 : vector<1x1x88xf32> to vector<8x8x88xf32>
    %186 = arith.mulf %184, %185 : vector<8x8x88xf32>
    %187 = arith.addf %180, %186 : vector<8x8x88xf32>
    %188 = vector.extract_strided_slice %9 {offsets = [4, 3, 0], sizes = [1, 1, 88], strides = [1, 1, 1]} : vector<7x7x88xf32> to vector<1x1x88xf32>
    %189 = vector.shape_cast %188 : vector<1x1x88xf32> to vector<88xf32>
    %190 = vector.shape_cast %189 : vector<88xf32> to vector<1x1x88xf32>
    %191 = vector.extract_strided_slice %159 {offsets = [4, 0, 0], sizes = [8, 8, 88], strides = [1, 1, 1]} : vector<14x8x88xf32> to vector<8x8x88xf32>
    %192 = vector.broadcast %190 : vector<1x1x88xf32> to vector<8x8x88xf32>
    %193 = arith.mulf %191, %192 : vector<8x8x88xf32>
    %194 = arith.addf %187, %193 : vector<8x8x88xf32>
    %195 = vector.extract_strided_slice %9 {offsets = [5, 3, 0], sizes = [1, 1, 88], strides = [1, 1, 1]} : vector<7x7x88xf32> to vector<1x1x88xf32>
    %196 = vector.shape_cast %195 : vector<1x1x88xf32> to vector<88xf32>
    %197 = vector.shape_cast %196 : vector<88xf32> to vector<1x1x88xf32>
    %198 = vector.extract_strided_slice %159 {offsets = [5, 0, 0], sizes = [8, 8, 88], strides = [1, 1, 1]} : vector<14x8x88xf32> to vector<8x8x88xf32>
    %199 = vector.broadcast %197 : vector<1x1x88xf32> to vector<8x8x88xf32>
    %200 = arith.mulf %198, %199 : vector<8x8x88xf32>
    %201 = arith.addf %194, %200 : vector<8x8x88xf32>
    %202 = vector.extract_strided_slice %9 {offsets = [6, 3, 0], sizes = [1, 1, 88], strides = [1, 1, 1]} : vector<7x7x88xf32> to vector<1x1x88xf32>
    %203 = vector.shape_cast %202 : vector<1x1x88xf32> to vector<88xf32>
    %204 = vector.shape_cast %203 : vector<88xf32> to vector<1x1x88xf32>
    %205 = vector.extract_strided_slice %159 {offsets = [6, 0, 0], sizes = [8, 8, 88], strides = [1, 1, 1]} : vector<14x8x88xf32> to vector<8x8x88xf32>
    %206 = vector.broadcast %204 : vector<1x1x88xf32> to vector<8x8x88xf32>
    %207 = arith.mulf %205, %206 : vector<8x8x88xf32>
    %208 = arith.addf %201, %207 : vector<8x8x88xf32>
    %c0_29 = arith.constant 0 : index
    %c4 = arith.constant 4 : index
    %c0_30 = arith.constant 0 : index
    %209 = vector.load %arg5[%c0_29, %c4, %c0_30] : memref<14x14x88xf32, #tpu.memory_space<vmem>>, vector<14x8x88xf32>
    %210 = vector.extract_strided_slice %9 {offsets = [0, 4, 0], sizes = [1, 1, 88], strides = [1, 1, 1]} : vector<7x7x88xf32> to vector<1x1x88xf32>
    %211 = vector.shape_cast %210 : vector<1x1x88xf32> to vector<88xf32>
    %212 = vector.shape_cast %211 : vector<88xf32> to vector<1x1x88xf32>
    %213 = vector.extract_strided_slice %209 {offsets = [0, 0, 0], sizes = [8, 8, 88], strides = [1, 1, 1]} : vector<14x8x88xf32> to vector<8x8x88xf32>
    %214 = vector.broadcast %212 : vector<1x1x88xf32> to vector<8x8x88xf32>
    %215 = arith.mulf %213, %214 : vector<8x8x88xf32>
    %216 = arith.addf %208, %215 : vector<8x8x88xf32>
    %217 = vector.extract_strided_slice %9 {offsets = [1, 4, 0], sizes = [1, 1, 88], strides = [1, 1, 1]} : vector<7x7x88xf32> to vector<1x1x88xf32>
    %218 = vector.shape_cast %217 : vector<1x1x88xf32> to vector<88xf32>
    %219 = vector.shape_cast %218 : vector<88xf32> to vector<1x1x88xf32>
    %220 = vector.extract_strided_slice %209 {offsets = [1, 0, 0], sizes = [8, 8, 88], strides = [1, 1, 1]} : vector<14x8x88xf32> to vector<8x8x88xf32>
    %221 = vector.broadcast %219 : vector<1x1x88xf32> to vector<8x8x88xf32>
    %222 = arith.mulf %220, %221 : vector<8x8x88xf32>
    %223 = arith.addf %216, %222 : vector<8x8x88xf32>
    %224 = vector.extract_strided_slice %9 {offsets = [2, 4, 0], sizes = [1, 1, 88], strides = [1, 1, 1]} : vector<7x7x88xf32> to vector<1x1x88xf32>
    %225 = vector.shape_cast %224 : vector<1x1x88xf32> to vector<88xf32>
    %226 = vector.shape_cast %225 : vector<88xf32> to vector<1x1x88xf32>
    %227 = vector.extract_strided_slice %209 {offsets = [2, 0, 0], sizes = [8, 8, 88], strides = [1, 1, 1]} : vector<14x8x88xf32> to vector<8x8x88xf32>
    %228 = vector.broadcast %226 : vector<1x1x88xf32> to vector<8x8x88xf32>
    %229 = arith.mulf %227, %228 : vector<8x8x88xf32>
    %230 = arith.addf %223, %229 : vector<8x8x88xf32>
    %231 = vector.extract_strided_slice %9 {offsets = [3, 4, 0], sizes = [1, 1, 88], strides = [1, 1, 1]} : vector<7x7x88xf32> to vector<1x1x88xf32>
    %232 = vector.shape_cast %231 : vector<1x1x88xf32> to vector<88xf32>
    %233 = vector.shape_cast %232 : vector<88xf32> to vector<1x1x88xf32>
    %234 = vector.extract_strided_slice %209 {offsets = [3, 0, 0], sizes = [8, 8, 88], strides = [1, 1, 1]} : vector<14x8x88xf32> to vector<8x8x88xf32>
    %235 = vector.broadcast %233 : vector<1x1x88xf32> to vector<8x8x88xf32>
    %236 = arith.mulf %234, %235 : vector<8x8x88xf32>
    %237 = arith.addf %230, %236 : vector<8x8x88xf32>
    %238 = vector.extract_strided_slice %9 {offsets = [4, 4, 0], sizes = [1, 1, 88], strides = [1, 1, 1]} : vector<7x7x88xf32> to vector<1x1x88xf32>
    %239 = vector.shape_cast %238 : vector<1x1x88xf32> to vector<88xf32>
    %240 = vector.shape_cast %239 : vector<88xf32> to vector<1x1x88xf32>
    %241 = vector.extract_strided_slice %209 {offsets = [4, 0, 0], sizes = [8, 8, 88], strides = [1, 1, 1]} : vector<14x8x88xf32> to vector<8x8x88xf32>
    %242 = vector.broadcast %240 : vector<1x1x88xf32> to vector<8x8x88xf32>
    %243 = arith.mulf %241, %242 : vector<8x8x88xf32>
    %244 = arith.addf %237, %243 : vector<8x8x88xf32>
    %245 = vector.extract_strided_slice %9 {offsets = [5, 4, 0], sizes = [1, 1, 88], strides = [1, 1, 1]} : vector<7x7x88xf32> to vector<1x1x88xf32>
    %246 = vector.shape_cast %245 : vector<1x1x88xf32> to vector<88xf32>
    %247 = vector.shape_cast %246 : vector<88xf32> to vector<1x1x88xf32>
    %248 = vector.extract_strided_slice %209 {offsets = [5, 0, 0], sizes = [8, 8, 88], strides = [1, 1, 1]} : vector<14x8x88xf32> to vector<8x8x88xf32>
    %249 = vector.broadcast %247 : vector<1x1x88xf32> to vector<8x8x88xf32>
    %250 = arith.mulf %248, %249 : vector<8x8x88xf32>
    %251 = arith.addf %244, %250 : vector<8x8x88xf32>
    %252 = vector.extract_strided_slice %9 {offsets = [6, 4, 0], sizes = [1, 1, 88], strides = [1, 1, 1]} : vector<7x7x88xf32> to vector<1x1x88xf32>
    %253 = vector.shape_cast %252 : vector<1x1x88xf32> to vector<88xf32>
    %254 = vector.shape_cast %253 : vector<88xf32> to vector<1x1x88xf32>
    %255 = vector.extract_strided_slice %209 {offsets = [6, 0, 0], sizes = [8, 8, 88], strides = [1, 1, 1]} : vector<14x8x88xf32> to vector<8x8x88xf32>
    %256 = vector.broadcast %254 : vector<1x1x88xf32> to vector<8x8x88xf32>
    %257 = arith.mulf %255, %256 : vector<8x8x88xf32>
    %258 = arith.addf %251, %257 : vector<8x8x88xf32>
    %c0_31 = arith.constant 0 : index
    %c5 = arith.constant 5 : index
    %c0_32 = arith.constant 0 : index
    %259 = vector.load %arg5[%c0_31, %c5, %c0_32] : memref<14x14x88xf32, #tpu.memory_space<vmem>>, vector<14x8x88xf32>
    %260 = vector.extract_strided_slice %9 {offsets = [0, 5, 0], sizes = [1, 1, 88], strides = [1, 1, 1]} : vector<7x7x88xf32> to vector<1x1x88xf32>
    %261 = vector.shape_cast %260 : vector<1x1x88xf32> to vector<88xf32>
    %262 = vector.shape_cast %261 : vector<88xf32> to vector<1x1x88xf32>
    %263 = vector.extract_strided_slice %259 {offsets = [0, 0, 0], sizes = [8, 8, 88], strides = [1, 1, 1]} : vector<14x8x88xf32> to vector<8x8x88xf32>
    %264 = vector.broadcast %262 : vector<1x1x88xf32> to vector<8x8x88xf32>
    %265 = arith.mulf %263, %264 : vector<8x8x88xf32>
    %266 = arith.addf %258, %265 : vector<8x8x88xf32>
    %267 = vector.extract_strided_slice %9 {offsets = [1, 5, 0], sizes = [1, 1, 88], strides = [1, 1, 1]} : vector<7x7x88xf32> to vector<1x1x88xf32>
    %268 = vector.shape_cast %267 : vector<1x1x88xf32> to vector<88xf32>
    %269 = vector.shape_cast %268 : vector<88xf32> to vector<1x1x88xf32>
    %270 = vector.extract_strided_slice %259 {offsets = [1, 0, 0], sizes = [8, 8, 88], strides = [1, 1, 1]} : vector<14x8x88xf32> to vector<8x8x88xf32>
    %271 = vector.broadcast %269 : vector<1x1x88xf32> to vector<8x8x88xf32>
    %272 = arith.mulf %270, %271 : vector<8x8x88xf32>
    %273 = arith.addf %266, %272 : vector<8x8x88xf32>
    %274 = vector.extract_strided_slice %9 {offsets = [2, 5, 0], sizes = [1, 1, 88], strides = [1, 1, 1]} : vector<7x7x88xf32> to vector<1x1x88xf32>
    %275 = vector.shape_cast %274 : vector<1x1x88xf32> to vector<88xf32>
    %276 = vector.shape_cast %275 : vector<88xf32> to vector<1x1x88xf32>
    %277 = vector.extract_strided_slice %259 {offsets = [2, 0, 0], sizes = [8, 8, 88], strides = [1, 1, 1]} : vector<14x8x88xf32> to vector<8x8x88xf32>
    %278 = vector.broadcast %276 : vector<1x1x88xf32> to vector<8x8x88xf32>
    %279 = arith.mulf %277, %278 : vector<8x8x88xf32>
    %280 = arith.addf %273, %279 : vector<8x8x88xf32>
    %281 = vector.extract_strided_slice %9 {offsets = [3, 5, 0], sizes = [1, 1, 88], strides = [1, 1, 1]} : vector<7x7x88xf32> to vector<1x1x88xf32>
    %282 = vector.shape_cast %281 : vector<1x1x88xf32> to vector<88xf32>
    %283 = vector.shape_cast %282 : vector<88xf32> to vector<1x1x88xf32>
    %284 = vector.extract_strided_slice %259 {offsets = [3, 0, 0], sizes = [8, 8, 88], strides = [1, 1, 1]} : vector<14x8x88xf32> to vector<8x8x88xf32>
    %285 = vector.broadcast %283 : vector<1x1x88xf32> to vector<8x8x88xf32>
    %286 = arith.mulf %284, %285 : vector<8x8x88xf32>
    %287 = arith.addf %280, %286 : vector<8x8x88xf32>
    %288 = vector.extract_strided_slice %9 {offsets = [4, 5, 0], sizes = [1, 1, 88], strides = [1, 1, 1]} : vector<7x7x88xf32> to vector<1x1x88xf32>
    %289 = vector.shape_cast %288 : vector<1x1x88xf32> to vector<88xf32>
    %290 = vector.shape_cast %289 : vector<88xf32> to vector<1x1x88xf32>
    %291 = vector.extract_strided_slice %259 {offsets = [4, 0, 0], sizes = [8, 8, 88], strides = [1, 1, 1]} : vector<14x8x88xf32> to vector<8x8x88xf32>
    %292 = vector.broadcast %290 : vector<1x1x88xf32> to vector<8x8x88xf32>
    %293 = arith.mulf %291, %292 : vector<8x8x88xf32>
    %294 = arith.addf %287, %293 : vector<8x8x88xf32>
    %295 = vector.extract_strided_slice %9 {offsets = [5, 5, 0], sizes = [1, 1, 88], strides = [1, 1, 1]} : vector<7x7x88xf32> to vector<1x1x88xf32>
    %296 = vector.shape_cast %295 : vector<1x1x88xf32> to vector<88xf32>
    %297 = vector.shape_cast %296 : vector<88xf32> to vector<1x1x88xf32>
    %298 = vector.extract_strided_slice %259 {offsets = [5, 0, 0], sizes = [8, 8, 88], strides = [1, 1, 1]} : vector<14x8x88xf32> to vector<8x8x88xf32>
    %299 = vector.broadcast %297 : vector<1x1x88xf32> to vector<8x8x88xf32>
    %300 = arith.mulf %298, %299 : vector<8x8x88xf32>
    %301 = arith.addf %294, %300 : vector<8x8x88xf32>
    %302 = vector.extract_strided_slice %9 {offsets = [6, 5, 0], sizes = [1, 1, 88], strides = [1, 1, 1]} : vector<7x7x88xf32> to vector<1x1x88xf32>
    %303 = vector.shape_cast %302 : vector<1x1x88xf32> to vector<88xf32>
    %304 = vector.shape_cast %303 : vector<88xf32> to vector<1x1x88xf32>
    %305 = vector.extract_strided_slice %259 {offsets = [6, 0, 0], sizes = [8, 8, 88], strides = [1, 1, 1]} : vector<14x8x88xf32> to vector<8x8x88xf32>
    %306 = vector.broadcast %304 : vector<1x1x88xf32> to vector<8x8x88xf32>
    %307 = arith.mulf %305, %306 : vector<8x8x88xf32>
    %308 = arith.addf %301, %307 : vector<8x8x88xf32>
    %c0_33 = arith.constant 0 : index
    %c6 = arith.constant 6 : index
    %c0_34 = arith.constant 0 : index
    %309 = vector.load %arg5[%c0_33, %c6, %c0_34] : memref<14x14x88xf32, #tpu.memory_space<vmem>>, vector<14x8x88xf32>
    %310 = vector.extract_strided_slice %9 {offsets = [0, 6, 0], sizes = [1, 1, 88], strides = [1, 1, 1]} : vector<7x7x88xf32> to vector<1x1x88xf32>
    %311 = vector.shape_cast %310 : vector<1x1x88xf32> to vector<88xf32>
    %312 = vector.shape_cast %311 : vector<88xf32> to vector<1x1x88xf32>
    %313 = vector.extract_strided_slice %309 {offsets = [0, 0, 0], sizes = [8, 8, 88], strides = [1, 1, 1]} : vector<14x8x88xf32> to vector<8x8x88xf32>
    %314 = vector.broadcast %312 : vector<1x1x88xf32> to vector<8x8x88xf32>
    %315 = arith.mulf %313, %314 : vector<8x8x88xf32>
    %316 = arith.addf %308, %315 : vector<8x8x88xf32>
    %317 = vector.extract_strided_slice %9 {offsets = [1, 6, 0], sizes = [1, 1, 88], strides = [1, 1, 1]} : vector<7x7x88xf32> to vector<1x1x88xf32>
    %318 = vector.shape_cast %317 : vector<1x1x88xf32> to vector<88xf32>
    %319 = vector.shape_cast %318 : vector<88xf32> to vector<1x1x88xf32>
    %320 = vector.extract_strided_slice %309 {offsets = [1, 0, 0], sizes = [8, 8, 88], strides = [1, 1, 1]} : vector<14x8x88xf32> to vector<8x8x88xf32>
    %321 = vector.broadcast %319 : vector<1x1x88xf32> to vector<8x8x88xf32>
    %322 = arith.mulf %320, %321 : vector<8x8x88xf32>
    %323 = arith.addf %316, %322 : vector<8x8x88xf32>
    %324 = vector.extract_strided_slice %9 {offsets = [2, 6, 0], sizes = [1, 1, 88], strides = [1, 1, 1]} : vector<7x7x88xf32> to vector<1x1x88xf32>
    %325 = vector.shape_cast %324 : vector<1x1x88xf32> to vector<88xf32>
    %326 = vector.shape_cast %325 : vector<88xf32> to vector<1x1x88xf32>
    %327 = vector.extract_strided_slice %309 {offsets = [2, 0, 0], sizes = [8, 8, 88], strides = [1, 1, 1]} : vector<14x8x88xf32> to vector<8x8x88xf32>
    %328 = vector.broadcast %326 : vector<1x1x88xf32> to vector<8x8x88xf32>
    %329 = arith.mulf %327, %328 : vector<8x8x88xf32>
    %330 = arith.addf %323, %329 : vector<8x8x88xf32>
    %331 = vector.extract_strided_slice %9 {offsets = [3, 6, 0], sizes = [1, 1, 88], strides = [1, 1, 1]} : vector<7x7x88xf32> to vector<1x1x88xf32>
    %332 = vector.shape_cast %331 : vector<1x1x88xf32> to vector<88xf32>
    %333 = vector.shape_cast %332 : vector<88xf32> to vector<1x1x88xf32>
    %334 = vector.extract_strided_slice %309 {offsets = [3, 0, 0], sizes = [8, 8, 88], strides = [1, 1, 1]} : vector<14x8x88xf32> to vector<8x8x88xf32>
    %335 = vector.broadcast %333 : vector<1x1x88xf32> to vector<8x8x88xf32>
    %336 = arith.mulf %334, %335 : vector<8x8x88xf32>
    %337 = arith.addf %330, %336 : vector<8x8x88xf32>
    %338 = vector.extract_strided_slice %9 {offsets = [4, 6, 0], sizes = [1, 1, 88], strides = [1, 1, 1]} : vector<7x7x88xf32> to vector<1x1x88xf32>
    %339 = vector.shape_cast %338 : vector<1x1x88xf32> to vector<88xf32>
    %340 = vector.shape_cast %339 : vector<88xf32> to vector<1x1x88xf32>
    %341 = vector.extract_strided_slice %309 {offsets = [4, 0, 0], sizes = [8, 8, 88], strides = [1, 1, 1]} : vector<14x8x88xf32> to vector<8x8x88xf32>
    %342 = vector.broadcast %340 : vector<1x1x88xf32> to vector<8x8x88xf32>
    %343 = arith.mulf %341, %342 : vector<8x8x88xf32>
    %344 = arith.addf %337, %343 : vector<8x8x88xf32>
    %345 = vector.extract_strided_slice %9 {offsets = [5, 6, 0], sizes = [1, 1, 88], strides = [1, 1, 1]} : vector<7x7x88xf32> to vector<1x1x88xf32>
    %346 = vector.shape_cast %345 : vector<1x1x88xf32> to vector<88xf32>
    %347 = vector.shape_cast %346 : vector<88xf32> to vector<1x1x88xf32>
    %348 = vector.extract_strided_slice %309 {offsets = [5, 0, 0], sizes = [8, 8, 88], strides = [1, 1, 1]} : vector<14x8x88xf32> to vector<8x8x88xf32>
    %349 = vector.broadcast %347 : vector<1x1x88xf32> to vector<8x8x88xf32>
    %350 = arith.mulf %348, %349 : vector<8x8x88xf32>
    %351 = arith.addf %344, %350 : vector<8x8x88xf32>
    %352 = vector.extract_strided_slice %9 {offsets = [6, 6, 0], sizes = [1, 1, 88], strides = [1, 1, 1]} : vector<7x7x88xf32> to vector<1x1x88xf32>
    %353 = vector.shape_cast %352 : vector<1x1x88xf32> to vector<88xf32>
    %354 = vector.shape_cast %353 : vector<88xf32> to vector<1x1x88xf32>
    %355 = vector.extract_strided_slice %309 {offsets = [6, 0, 0], sizes = [8, 8, 88], strides = [1, 1, 1]} : vector<14x8x88xf32> to vector<8x8x88xf32>
    %356 = vector.broadcast %354 : vector<1x1x88xf32> to vector<8x8x88xf32>
    %357 = arith.mulf %355, %356 : vector<8x8x88xf32>
    %358 = arith.addf %351, %357 : vector<8x8x88xf32>
    %c0_35 = arith.constant 0 : index
    %c0_36 = arith.constant 0 : index
    %359 = vector.load %arg3[%c0_35, %c0_36] : memref<2x88xf32, #tpu.memory_space<vmem>>, vector<1x88xf32>
    %360 = vector.shape_cast %359 : vector<1x88xf32> to vector<88xf32>
    %361 = vector.shape_cast %360 : vector<88xf32> to vector<1x1x88xf32>
    %362 = vector.broadcast %361 : vector<1x1x88xf32> to vector<8x8x88xf32>
    %363 = arith.addf %358, %362 : vector<8x8x88xf32>
    %c0_37 = arith.constant 0 : index
    %c0_38 = arith.constant 0 : index
    %c0_39 = arith.constant 0 : index
    %364 = vector.load %arg6[%c0_37, %c0_38, %c0_39] : memref<10x10x88xf32, #tpu.memory_space<vmem>>, vector<10x8x88xf32>
    %365 = vector.extract_strided_slice %364 {offsets = [0, 0, 0], sizes = [8, 8, 88], strides = [1, 1, 1]} : vector<10x8x88xf32> to vector<8x8x88xf32>
    %366 = vector.extract_strided_slice %364 {offsets = [1, 0, 0], sizes = [8, 8, 88], strides = [1, 1, 1]} : vector<10x8x88xf32> to vector<8x8x88xf32>
    %367 = arith.maximumf %365, %366 : vector<8x8x88xf32>
    %368 = vector.extract_strided_slice %364 {offsets = [2, 0, 0], sizes = [8, 8, 88], strides = [1, 1, 1]} : vector<10x8x88xf32> to vector<8x8x88xf32>
    %369 = arith.maximumf %367, %368 : vector<8x8x88xf32>
    %c0_40 = arith.constant 0 : index
    %c1_41 = arith.constant 1 : index
    %c0_42 = arith.constant 0 : index
    %370 = vector.load %arg6[%c0_40, %c1_41, %c0_42] : memref<10x10x88xf32, #tpu.memory_space<vmem>>, vector<10x8x88xf32>
    %371 = vector.extract_strided_slice %370 {offsets = [0, 0, 0], sizes = [8, 8, 88], strides = [1, 1, 1]} : vector<10x8x88xf32> to vector<8x8x88xf32>
    %372 = arith.maximumf %369, %371 : vector<8x8x88xf32>
    %373 = vector.extract_strided_slice %370 {offsets = [1, 0, 0], sizes = [8, 8, 88], strides = [1, 1, 1]} : vector<10x8x88xf32> to vector<8x8x88xf32>
    %374 = arith.maximumf %372, %373 : vector<8x8x88xf32>
    %375 = vector.extract_strided_slice %370 {offsets = [2, 0, 0], sizes = [8, 8, 88], strides = [1, 1, 1]} : vector<10x8x88xf32> to vector<8x8x88xf32>
    %376 = arith.maximumf %374, %375 : vector<8x8x88xf32>
    %c0_43 = arith.constant 0 : index
    %c2_44 = arith.constant 2 : index
    %c0_45 = arith.constant 0 : index
    %377 = vector.load %arg6[%c0_43, %c2_44, %c0_45] : memref<10x10x88xf32, #tpu.memory_space<vmem>>, vector<10x8x88xf32>
    %378 = vector.extract_strided_slice %377 {offsets = [0, 0, 0], sizes = [8, 8, 88], strides = [1, 1, 1]} : vector<10x8x88xf32> to vector<8x8x88xf32>
    %379 = arith.maximumf %376, %378 : vector<8x8x88xf32>
    %380 = vector.extract_strided_slice %377 {offsets = [1, 0, 0], sizes = [8, 8, 88], strides = [1, 1, 1]} : vector<10x8x88xf32> to vector<8x8x88xf32>
    %381 = arith.maximumf %379, %380 : vector<8x8x88xf32>
    %382 = vector.extract_strided_slice %377 {offsets = [2, 0, 0], sizes = [8, 8, 88], strides = [1, 1, 1]} : vector<10x8x88xf32> to vector<8x8x88xf32>
    %383 = arith.maximumf %381, %382 : vector<8x8x88xf32>
    %384 = arith.addf %363, %383 : vector<8x8x88xf32>
    %cst_46 = arith.constant 0.000000e+00 : f32
    %385 = vector.broadcast %cst_46 : f32 to vector<8x8x88xf32>
    %386 = arith.maximumf %384, %385 : vector<8x8x88xf32>
    %c3_47 = arith.constant 3 : index
    %c3_48 = arith.constant 3 : index
    %c0_49 = arith.constant 0 : index
    %387 = vector.load %arg5[%c3_47, %c3_48, %c0_49] : memref<14x14x88xf32, #tpu.memory_space<vmem>>, vector<8x8x88xf32>
    tpu.vector_store %arg5[%c3_47, %c3_48, %c0_49], %386 {strides = array<i32>} : memref<14x14x88xf32, #tpu.memory_space<vmem>>, vector<8x8x88xf32>,
    %c1_50 = arith.constant 1 : index
    %c0_51 = arith.constant 0 : index
    %c0_52 = arith.constant 0 : index
    %c0_53 = arith.constant 0 : index
    %388 = vector.load %arg2[%c1_50, %c0_51, %c0_52, %c0_53] : memref<2x7x7x88xf32, #tpu.memory_space<vmem>>, vector<1x7x7x88xf32>
    %389 = vector.shape_cast %388 : vector<1x7x7x88xf32> to vector<7x7x88xf32>
    %c0_54 = arith.constant 0 : index
    %c0_55 = arith.constant 0 : index
    %c0_56 = arith.constant 0 : index
    %390 = vector.load %arg5[%c0_54, %c0_55, %c0_56] : memref<14x14x88xf32, #tpu.memory_space<vmem>>, vector<14x8x88xf32>
    %391 = vector.extract_strided_slice %389 {offsets = [0, 0, 0], sizes = [1, 1, 88], strides = [1, 1, 1]} : vector<7x7x88xf32> to vector<1x1x88xf32>
    %392 = vector.shape_cast %391 : vector<1x1x88xf32> to vector<88xf32>
    %393 = vector.shape_cast %392 : vector<88xf32> to vector<1x1x88xf32>
    %394 = vector.extract_strided_slice %390 {offsets = [0, 0, 0], sizes = [8, 8, 88], strides = [1, 1, 1]} : vector<14x8x88xf32> to vector<8x8x88xf32>
    %395 = vector.broadcast %393 : vector<1x1x88xf32> to vector<8x8x88xf32>
    %396 = arith.mulf %394, %395 : vector<8x8x88xf32>
    %397 = vector.extract_strided_slice %389 {offsets = [1, 0, 0], sizes = [1, 1, 88], strides = [1, 1, 1]} : vector<7x7x88xf32> to vector<1x1x88xf32>
    %398 = vector.shape_cast %397 : vector<1x1x88xf32> to vector<88xf32>
    %399 = vector.shape_cast %398 : vector<88xf32> to vector<1x1x88xf32>
    %400 = vector.extract_strided_slice %390 {offsets = [1, 0, 0], sizes = [8, 8, 88], strides = [1, 1, 1]} : vector<14x8x88xf32> to vector<8x8x88xf32>
    %401 = vector.broadcast %399 : vector<1x1x88xf32> to vector<8x8x88xf32>
    %402 = arith.mulf %400, %401 : vector<8x8x88xf32>
    %403 = arith.addf %396, %402 : vector<8x8x88xf32>
    %404 = vector.extract_strided_slice %389 {offsets = [2, 0, 0], sizes = [1, 1, 88], strides = [1, 1, 1]} : vector<7x7x88xf32> to vector<1x1x88xf32>
    %405 = vector.shape_cast %404 : vector<1x1x88xf32> to vector<88xf32>
    %406 = vector.shape_cast %405 : vector<88xf32> to vector<1x1x88xf32>
    %407 = vector.extract_strided_slice %390 {offsets = [2, 0, 0], sizes = [8, 8, 88], strides = [1, 1, 1]} : vector<14x8x88xf32> to vector<8x8x88xf32>
    %408 = vector.broadcast %406 : vector<1x1x88xf32> to vector<8x8x88xf32>
    %409 = arith.mulf %407, %408 : vector<8x8x88xf32>
    %410 = arith.addf %403, %409 : vector<8x8x88xf32>
    %411 = vector.extract_strided_slice %389 {offsets = [3, 0, 0], sizes = [1, 1, 88], strides = [1, 1, 1]} : vector<7x7x88xf32> to vector<1x1x88xf32>
    %412 = vector.shape_cast %411 : vector<1x1x88xf32> to vector<88xf32>
    %413 = vector.shape_cast %412 : vector<88xf32> to vector<1x1x88xf32>
    %414 = vector.extract_strided_slice %390 {offsets = [3, 0, 0], sizes = [8, 8, 88], strides = [1, 1, 1]} : vector<14x8x88xf32> to vector<8x8x88xf32>
    %415 = vector.broadcast %413 : vector<1x1x88xf32> to vector<8x8x88xf32>
    %416 = arith.mulf %414, %415 : vector<8x8x88xf32>
    %417 = arith.addf %410, %416 : vector<8x8x88xf32>
    %418 = vector.extract_strided_slice %389 {offsets = [4, 0, 0], sizes = [1, 1, 88], strides = [1, 1, 1]} : vector<7x7x88xf32> to vector<1x1x88xf32>
    %419 = vector.shape_cast %418 : vector<1x1x88xf32> to vector<88xf32>
    %420 = vector.shape_cast %419 : vector<88xf32> to vector<1x1x88xf32>
    %421 = vector.extract_strided_slice %390 {offsets = [4, 0, 0], sizes = [8, 8, 88], strides = [1, 1, 1]} : vector<14x8x88xf32> to vector<8x8x88xf32>
    %422 = vector.broadcast %420 : vector<1x1x88xf32> to vector<8x8x88xf32>
    %423 = arith.mulf %421, %422 : vector<8x8x88xf32>
    %424 = arith.addf %417, %423 : vector<8x8x88xf32>
    %425 = vector.extract_strided_slice %389 {offsets = [5, 0, 0], sizes = [1, 1, 88], strides = [1, 1, 1]} : vector<7x7x88xf32> to vector<1x1x88xf32>
    %426 = vector.shape_cast %425 : vector<1x1x88xf32> to vector<88xf32>
    %427 = vector.shape_cast %426 : vector<88xf32> to vector<1x1x88xf32>
    %428 = vector.extract_strided_slice %390 {offsets = [5, 0, 0], sizes = [8, 8, 88], strides = [1, 1, 1]} : vector<14x8x88xf32> to vector<8x8x88xf32>
    %429 = vector.broadcast %427 : vector<1x1x88xf32> to vector<8x8x88xf32>
    %430 = arith.mulf %428, %429 : vector<8x8x88xf32>
    %431 = arith.addf %424, %430 : vector<8x8x88xf32>
    %432 = vector.extract_strided_slice %389 {offsets = [6, 0, 0], sizes = [1, 1, 88], strides = [1, 1, 1]} : vector<7x7x88xf32> to vector<1x1x88xf32>
    %433 = vector.shape_cast %432 : vector<1x1x88xf32> to vector<88xf32>
    %434 = vector.shape_cast %433 : vector<88xf32> to vector<1x1x88xf32>
    %435 = vector.extract_strided_slice %390 {offsets = [6, 0, 0], sizes = [8, 8, 88], strides = [1, 1, 1]} : vector<14x8x88xf32> to vector<8x8x88xf32>
    %436 = vector.broadcast %434 : vector<1x1x88xf32> to vector<8x8x88xf32>
    %437 = arith.mulf %435, %436 : vector<8x8x88xf32>
    %438 = arith.addf %431, %437 : vector<8x8x88xf32>
    %c0_57 = arith.constant 0 : index
    %c1_58 = arith.constant 1 : index
    %c0_59 = arith.constant 0 : index
    %439 = vector.load %arg5[%c0_57, %c1_58, %c0_59] : memref<14x14x88xf32, #tpu.memory_space<vmem>>, vector<14x8x88xf32>
    %440 = vector.extract_strided_slice %389 {offsets = [0, 1, 0], sizes = [1, 1, 88], strides = [1, 1, 1]} : vector<7x7x88xf32> to vector<1x1x88xf32>
    %441 = vector.shape_cast %440 : vector<1x1x88xf32> to vector<88xf32>
    %442 = vector.shape_cast %441 : vector<88xf32> to vector<1x1x88xf32>
    %443 = vector.extract_strided_slice %439 {offsets = [0, 0, 0], sizes = [8, 8, 88], strides = [1, 1, 1]} : vector<14x8x88xf32> to vector<8x8x88xf32>
    %444 = vector.broadcast %442 : vector<1x1x88xf32> to vector<8x8x88xf32>
    %445 = arith.mulf %443, %444 : vector<8x8x88xf32>
    %446 = arith.addf %438, %445 : vector<8x8x88xf32>
    %447 = vector.extract_strided_slice %389 {offsets = [1, 1, 0], sizes = [1, 1, 88], strides = [1, 1, 1]} : vector<7x7x88xf32> to vector<1x1x88xf32>
    %448 = vector.shape_cast %447 : vector<1x1x88xf32> to vector<88xf32>
    %449 = vector.shape_cast %448 : vector<88xf32> to vector<1x1x88xf32>
    %450 = vector.extract_strided_slice %439 {offsets = [1, 0, 0], sizes = [8, 8, 88], strides = [1, 1, 1]} : vector<14x8x88xf32> to vector<8x8x88xf32>
    %451 = vector.broadcast %449 : vector<1x1x88xf32> to vector<8x8x88xf32>
    %452 = arith.mulf %450, %451 : vector<8x8x88xf32>
    %453 = arith.addf %446, %452 : vector<8x8x88xf32>
    %454 = vector.extract_strided_slice %389 {offsets = [2, 1, 0], sizes = [1, 1, 88], strides = [1, 1, 1]} : vector<7x7x88xf32> to vector<1x1x88xf32>
    %455 = vector.shape_cast %454 : vector<1x1x88xf32> to vector<88xf32>
    %456 = vector.shape_cast %455 : vector<88xf32> to vector<1x1x88xf32>
    %457 = vector.extract_strided_slice %439 {offsets = [2, 0, 0], sizes = [8, 8, 88], strides = [1, 1, 1]} : vector<14x8x88xf32> to vector<8x8x88xf32>
    %458 = vector.broadcast %456 : vector<1x1x88xf32> to vector<8x8x88xf32>
    %459 = arith.mulf %457, %458 : vector<8x8x88xf32>
    %460 = arith.addf %453, %459 : vector<8x8x88xf32>
    %461 = vector.extract_strided_slice %389 {offsets = [3, 1, 0], sizes = [1, 1, 88], strides = [1, 1, 1]} : vector<7x7x88xf32> to vector<1x1x88xf32>
    %462 = vector.shape_cast %461 : vector<1x1x88xf32> to vector<88xf32>
    %463 = vector.shape_cast %462 : vector<88xf32> to vector<1x1x88xf32>
    %464 = vector.extract_strided_slice %439 {offsets = [3, 0, 0], sizes = [8, 8, 88], strides = [1, 1, 1]} : vector<14x8x88xf32> to vector<8x8x88xf32>
    %465 = vector.broadcast %463 : vector<1x1x88xf32> to vector<8x8x88xf32>
    %466 = arith.mulf %464, %465 : vector<8x8x88xf32>
    %467 = arith.addf %460, %466 : vector<8x8x88xf32>
    %468 = vector.extract_strided_slice %389 {offsets = [4, 1, 0], sizes = [1, 1, 88], strides = [1, 1, 1]} : vector<7x7x88xf32> to vector<1x1x88xf32>
    %469 = vector.shape_cast %468 : vector<1x1x88xf32> to vector<88xf32>
    %470 = vector.shape_cast %469 : vector<88xf32> to vector<1x1x88xf32>
    %471 = vector.extract_strided_slice %439 {offsets = [4, 0, 0], sizes = [8, 8, 88], strides = [1, 1, 1]} : vector<14x8x88xf32> to vector<8x8x88xf32>
    %472 = vector.broadcast %470 : vector<1x1x88xf32> to vector<8x8x88xf32>
    %473 = arith.mulf %471, %472 : vector<8x8x88xf32>
    %474 = arith.addf %467, %473 : vector<8x8x88xf32>
    %475 = vector.extract_strided_slice %389 {offsets = [5, 1, 0], sizes = [1, 1, 88], strides = [1, 1, 1]} : vector<7x7x88xf32> to vector<1x1x88xf32>
    %476 = vector.shape_cast %475 : vector<1x1x88xf32> to vector<88xf32>
    %477 = vector.shape_cast %476 : vector<88xf32> to vector<1x1x88xf32>
    %478 = vector.extract_strided_slice %439 {offsets = [5, 0, 0], sizes = [8, 8, 88], strides = [1, 1, 1]} : vector<14x8x88xf32> to vector<8x8x88xf32>
    %479 = vector.broadcast %477 : vector<1x1x88xf32> to vector<8x8x88xf32>
    %480 = arith.mulf %478, %479 : vector<8x8x88xf32>
    %481 = arith.addf %474, %480 : vector<8x8x88xf32>
    %482 = vector.extract_strided_slice %389 {offsets = [6, 1, 0], sizes = [1, 1, 88], strides = [1, 1, 1]} : vector<7x7x88xf32> to vector<1x1x88xf32>
    %483 = vector.shape_cast %482 : vector<1x1x88xf32> to vector<88xf32>
    %484 = vector.shape_cast %483 : vector<88xf32> to vector<1x1x88xf32>
    %485 = vector.extract_strided_slice %439 {offsets = [6, 0, 0], sizes = [8, 8, 88], strides = [1, 1, 1]} : vector<14x8x88xf32> to vector<8x8x88xf32>
    %486 = vector.broadcast %484 : vector<1x1x88xf32> to vector<8x8x88xf32>
    %487 = arith.mulf %485, %486 : vector<8x8x88xf32>
    %488 = arith.addf %481, %487 : vector<8x8x88xf32>
    %c0_60 = arith.constant 0 : index
    %c2_61 = arith.constant 2 : index
    %c0_62 = arith.constant 0 : index
    %489 = vector.load %arg5[%c0_60, %c2_61, %c0_62] : memref<14x14x88xf32, #tpu.memory_space<vmem>>, vector<14x8x88xf32>
    %490 = vector.extract_strided_slice %389 {offsets = [0, 2, 0], sizes = [1, 1, 88], strides = [1, 1, 1]} : vector<7x7x88xf32> to vector<1x1x88xf32>
    %491 = vector.shape_cast %490 : vector<1x1x88xf32> to vector<88xf32>
    %492 = vector.shape_cast %491 : vector<88xf32> to vector<1x1x88xf32>
    %493 = vector.extract_strided_slice %489 {offsets = [0, 0, 0], sizes = [8, 8, 88], strides = [1, 1, 1]} : vector<14x8x88xf32> to vector<8x8x88xf32>
    %494 = vector.broadcast %492 : vector<1x1x88xf32> to vector<8x8x88xf32>
    %495 = arith.mulf %493, %494 : vector<8x8x88xf32>
    %496 = arith.addf %488, %495 : vector<8x8x88xf32>
    %497 = vector.extract_strided_slice %389 {offsets = [1, 2, 0], sizes = [1, 1, 88], strides = [1, 1, 1]} : vector<7x7x88xf32> to vector<1x1x88xf32>
    %498 = vector.shape_cast %497 : vector<1x1x88xf32> to vector<88xf32>
    %499 = vector.shape_cast %498 : vector<88xf32> to vector<1x1x88xf32>
    %500 = vector.extract_strided_slice %489 {offsets = [1, 0, 0], sizes = [8, 8, 88], strides = [1, 1, 1]} : vector<14x8x88xf32> to vector<8x8x88xf32>
    %501 = vector.broadcast %499 : vector<1x1x88xf32> to vector<8x8x88xf32>
    %502 = arith.mulf %500, %501 : vector<8x8x88xf32>
    %503 = arith.addf %496, %502 : vector<8x8x88xf32>
    %504 = vector.extract_strided_slice %389 {offsets = [2, 2, 0], sizes = [1, 1, 88], strides = [1, 1, 1]} : vector<7x7x88xf32> to vector<1x1x88xf32>
    %505 = vector.shape_cast %504 : vector<1x1x88xf32> to vector<88xf32>
    %506 = vector.shape_cast %505 : vector<88xf32> to vector<1x1x88xf32>
    %507 = vector.extract_strided_slice %489 {offsets = [2, 0, 0], sizes = [8, 8, 88], strides = [1, 1, 1]} : vector<14x8x88xf32> to vector<8x8x88xf32>
    %508 = vector.broadcast %506 : vector<1x1x88xf32> to vector<8x8x88xf32>
    %509 = arith.mulf %507, %508 : vector<8x8x88xf32>
    %510 = arith.addf %503, %509 : vector<8x8x88xf32>
    %511 = vector.extract_strided_slice %389 {offsets = [3, 2, 0], sizes = [1, 1, 88], strides = [1, 1, 1]} : vector<7x7x88xf32> to vector<1x1x88xf32>
    %512 = vector.shape_cast %511 : vector<1x1x88xf32> to vector<88xf32>
    %513 = vector.shape_cast %512 : vector<88xf32> to vector<1x1x88xf32>
    %514 = vector.extract_strided_slice %489 {offsets = [3, 0, 0], sizes = [8, 8, 88], strides = [1, 1, 1]} : vector<14x8x88xf32> to vector<8x8x88xf32>
    %515 = vector.broadcast %513 : vector<1x1x88xf32> to vector<8x8x88xf32>
    %516 = arith.mulf %514, %515 : vector<8x8x88xf32>
    %517 = arith.addf %510, %516 : vector<8x8x88xf32>
    %518 = vector.extract_strided_slice %389 {offsets = [4, 2, 0], sizes = [1, 1, 88], strides = [1, 1, 1]} : vector<7x7x88xf32> to vector<1x1x88xf32>
    %519 = vector.shape_cast %518 : vector<1x1x88xf32> to vector<88xf32>
    %520 = vector.shape_cast %519 : vector<88xf32> to vector<1x1x88xf32>
    %521 = vector.extract_strided_slice %489 {offsets = [4, 0, 0], sizes = [8, 8, 88], strides = [1, 1, 1]} : vector<14x8x88xf32> to vector<8x8x88xf32>
    %522 = vector.broadcast %520 : vector<1x1x88xf32> to vector<8x8x88xf32>
    %523 = arith.mulf %521, %522 : vector<8x8x88xf32>
    %524 = arith.addf %517, %523 : vector<8x8x88xf32>
    %525 = vector.extract_strided_slice %389 {offsets = [5, 2, 0], sizes = [1, 1, 88], strides = [1, 1, 1]} : vector<7x7x88xf32> to vector<1x1x88xf32>
    %526 = vector.shape_cast %525 : vector<1x1x88xf32> to vector<88xf32>
    %527 = vector.shape_cast %526 : vector<88xf32> to vector<1x1x88xf32>
    %528 = vector.extract_strided_slice %489 {offsets = [5, 0, 0], sizes = [8, 8, 88], strides = [1, 1, 1]} : vector<14x8x88xf32> to vector<8x8x88xf32>
    %529 = vector.broadcast %527 : vector<1x1x88xf32> to vector<8x8x88xf32>
    %530 = arith.mulf %528, %529 : vector<8x8x88xf32>
    %531 = arith.addf %524, %530 : vector<8x8x88xf32>
    %532 = vector.extract_strided_slice %389 {offsets = [6, 2, 0], sizes = [1, 1, 88], strides = [1, 1, 1]} : vector<7x7x88xf32> to vector<1x1x88xf32>
    %533 = vector.shape_cast %532 : vector<1x1x88xf32> to vector<88xf32>
    %534 = vector.shape_cast %533 : vector<88xf32> to vector<1x1x88xf32>
    %535 = vector.extract_strided_slice %489 {offsets = [6, 0, 0], sizes = [8, 8, 88], strides = [1, 1, 1]} : vector<14x8x88xf32> to vector<8x8x88xf32>
    %536 = vector.broadcast %534 : vector<1x1x88xf32> to vector<8x8x88xf32>
    %537 = arith.mulf %535, %536 : vector<8x8x88xf32>
    %538 = arith.addf %531, %537 : vector<8x8x88xf32>
    %539 = vector.extract_strided_slice %489 {offsets = [2, 0, 0], sizes = [8, 8, 88], strides = [1, 1, 1]} : vector<14x8x88xf32> to vector<8x8x88xf32>
    %540 = vector.extract_strided_slice %489 {offsets = [3, 0, 0], sizes = [8, 8, 88], strides = [1, 1, 1]} : vector<14x8x88xf32> to vector<8x8x88xf32>
    %541 = arith.maximumf %539, %540 : vector<8x8x88xf32>
    %542 = vector.extract_strided_slice %489 {offsets = [4, 0, 0], sizes = [8, 8, 88], strides = [1, 1, 1]} : vector<14x8x88xf32> to vector<8x8x88xf32>
    %543 = arith.maximumf %541, %542 : vector<8x8x88xf32>
    %c0_63 = arith.constant 0 : index
    %c3_64 = arith.constant 3 : index
    %c0_65 = arith.constant 0 : index
    %544 = vector.load %arg5[%c0_63, %c3_64, %c0_65] : memref<14x14x88xf32, #tpu.memory_space<vmem>>, vector<14x8x88xf32>
    %545 = vector.extract_strided_slice %389 {offsets = [0, 3, 0], sizes = [1, 1, 88], strides = [1, 1, 1]} : vector<7x7x88xf32> to vector<1x1x88xf32>
    %546 = vector.shape_cast %545 : vector<1x1x88xf32> to vector<88xf32>
    %547 = vector.shape_cast %546 : vector<88xf32> to vector<1x1x88xf32>
    %548 = vector.extract_strided_slice %544 {offsets = [0, 0, 0], sizes = [8, 8, 88], strides = [1, 1, 1]} : vector<14x8x88xf32> to vector<8x8x88xf32>
    %549 = vector.broadcast %547 : vector<1x1x88xf32> to vector<8x8x88xf32>
    %550 = arith.mulf %548, %549 : vector<8x8x88xf32>
    %551 = arith.addf %538, %550 : vector<8x8x88xf32>
    %552 = vector.extract_strided_slice %389 {offsets = [1, 3, 0], sizes = [1, 1, 88], strides = [1, 1, 1]} : vector<7x7x88xf32> to vector<1x1x88xf32>
    %553 = vector.shape_cast %552 : vector<1x1x88xf32> to vector<88xf32>
    %554 = vector.shape_cast %553 : vector<88xf32> to vector<1x1x88xf32>
    %555 = vector.extract_strided_slice %544 {offsets = [1, 0, 0], sizes = [8, 8, 88], strides = [1, 1, 1]} : vector<14x8x88xf32> to vector<8x8x88xf32>
    %556 = vector.broadcast %554 : vector<1x1x88xf32> to vector<8x8x88xf32>
    %557 = arith.mulf %555, %556 : vector<8x8x88xf32>
    %558 = arith.addf %551, %557 : vector<8x8x88xf32>
    %559 = vector.extract_strided_slice %389 {offsets = [2, 3, 0], sizes = [1, 1, 88], strides = [1, 1, 1]} : vector<7x7x88xf32> to vector<1x1x88xf32>
    %560 = vector.shape_cast %559 : vector<1x1x88xf32> to vector<88xf32>
    %561 = vector.shape_cast %560 : vector<88xf32> to vector<1x1x88xf32>
    %562 = vector.extract_strided_slice %544 {offsets = [2, 0, 0], sizes = [8, 8, 88], strides = [1, 1, 1]} : vector<14x8x88xf32> to vector<8x8x88xf32>
    %563 = vector.broadcast %561 : vector<1x1x88xf32> to vector<8x8x88xf32>
    %564 = arith.mulf %562, %563 : vector<8x8x88xf32>
    %565 = arith.addf %558, %564 : vector<8x8x88xf32>
    %566 = vector.extract_strided_slice %389 {offsets = [3, 3, 0], sizes = [1, 1, 88], strides = [1, 1, 1]} : vector<7x7x88xf32> to vector<1x1x88xf32>
    %567 = vector.shape_cast %566 : vector<1x1x88xf32> to vector<88xf32>
    %568 = vector.shape_cast %567 : vector<88xf32> to vector<1x1x88xf32>
    %569 = vector.extract_strided_slice %544 {offsets = [3, 0, 0], sizes = [8, 8, 88], strides = [1, 1, 1]} : vector<14x8x88xf32> to vector<8x8x88xf32>
    %570 = vector.broadcast %568 : vector<1x1x88xf32> to vector<8x8x88xf32>
    %571 = arith.mulf %569, %570 : vector<8x8x88xf32>
    %572 = arith.addf %565, %571 : vector<8x8x88xf32>
    %573 = vector.extract_strided_slice %389 {offsets = [4, 3, 0], sizes = [1, 1, 88], strides = [1, 1, 1]} : vector<7x7x88xf32> to vector<1x1x88xf32>
    %574 = vector.shape_cast %573 : vector<1x1x88xf32> to vector<88xf32>
    %575 = vector.shape_cast %574 : vector<88xf32> to vector<1x1x88xf32>
    %576 = vector.extract_strided_slice %544 {offsets = [4, 0, 0], sizes = [8, 8, 88], strides = [1, 1, 1]} : vector<14x8x88xf32> to vector<8x8x88xf32>
    %577 = vector.broadcast %575 : vector<1x1x88xf32> to vector<8x8x88xf32>
    %578 = arith.mulf %576, %577 : vector<8x8x88xf32>
    %579 = arith.addf %572, %578 : vector<8x8x88xf32>
    %580 = vector.extract_strided_slice %389 {offsets = [5, 3, 0], sizes = [1, 1, 88], strides = [1, 1, 1]} : vector<7x7x88xf32> to vector<1x1x88xf32>
    %581 = vector.shape_cast %580 : vector<1x1x88xf32> to vector<88xf32>
    %582 = vector.shape_cast %581 : vector<88xf32> to vector<1x1x88xf32>
    %583 = vector.extract_strided_slice %544 {offsets = [5, 0, 0], sizes = [8, 8, 88], strides = [1, 1, 1]} : vector<14x8x88xf32> to vector<8x8x88xf32>
    %584 = vector.broadcast %582 : vector<1x1x88xf32> to vector<8x8x88xf32>
    %585 = arith.mulf %583, %584 : vector<8x8x88xf32>
    %586 = arith.addf %579, %585 : vector<8x8x88xf32>
    %587 = vector.extract_strided_slice %389 {offsets = [6, 3, 0], sizes = [1, 1, 88], strides = [1, 1, 1]} : vector<7x7x88xf32> to vector<1x1x88xf32>
    %588 = vector.shape_cast %587 : vector<1x1x88xf32> to vector<88xf32>
    %589 = vector.shape_cast %588 : vector<88xf32> to vector<1x1x88xf32>
    %590 = vector.extract_strided_slice %544 {offsets = [6, 0, 0], sizes = [8, 8, 88], strides = [1, 1, 1]} : vector<14x8x88xf32> to vector<8x8x88xf32>
    %591 = vector.broadcast %589 : vector<1x1x88xf32> to vector<8x8x88xf32>
    %592 = arith.mulf %590, %591 : vector<8x8x88xf32>
    %593 = arith.addf %586, %592 : vector<8x8x88xf32>
    %594 = vector.extract_strided_slice %544 {offsets = [2, 0, 0], sizes = [8, 8, 88], strides = [1, 1, 1]} : vector<14x8x88xf32> to vector<8x8x88xf32>
    %595 = arith.maximumf %543, %594 : vector<8x8x88xf32>
    %596 = vector.extract_strided_slice %544 {offsets = [3, 0, 0], sizes = [8, 8, 88], strides = [1, 1, 1]} : vector<14x8x88xf32> to vector<8x8x88xf32>
    %597 = arith.maximumf %595, %596 : vector<8x8x88xf32>
    %598 = vector.extract_strided_slice %544 {offsets = [4, 0, 0], sizes = [8, 8, 88], strides = [1, 1, 1]} : vector<14x8x88xf32> to vector<8x8x88xf32>
    %599 = arith.maximumf %597, %598 : vector<8x8x88xf32>
    %c0_66 = arith.constant 0 : index
    %c4_67 = arith.constant 4 : index
    %c0_68 = arith.constant 0 : index
    %600 = vector.load %arg5[%c0_66, %c4_67, %c0_68] : memref<14x14x88xf32, #tpu.memory_space<vmem>>, vector<14x8x88xf32>
    %601 = vector.extract_strided_slice %389 {offsets = [0, 4, 0], sizes = [1, 1, 88], strides = [1, 1, 1]} : vector<7x7x88xf32> to vector<1x1x88xf32>
    %602 = vector.shape_cast %601 : vector<1x1x88xf32> to vector<88xf32>
    %603 = vector.shape_cast %602 : vector<88xf32> to vector<1x1x88xf32>
    %604 = vector.extract_strided_slice %600 {offsets = [0, 0, 0], sizes = [8, 8, 88], strides = [1, 1, 1]} : vector<14x8x88xf32> to vector<8x8x88xf32>
    %605 = vector.broadcast %603 : vector<1x1x88xf32> to vector<8x8x88xf32>
    %606 = arith.mulf %604, %605 : vector<8x8x88xf32>
    %607 = arith.addf %593, %606 : vector<8x8x88xf32>
    %608 = vector.extract_strided_slice %389 {offsets = [1, 4, 0], sizes = [1, 1, 88], strides = [1, 1, 1]} : vector<7x7x88xf32> to vector<1x1x88xf32>
    %609 = vector.shape_cast %608 : vector<1x1x88xf32> to vector<88xf32>
    %610 = vector.shape_cast %609 : vector<88xf32> to vector<1x1x88xf32>
    %611 = vector.extract_strided_slice %600 {offsets = [1, 0, 0], sizes = [8, 8, 88], strides = [1, 1, 1]} : vector<14x8x88xf32> to vector<8x8x88xf32>
    %612 = vector.broadcast %610 : vector<1x1x88xf32> to vector<8x8x88xf32>
    %613 = arith.mulf %611, %612 : vector<8x8x88xf32>
    %614 = arith.addf %607, %613 : vector<8x8x88xf32>
    %615 = vector.extract_strided_slice %389 {offsets = [2, 4, 0], sizes = [1, 1, 88], strides = [1, 1, 1]} : vector<7x7x88xf32> to vector<1x1x88xf32>
    %616 = vector.shape_cast %615 : vector<1x1x88xf32> to vector<88xf32>
    %617 = vector.shape_cast %616 : vector<88xf32> to vector<1x1x88xf32>
    %618 = vector.extract_strided_slice %600 {offsets = [2, 0, 0], sizes = [8, 8, 88], strides = [1, 1, 1]} : vector<14x8x88xf32> to vector<8x8x88xf32>
    %619 = vector.broadcast %617 : vector<1x1x88xf32> to vector<8x8x88xf32>
    %620 = arith.mulf %618, %619 : vector<8x8x88xf32>
    %621 = arith.addf %614, %620 : vector<8x8x88xf32>
    %622 = vector.extract_strided_slice %389 {offsets = [3, 4, 0], sizes = [1, 1, 88], strides = [1, 1, 1]} : vector<7x7x88xf32> to vector<1x1x88xf32>
    %623 = vector.shape_cast %622 : vector<1x1x88xf32> to vector<88xf32>
    %624 = vector.shape_cast %623 : vector<88xf32> to vector<1x1x88xf32>
    %625 = vector.extract_strided_slice %600 {offsets = [3, 0, 0], sizes = [8, 8, 88], strides = [1, 1, 1]} : vector<14x8x88xf32> to vector<8x8x88xf32>
    %626 = vector.broadcast %624 : vector<1x1x88xf32> to vector<8x8x88xf32>
    %627 = arith.mulf %625, %626 : vector<8x8x88xf32>
    %628 = arith.addf %621, %627 : vector<8x8x88xf32>
    %629 = vector.extract_strided_slice %389 {offsets = [4, 4, 0], sizes = [1, 1, 88], strides = [1, 1, 1]} : vector<7x7x88xf32> to vector<1x1x88xf32>
    %630 = vector.shape_cast %629 : vector<1x1x88xf32> to vector<88xf32>
    %631 = vector.shape_cast %630 : vector<88xf32> to vector<1x1x88xf32>
    %632 = vector.extract_strided_slice %600 {offsets = [4, 0, 0], sizes = [8, 8, 88], strides = [1, 1, 1]} : vector<14x8x88xf32> to vector<8x8x88xf32>
    %633 = vector.broadcast %631 : vector<1x1x88xf32> to vector<8x8x88xf32>
    %634 = arith.mulf %632, %633 : vector<8x8x88xf32>
    %635 = arith.addf %628, %634 : vector<8x8x88xf32>
    %636 = vector.extract_strided_slice %389 {offsets = [5, 4, 0], sizes = [1, 1, 88], strides = [1, 1, 1]} : vector<7x7x88xf32> to vector<1x1x88xf32>
    %637 = vector.shape_cast %636 : vector<1x1x88xf32> to vector<88xf32>
    %638 = vector.shape_cast %637 : vector<88xf32> to vector<1x1x88xf32>
    %639 = vector.extract_strided_slice %600 {offsets = [5, 0, 0], sizes = [8, 8, 88], strides = [1, 1, 1]} : vector<14x8x88xf32> to vector<8x8x88xf32>
    %640 = vector.broadcast %638 : vector<1x1x88xf32> to vector<8x8x88xf32>
    %641 = arith.mulf %639, %640 : vector<8x8x88xf32>
    %642 = arith.addf %635, %641 : vector<8x8x88xf32>
    %643 = vector.extract_strided_slice %389 {offsets = [6, 4, 0], sizes = [1, 1, 88], strides = [1, 1, 1]} : vector<7x7x88xf32> to vector<1x1x88xf32>
    %644 = vector.shape_cast %643 : vector<1x1x88xf32> to vector<88xf32>
    %645 = vector.shape_cast %644 : vector<88xf32> to vector<1x1x88xf32>
    %646 = vector.extract_strided_slice %600 {offsets = [6, 0, 0], sizes = [8, 8, 88], strides = [1, 1, 1]} : vector<14x8x88xf32> to vector<8x8x88xf32>
    %647 = vector.broadcast %645 : vector<1x1x88xf32> to vector<8x8x88xf32>
    %648 = arith.mulf %646, %647 : vector<8x8x88xf32>
    %649 = arith.addf %642, %648 : vector<8x8x88xf32>
    %650 = vector.extract_strided_slice %600 {offsets = [2, 0, 0], sizes = [8, 8, 88], strides = [1, 1, 1]} : vector<14x8x88xf32> to vector<8x8x88xf32>
    %651 = arith.maximumf %599, %650 : vector<8x8x88xf32>
    %652 = vector.extract_strided_slice %600 {offsets = [3, 0, 0], sizes = [8, 8, 88], strides = [1, 1, 1]} : vector<14x8x88xf32> to vector<8x8x88xf32>
    %653 = arith.maximumf %651, %652 : vector<8x8x88xf32>
    %654 = vector.extract_strided_slice %600 {offsets = [4, 0, 0], sizes = [8, 8, 88], strides = [1, 1, 1]} : vector<14x8x88xf32> to vector<8x8x88xf32>
    %655 = arith.maximumf %653, %654 : vector<8x8x88xf32>
    %c0_69 = arith.constant 0 : index
    %c5_70 = arith.constant 5 : index
    %c0_71 = arith.constant 0 : index
    %656 = vector.load %arg5[%c0_69, %c5_70, %c0_71] : memref<14x14x88xf32, #tpu.memory_space<vmem>>, vector<14x8x88xf32>
    %657 = vector.extract_strided_slice %389 {offsets = [0, 5, 0], sizes = [1, 1, 88], strides = [1, 1, 1]} : vector<7x7x88xf32> to vector<1x1x88xf32>
    %658 = vector.shape_cast %657 : vector<1x1x88xf32> to vector<88xf32>
    %659 = vector.shape_cast %658 : vector<88xf32> to vector<1x1x88xf32>
    %660 = vector.extract_strided_slice %656 {offsets = [0, 0, 0], sizes = [8, 8, 88], strides = [1, 1, 1]} : vector<14x8x88xf32> to vector<8x8x88xf32>
    %661 = vector.broadcast %659 : vector<1x1x88xf32> to vector<8x8x88xf32>
    %662 = arith.mulf %660, %661 : vector<8x8x88xf32>
    %663 = arith.addf %649, %662 : vector<8x8x88xf32>
    %664 = vector.extract_strided_slice %389 {offsets = [1, 5, 0], sizes = [1, 1, 88], strides = [1, 1, 1]} : vector<7x7x88xf32> to vector<1x1x88xf32>
    %665 = vector.shape_cast %664 : vector<1x1x88xf32> to vector<88xf32>
    %666 = vector.shape_cast %665 : vector<88xf32> to vector<1x1x88xf32>
    %667 = vector.extract_strided_slice %656 {offsets = [1, 0, 0], sizes = [8, 8, 88], strides = [1, 1, 1]} : vector<14x8x88xf32> to vector<8x8x88xf32>
    %668 = vector.broadcast %666 : vector<1x1x88xf32> to vector<8x8x88xf32>
    %669 = arith.mulf %667, %668 : vector<8x8x88xf32>
    %670 = arith.addf %663, %669 : vector<8x8x88xf32>
    %671 = vector.extract_strided_slice %389 {offsets = [2, 5, 0], sizes = [1, 1, 88], strides = [1, 1, 1]} : vector<7x7x88xf32> to vector<1x1x88xf32>
    %672 = vector.shape_cast %671 : vector<1x1x88xf32> to vector<88xf32>
    %673 = vector.shape_cast %672 : vector<88xf32> to vector<1x1x88xf32>
    %674 = vector.extract_strided_slice %656 {offsets = [2, 0, 0], sizes = [8, 8, 88], strides = [1, 1, 1]} : vector<14x8x88xf32> to vector<8x8x88xf32>
    %675 = vector.broadcast %673 : vector<1x1x88xf32> to vector<8x8x88xf32>
    %676 = arith.mulf %674, %675 : vector<8x8x88xf32>
    %677 = arith.addf %670, %676 : vector<8x8x88xf32>
    %678 = vector.extract_strided_slice %389 {offsets = [3, 5, 0], sizes = [1, 1, 88], strides = [1, 1, 1]} : vector<7x7x88xf32> to vector<1x1x88xf32>
    %679 = vector.shape_cast %678 : vector<1x1x88xf32> to vector<88xf32>
    %680 = vector.shape_cast %679 : vector<88xf32> to vector<1x1x88xf32>
    %681 = vector.extract_strided_slice %656 {offsets = [3, 0, 0], sizes = [8, 8, 88], strides = [1, 1, 1]} : vector<14x8x88xf32> to vector<8x8x88xf32>
    %682 = vector.broadcast %680 : vector<1x1x88xf32> to vector<8x8x88xf32>
    %683 = arith.mulf %681, %682 : vector<8x8x88xf32>
    %684 = arith.addf %677, %683 : vector<8x8x88xf32>
    %685 = vector.extract_strided_slice %389 {offsets = [4, 5, 0], sizes = [1, 1, 88], strides = [1, 1, 1]} : vector<7x7x88xf32> to vector<1x1x88xf32>
    %686 = vector.shape_cast %685 : vector<1x1x88xf32> to vector<88xf32>
    %687 = vector.shape_cast %686 : vector<88xf32> to vector<1x1x88xf32>
    %688 = vector.extract_strided_slice %656 {offsets = [4, 0, 0], sizes = [8, 8, 88], strides = [1, 1, 1]} : vector<14x8x88xf32> to vector<8x8x88xf32>
    %689 = vector.broadcast %687 : vector<1x1x88xf32> to vector<8x8x88xf32>
    %690 = arith.mulf %688, %689 : vector<8x8x88xf32>
    %691 = arith.addf %684, %690 : vector<8x8x88xf32>
    %692 = vector.extract_strided_slice %389 {offsets = [5, 5, 0], sizes = [1, 1, 88], strides = [1, 1, 1]} : vector<7x7x88xf32> to vector<1x1x88xf32>
    %693 = vector.shape_cast %692 : vector<1x1x88xf32> to vector<88xf32>
    %694 = vector.shape_cast %693 : vector<88xf32> to vector<1x1x88xf32>
    %695 = vector.extract_strided_slice %656 {offsets = [5, 0, 0], sizes = [8, 8, 88], strides = [1, 1, 1]} : vector<14x8x88xf32> to vector<8x8x88xf32>
    %696 = vector.broadcast %694 : vector<1x1x88xf32> to vector<8x8x88xf32>
    %697 = arith.mulf %695, %696 : vector<8x8x88xf32>
    %698 = arith.addf %691, %697 : vector<8x8x88xf32>
    %699 = vector.extract_strided_slice %389 {offsets = [6, 5, 0], sizes = [1, 1, 88], strides = [1, 1, 1]} : vector<7x7x88xf32> to vector<1x1x88xf32>
    %700 = vector.shape_cast %699 : vector<1x1x88xf32> to vector<88xf32>
    %701 = vector.shape_cast %700 : vector<88xf32> to vector<1x1x88xf32>
    %702 = vector.extract_strided_slice %656 {offsets = [6, 0, 0], sizes = [8, 8, 88], strides = [1, 1, 1]} : vector<14x8x88xf32> to vector<8x8x88xf32>
    %703 = vector.broadcast %701 : vector<1x1x88xf32> to vector<8x8x88xf32>
    %704 = arith.mulf %702, %703 : vector<8x8x88xf32>
    %705 = arith.addf %698, %704 : vector<8x8x88xf32>
    %c0_72 = arith.constant 0 : index
    %c6_73 = arith.constant 6 : index
    %c0_74 = arith.constant 0 : index
    %706 = vector.load %arg5[%c0_72, %c6_73, %c0_74] : memref<14x14x88xf32, #tpu.memory_space<vmem>>, vector<14x8x88xf32>
    %707 = vector.extract_strided_slice %389 {offsets = [0, 6, 0], sizes = [1, 1, 88], strides = [1, 1, 1]} : vector<7x7x88xf32> to vector<1x1x88xf32>
    %708 = vector.shape_cast %707 : vector<1x1x88xf32> to vector<88xf32>
    %709 = vector.shape_cast %708 : vector<88xf32> to vector<1x1x88xf32>
    %710 = vector.extract_strided_slice %706 {offsets = [0, 0, 0], sizes = [8, 8, 88], strides = [1, 1, 1]} : vector<14x8x88xf32> to vector<8x8x88xf32>
    %711 = vector.broadcast %709 : vector<1x1x88xf32> to vector<8x8x88xf32>
    %712 = arith.mulf %710, %711 : vector<8x8x88xf32>
    %713 = arith.addf %705, %712 : vector<8x8x88xf32>
    %714 = vector.extract_strided_slice %389 {offsets = [1, 6, 0], sizes = [1, 1, 88], strides = [1, 1, 1]} : vector<7x7x88xf32> to vector<1x1x88xf32>
    %715 = vector.shape_cast %714 : vector<1x1x88xf32> to vector<88xf32>
    %716 = vector.shape_cast %715 : vector<88xf32> to vector<1x1x88xf32>
    %717 = vector.extract_strided_slice %706 {offsets = [1, 0, 0], sizes = [8, 8, 88], strides = [1, 1, 1]} : vector<14x8x88xf32> to vector<8x8x88xf32>
    %718 = vector.broadcast %716 : vector<1x1x88xf32> to vector<8x8x88xf32>
    %719 = arith.mulf %717, %718 : vector<8x8x88xf32>
    %720 = arith.addf %713, %719 : vector<8x8x88xf32>
    %721 = vector.extract_strided_slice %389 {offsets = [2, 6, 0], sizes = [1, 1, 88], strides = [1, 1, 1]} : vector<7x7x88xf32> to vector<1x1x88xf32>
    %722 = vector.shape_cast %721 : vector<1x1x88xf32> to vector<88xf32>
    %723 = vector.shape_cast %722 : vector<88xf32> to vector<1x1x88xf32>
    %724 = vector.extract_strided_slice %706 {offsets = [2, 0, 0], sizes = [8, 8, 88], strides = [1, 1, 1]} : vector<14x8x88xf32> to vector<8x8x88xf32>
    %725 = vector.broadcast %723 : vector<1x1x88xf32> to vector<8x8x88xf32>
    %726 = arith.mulf %724, %725 : vector<8x8x88xf32>
    %727 = arith.addf %720, %726 : vector<8x8x88xf32>
    %728 = vector.extract_strided_slice %389 {offsets = [3, 6, 0], sizes = [1, 1, 88], strides = [1, 1, 1]} : vector<7x7x88xf32> to vector<1x1x88xf32>
    %729 = vector.shape_cast %728 : vector<1x1x88xf32> to vector<88xf32>
    %730 = vector.shape_cast %729 : vector<88xf32> to vector<1x1x88xf32>
    %731 = vector.extract_strided_slice %706 {offsets = [3, 0, 0], sizes = [8, 8, 88], strides = [1, 1, 1]} : vector<14x8x88xf32> to vector<8x8x88xf32>
    %732 = vector.broadcast %730 : vector<1x1x88xf32> to vector<8x8x88xf32>
    %733 = arith.mulf %731, %732 : vector<8x8x88xf32>
    %734 = arith.addf %727, %733 : vector<8x8x88xf32>
    %735 = vector.extract_strided_slice %389 {offsets = [4, 6, 0], sizes = [1, 1, 88], strides = [1, 1, 1]} : vector<7x7x88xf32> to vector<1x1x88xf32>
    %736 = vector.shape_cast %735 : vector<1x1x88xf32> to vector<88xf32>
    %737 = vector.shape_cast %736 : vector<88xf32> to vector<1x1x88xf32>
    %738 = vector.extract_strided_slice %706 {offsets = [4, 0, 0], sizes = [8, 8, 88], strides = [1, 1, 1]} : vector<14x8x88xf32> to vector<8x8x88xf32>
    %739 = vector.broadcast %737 : vector<1x1x88xf32> to vector<8x8x88xf32>
    %740 = arith.mulf %738, %739 : vector<8x8x88xf32>
    %741 = arith.addf %734, %740 : vector<8x8x88xf32>
    %742 = vector.extract_strided_slice %389 {offsets = [5, 6, 0], sizes = [1, 1, 88], strides = [1, 1, 1]} : vector<7x7x88xf32> to vector<1x1x88xf32>
    %743 = vector.shape_cast %742 : vector<1x1x88xf32> to vector<88xf32>
    %744 = vector.shape_cast %743 : vector<88xf32> to vector<1x1x88xf32>
    %745 = vector.extract_strided_slice %706 {offsets = [5, 0, 0], sizes = [8, 8, 88], strides = [1, 1, 1]} : vector<14x8x88xf32> to vector<8x8x88xf32>
    %746 = vector.broadcast %744 : vector<1x1x88xf32> to vector<8x8x88xf32>
    %747 = arith.mulf %745, %746 : vector<8x8x88xf32>
    %748 = arith.addf %741, %747 : vector<8x8x88xf32>
    %749 = vector.extract_strided_slice %389 {offsets = [6, 6, 0], sizes = [1, 1, 88], strides = [1, 1, 1]} : vector<7x7x88xf32> to vector<1x1x88xf32>
    %750 = vector.shape_cast %749 : vector<1x1x88xf32> to vector<88xf32>
    %751 = vector.shape_cast %750 : vector<88xf32> to vector<1x1x88xf32>
    %752 = vector.extract_strided_slice %706 {offsets = [6, 0, 0], sizes = [8, 8, 88], strides = [1, 1, 1]} : vector<14x8x88xf32> to vector<8x8x88xf32>
    %753 = vector.broadcast %751 : vector<1x1x88xf32> to vector<8x8x88xf32>
    %754 = arith.mulf %752, %753 : vector<8x8x88xf32>
    %755 = arith.addf %748, %754 : vector<8x8x88xf32>
    %c1_75 = arith.constant 1 : index
    %c0_76 = arith.constant 0 : index
    %756 = vector.load %arg3[%c1_75, %c0_76] : memref<2x88xf32, #tpu.memory_space<vmem>>, vector<1x88xf32>
    %757 = vector.shape_cast %756 : vector<1x88xf32> to vector<88xf32>
    %758 = vector.shape_cast %757 : vector<88xf32> to vector<1x1x88xf32>
    %759 = vector.broadcast %758 : vector<1x1x88xf32> to vector<8x8x88xf32>
    %760 = arith.addf %755, %759 : vector<8x8x88xf32>
    %761 = arith.addf %760, %655 : vector<8x8x88xf32>
    %cst_77 = arith.constant 0.000000e+00 : f32
    %762 = vector.broadcast %cst_77 : f32 to vector<8x8x88xf32>
    %763 = arith.maximumf %761, %762 : vector<8x8x88xf32>
    %c0_78 = arith.constant 0 : index
    %c0_79 = arith.constant 0 : index
    %c0_80 = arith.constant 0 : index
    %c0_81 = arith.constant 0 : index
    %764 = vector.load %arg4[%c0_78, %c0_79, %c0_80, %c0_81] : memref<1x8x8x88xf32, #tpu.memory_space<vmem>>, vector<1x8x8x88xf32>
    %765 = vector.shape_cast %764 : vector<1x8x8x88xf32> to vector<8x8x88xf32>
    %766 = vector.shape_cast %763 : vector<8x8x88xf32> to vector<1x8x8x88xf32>
    tpu.vector_store %arg4[%c0_78, %c0_79, %c0_80, %c0_81], %766 {strides = array<i32>} : memref<1x8x8x88xf32, #tpu.memory_space<vmem>>, vector<1x8x8x88xf32>,
    return
  }
  func.func @transform_0(%arg0: i32) -> (i32, i32, i32, i32) {
    %c0_i32 = arith.constant 0 : i32
    %c0_i32_0 = arith.constant 0 : i32
    %c0_i32_1 = arith.constant 0 : i32
    %c0_i32_2 = arith.constant 0 : i32
    return %arg0, %c0_i32, %c0_i32_0, %c0_i32_1 : i32, i32, i32, i32
  }
  func.func @transform_1(%arg0: i32) -> (i32, i32, i32, i32) {
    %c0_i32 = arith.constant 0 : i32
    %c0_i32_0 = arith.constant 0 : i32
    %c0_i32_1 = arith.constant 0 : i32
    %c0_i32_2 = arith.constant 0 : i32
    %c0_i32_3 = arith.constant 0 : i32
    return %c0_i32, %c0_i32_0, %c0_i32_1, %c0_i32_2 : i32, i32, i32, i32
  }
  func.func @transform_2(%arg0: i32) -> (i32, i32) {
    %c0_i32 = arith.constant 0 : i32
    %c0_i32_0 = arith.constant 0 : i32
    %c0_i32_1 = arith.constant 0 : i32
    return %c0_i32, %c0_i32_0 : i32, i32
  }
  func.func @transform_3(%arg0: i32) -> (i32, i32, i32, i32) {
    %c0_i32 = arith.constant 0 : i32
    %c0_i32_0 = arith.constant 0 : i32
    %c0_i32_1 = arith.constant 0 : i32
    %c0_i32_2 = arith.constant 0 : i32
    return %arg0, %c0_i32, %c0_i32_0, %c0_i32_1 : i32, i32, i32, i32
  }
}

</mosaic_0001>

<bundles_post_ra>
// kernel: tpu_custom_call.1
= control target key start
LH: loop header
LB: loop body
LE: loop exit
PB: predicated region body
PF: predicated region fallthrough
CT: control target
= control target key end

     0   :  { %vm23_vm0 = vcmask 719872   ;;  %v113_v0 = vlaneseq  ;;  %v2584_v1 = vmov 0.0   ;;  %vm25_vm1 = vcmask 717824   ;;  %s6072_s0 = inlined_call_operand.vmem [shape: f32[1,8,8,88], index: 0, kind: input, shape index: {}]   ;;  %s6073_s1 = inlined_call_operand.vmem [shape: f32[2,7,7,88], index: 1, kind: input, shape index: {}]   ;;  %s6074_s2 = inlined_call_operand.vmem [shape: f32[2,88], index: 2, kind: input, shape index: {}]   ;;  %s6075_s3 = inlined_call_operand.hbm [shape: f32[1,8,8,88], index: 3, kind: output, shape index: {}]  }
   0x1   :  { %24 = vst.msk [vmem:[#allocation2] sm:$0xff] %vm23_vm0, %v2584_v1  ;;  %27 = vst.msk [vmem:[#allocation2 + $0x10] sm:$0xff] %vm23_vm0, %v2584_v1  ;;  %v2628_v3 = vld [vmem:[%s6073_s1 + $0x38] sm:$0x7f]  ;;  %v2633_v4 = vld [vmem:[%s6073_s1 + $0x40] sm:$0x7f] }
   0x2   :  { %29 = vst.msk [vmem:[#allocation2 + $0x20] sm:$0xff] %vm23_vm0, %v2584_v1  ;;  %31 = vst.msk [vmem:[#allocation2 + $0x30] sm:$0xff] %vm23_vm0, %v2584_v1  ;;  %v2623_v2 = vshrl.u32 %v113_v0, 7  ;;  %v2652_v5 = vld [vmem:[%s6072_s0] sm:$0xff]  ;;  %v2660_v7 = vld [vmem:[%s6073_s1 + $0x48] sm:$0x7f] }
   0x3   :  { %33 = vst.msk [vmem:[#allocation2 + $0x40] sm:$0xff] %vm23_vm0, %v2584_v1  ;;  %35 = vst.msk [vmem:[#allocation2 + $0x50] sm:$0xff] %vm23_vm0, %v2584_v1  ;;  %v2667_v8 = vld [vmem:[%s6072_s0 + $0x8] sm:$0xff]  ;;  %v2672_v9 = vld [vmem:[%s6072_s0 + $0x10] sm:$0xff] }
   0x4   :  { %37 = vst.msk [vmem:[#allocation2 + $0x60] sm:$0xff] %vm23_vm0, %v2584_v1  ;;  %39 = vst.msk [vmem:[#allocation2 + $0x70] sm:$0xff] %vm23_vm0, %v2584_v1  ;;  %v2655_v6 = vsub.s32 0, %v2623_v2  ;;  %v2681_v10 = vld [vmem:[%s6072_s0 + $0x18] sm:$0xff]  ;;  %v2686_v11 = vld [vmem:[%s6072_s0 + $0x20] sm:$0xff]  ;;  %v2771_v36 = vsub.s32 1, %v2623_v2 }
   0x5   :  { %41 = vst.msk [vmem:[#allocation2 + $0x80] sm:$0xff] %vm23_vm0, %v2584_v1  ;;  %43 = vst.msk [vmem:[#allocation2 + $0x90] sm:$0xff] %vm23_vm0, %v2584_v1  ;;  %v2691_v12 = vld [vmem:[%s6072_s0 + $0x28] sm:$0xff]  ;;  %v2696_v13 = vld [vmem:[%s6073_s1] sm:$0x7f]  ;;  %v2774_v37 = vsub.s32 2, %v2623_v2 }
   0x6   :  { %45 = vst.msk [vmem:[#allocation2 + $0xa0] sm:$0xff] %vm23_vm0, %v2584_v1  ;;  %47 = vst.msk [vmem:[#allocation2 + $0xb0] sm:$0xff] %vm23_vm0, %v2584_v1  ;;  %v2700_v14 = vrot.slane %v2628_v3, %v2655_v6  ;;  %v2711_v15 = vld [vmem:[%s6073_s1 + $0x8] sm:$0x7f]  ;;  %v2715_v16 = vrot.slane %v2633_v4, %v2655_v6  ;;  %v2719_v17 = vrot.slane %v2660_v7, %v2655_v6  ;;  %v2724_v18 = vld [vmem:[%s6072_s0 + $0x30] sm:$0xff]  ;;  %v2797_v45 = vsub.s32 3, %v2623_v2 }
   0x7   :  { %49 = vst.msk [vmem:[#allocation2 + $0xc0] sm:$0xff] %vm23_vm0, %v2584_v1  ;;  %51 = vst.msk [vmem:[#allocation2 + $0xd0] sm:$0xff] %vm23_vm0, %v2584_v1  ;;  %v2729_v19 = vld [vmem:[%s6072_s0 + $0x38] sm:$0xff]  ;;  %v2738_v24 = vrot.slane %v2696_v13, %v2655_v6  ;;  %v2743_v26 = vrot.slane %v2711_v15, %v2655_v6  ;;  %v2751_v30 = vld [vmem:[%s6073_s1 + $0x10] sm:$0x7f]  ;;  %v2801_v46 = vrot.slane %v2696_v13, %v2771_v36  ;;  %v2804_v47 = vsub.s32 4, %v2623_v2 }
   0x8   :  { %32 = vst.msk [vmem:[#allocation2 + $0x38] sm:$0x3f] %vm25_vm1, %v2584_v1  ;;  %26 = vst.msk [vmem:[#allocation2 + $0x8] sm:$0x3f] %vm25_vm1, %v2584_v1  ;;  %v99_v20 = vld [vmem:[#allocation2] sm:$0xff]  ;;  %v100_v21 = vld [vmem:[#allocation2 + $0x10] sm:$0xff]  ;;  %v2780_v40 = vrot.slane %v2751_v30, %v2655_v6  ;;  %v2822_v53 = vrot.slane %v2711_v15, %v2771_v36  ;;  %v2826_v54 = vrot.slane %v2751_v30, %v2771_v36 }
   0x9   :  { %28 = vst.msk [vmem:[#allocation2 + $0x18] sm:$0x3f] %vm25_vm1, %v2584_v1  ;;  %30 = vst.msk [vmem:[#allocation2 + $0x28] sm:$0x3f] %vm25_vm1, %v2584_v1  ;;  %v101_v22 = vld [vmem:[#allocation2 + $0x20] sm:$0xff]  ;;  %v1326_v23 = vmul.f32 %v2700_v14, %v99_v20  ;;  %v1327_v25 = vmul.f32 %v2700_v14, %v100_v21  ;;  %v1338_v27 = vmul.f32 %v2715_v16, %v100_v21  ;;  %v2807_v48 = vsub.s32 5, %v2623_v2 }
   0xa   :  { %34 = vst.msk [vmem:[#allocation2 + $0x48] sm:$0x3f] %vm25_vm1, %v2584_v1  ;;  %36 = vst.msk [vmem:[#allocation2 + $0x58] sm:$0x3f] %vm25_vm1, %v2584_v1  ;;  %v1339_v28 = vmul.f32 %v2715_v16, %v101_v22  ;;  %v1358_v29 = vmul.f32 %v2719_v17, %v101_v22  ;;  %v2756_v31 = vld [vmem:[%s6073_s1 + $0x58] sm:$0x7f]  ;;  %v117_v38 = vmul.f32 %v2738_v24, %v99_v20 }
   0xb   :  { %38 = vst.msk [vmem:[#allocation2 + $0x68] sm:$0x3f] %vm25_vm1, %v2584_v1  ;;  %40 = vst.msk [vmem:[#allocation2 + $0x78] sm:$0x3f] %vm25_vm1, %v2584_v1  ;;  %v2761_v32 = vld [vmem:[%s6073_s1 + $0x60] sm:$0x7f]  ;;  %v1346_v34 = vadd.f32 %v1338_v27, %v1326_v23  ;;  %v129_v39 = vmul.f32 %v2743_v26, %v100_v21  ;;  %v2786_v42 = vrot.slane %v2756_v31, %v2655_v6 }
   0xc   :  { %42 = vst.msk [vmem:[#allocation2 + $0x88] sm:$0x3f] %vm25_vm1, %v2584_v1  ;;  %44 = vst.msk [vmem:[#allocation2 + $0x98] sm:$0x3f] %vm25_vm1, %v2584_v1  ;;  %v2766_v33 = vld [vmem:[%s6073_s1 + $0x68] sm:$0x7f]  ;;  %v2768_v35 = vadd.f32 %v1339_v28, %v1327_v25  ;;  %v2790_v43 = vrot.slane %v2761_v32, %v2655_v6  ;;  %v2815_v51 = vmul.f32 %v2738_v24, %v100_v21 }
   0xd   :  { %46 = vst.msk [vmem:[#allocation2 + $0xa8] sm:$0x3f] %vm25_vm1, %v2584_v1  ;;  %48 = vst.msk [vmem:[#allocation2 + $0xb8] sm:$0x3f] %vm25_vm1, %v2584_v1  ;;  %v2782_v41 = vadd.f32 %v1358_v29, %v1346_v34  ;;  %v2794_v44 = vrot.slane %v2766_v33, %v2655_v6  ;;  %v2810_v49 = vsub.s32 6, %v2623_v2  ;;  %v2812_v50 = vld [vmem:[#allocation2 + $0xb0] sm:$0xff]  ;;  %v2818_v52 = vmul.f32 %v2738_v24, %v101_v22 }
   0xe   :  { %50 = vst.msk [vmem:[#allocation2 + $0xc8] sm:$0x3f] %vm25_vm1, %v2584_v1  ;;  %52 = vst.msk [vmem:[#allocation2 + $0xd8] sm:$0x3f] %vm25_vm1, %v2584_v1  ;;  %v2828_v55 = vld [vmem:[#allocation2 + $0xc0] sm:$0xff]  ;;  %v2831_v56 = vmul.f32 %v2743_v26, %v101_v22  ;;  %v2833_v57 = vadd.f32 %v129_v39, %v117_v38  ;;  %v2836_v58 = vmul.f32 %v2780_v40, %v101_v22  ;;  %v2845_v62 = vld [vmem:[#allocation2 + $0xd0] sm:$0xff] }
   0xf   :  { %6329 = vst [vmem:[#allocation7_spill] sm:$0xff] %v2652_v5  ;;  %6330 = vst [vmem:[#allocation8_spill] sm:$0xff] %v2655_v6  ;;  %v2839_v59 = vmul.f32 %v2700_v14, %v101_v22  ;;  %v2841_v60 = vld [vmem:[#allocation2 + $0x1] sm:$0xff]  ;;  %v2849_v63 = vmul.f32 %v2786_v42, %v2812_v50  ;;  %v2853_v0 = vmul.f32 %v2790_v43, %v2812_v50 }
  0x10   :  { %54 = vst.msk [vmem:[#allocation2 + $0x33] sm:$0xff] %vm23_vm0, %v2652_v5  ;;  %6331 = vst [vmem:[#allocation9_spill] sm:$0xff] %v2667_v8  ;;  %v2843_v61 = vld [vmem:[#allocation2 + $0x11] sm:$0xff]  ;;  %v2857_v1 = vmul.f32 %v2790_v43, %v2828_v55  ;;  %v2861_v2 = vmul.f32 %v2794_v44, %v2812_v50  ;;  %v2863_v20 = vld [vmem:[#allocation2 + $0x21] sm:$0xff]  ;;  %v2867_v21 = vmul.f32 %v2794_v44, %v2828_v55 }
  0x11   :  { %6332 = vst [vmem:[#allocation10_spill] sm:$0xff] %v2672_v9  ;;  %55 = vst.msk [vmem:[#allocation2 + $0x43] sm:$0xff] %vm23_vm0, %v2667_v8  ;;  %v2871_v22 = vmul.f32 %v2794_v44, %v2845_v62  ;;  %v2875_v23 = vrot.slane %v2696_v13, %v2774_v37  ;;  %v2879_v25 = vrot.slane %v2711_v15, %v2774_v37  ;;  %v2889_v29 = vld [vmem:[#allocation2 + $0x2] sm:$0xff]  ;;  %v400_v34 = vld [vmem:[#allocation2 + $0x12] sm:$0xff] }
  0x12   :  { %56 = vst.msk [vmem:[#allocation2 + $0x53] sm:$0xff] %vm23_vm0, %v2672_v9  ;;  %6333 = vst [vmem:[#allocation11_spill] sm:$0xff] %v2681_v10  ;;  %v2883_v27 = vmul.f32 %v2801_v46, %v2841_v60  ;;  %v2887_v28 = vmul.f32 %v2801_v46, %v2843_v61  ;;  %v401_v38 = vld [vmem:[#allocation2 + $0x22] sm:$0xff]  ;;  %v2893_v39 = vrot.slane %v2751_v30, %v2774_v37 }
  0x13   :  { %6334 = vst [vmem:[#allocation12_spill] sm:$0xff] %v2686_v11  ;;  %6335 = vst [vmem:[#allocation13_spill] sm:$0xff] %v2691_v12 }
  0x14   :  { %6336 = vst [vmem:[#allocation14_spill] sm:$0xff] %v2700_v14  ;;  %57 = vst.msk [vmem:[#allocation2 + $0x63] sm:$0xff] %vm23_vm0, %v2681_v10  ;;  %v2939_v14 = vmul.f32 %v2875_v23, %v401_v38 }
  0x15   :  { %58 = vst.msk [vmem:[#allocation2 + $0x73] sm:$0xff] %vm23_vm0, %v2686_v11  ;;  %59 = vst.msk [vmem:[#allocation2 + $0x83] sm:$0xff] %vm23_vm0, %v2691_v12 }
  0x16   :  { %6337 = vst [vmem:[#allocation15_spill] sm:$0xff] %v2715_v16  ;;  %6338 = vst [vmem:[#allocation16_spill] sm:$0xff] %v2719_v17  ;;  %v2933_v17 = vmul.f32 %v2875_v23, %v2889_v29  ;;  %v2936_v16 = vmul.f32 %v2875_v23, %v400_v34 }
  0x17   :  { %6339 = vst [vmem:[#allocation17_spill] sm:$0xff] %v2724_v18  ;;  %6340 = vst [vmem:[#allocation18_spill] sm:$0xff] %v2729_v19 }
  0x18   :  { %60 = vst.msk [vmem:[#allocation2 + $0x93] sm:$0xff] %vm23_vm0, %v2724_v18  ;;  %61 = vst.msk [vmem:[#allocation2 + $0xa3] sm:$0xff] %vm23_vm0, %v2729_v19 }
  0x19   :  { %6341 = vst [vmem:[#allocation19_spill] sm:$0xff] %v2738_v24  ;;  %6342 = vst [vmem:[#allocation20_spill] sm:$0xff] %v2743_v26 }
  0x1a   :  { %6343 = vst [vmem:[#allocation21_spill] sm:$0xff] %v2768_v35  ;;  %6344 = vst [vmem:[#allocation22_spill] sm:$0xff] %v2771_v36  ;;  %v553_v35 = vld [vmem:[#allocation2 + $0x3] sm:$0xff] }
  0x1b   :  { %6345 = vst [vmem:[#allocation23_spill] sm:$0xff] %v2774_v37  ;;  %6346 = vst [vmem:[#allocation24_spill] sm:$0xff] %v2780_v40 }
  0x1c   :  { %6347 = vst [vmem:[#allocation25_spill] sm:$0xff] %v2782_v41  ;;  %6348 = vst [vmem:[#allocation26_spill] sm:$0xff] %v2786_v42  ;;  %v2909_v41 = vmul.f32 %v2822_v53, %v2863_v20  ;;  %v2929_v42 = vrot.slane %v2711_v15, %v2804_v47 }
  0x1d   :  { %6349 = vst [vmem:[#allocation27_spill] sm:$0xff] %v2790_v43  ;;  %6350 = vst [vmem:[#allocation28_spill] sm:$0xff] %v2794_v44  ;;  %v2921_v44 = vrot.slane %v2751_v30, %v2797_v45  ;;  %v2925_v43 = vrot.slane %v2696_v13, %v2804_v47 }
  0x1e   :  { %6351 = vst [vmem:[#allocation29_spill] sm:$0xff] %v2797_v45  ;;  %6352 = vst [vmem:[#allocation30_spill] sm:$0xff] %v2801_v46 }
  0x1f   :  { %6353 = vst [vmem:[#allocation31_spill] sm:$0xff] %v2804_v47  ;;  %6354 = vst [vmem:[#allocation32_spill] sm:$0xff] %v2807_v48 }
  0x20   :  { %6355 = vst [vmem:[#allocation33_spill] sm:$0xff] %v2810_v49  ;;  %6356 = vst [vmem:[#allocation34_spill] sm:$0xff] %v2815_v51 }
  0x21   :  { %6357 = vst [vmem:[#allocation35_spill] sm:$0xff] %v2818_v52  ;;  %6358 = vst [vmem:[#allocation36_spill] sm:$0xff] %v2822_v53 }
  0x22   :  { %6359 = vst [vmem:[#allocation37_spill] sm:$0xff] %v2826_v54  ;;  %6360 = vst [vmem:[#allocation38_spill] sm:$0xff] %v2828_v55 }
  0x23   :  { %6361 = vst [vmem:[#allocation39_spill] sm:$0xff] %v2831_v56  ;;  %6362 = vst [vmem:[#allocation40_spill] sm:$0xff] %v2833_v57  ;;  %v1016_v57 = vld [vmem:[#allocation2 + $0x16] sm:$0xff] }
  0x24   :  { %6363 = vst [vmem:[#allocation41_spill] sm:$0xff] %v2836_v58  ;;  %6364 = vst [vmem:[#allocation42_spill] sm:$0xff] %v2839_v59  ;;  %v554_v59 = vld [vmem:[#allocation2 + $0x13] sm:$0xff] }
  0x25   :  { %6365 = vst [vmem:[#allocation43_spill] sm:$0xff] %v2845_v62  ;;  %6366 = vst [vmem:[#allocation44_spill] sm:$0xff] %v2849_v63  ;;  %v555_v63 = vld [vmem:[#allocation2 + $0x23] sm:$0xff] }
  0x26   :  { %6367 = vst [vmem:[#allocation45_spill] sm:$0xff] %v2853_v0  ;;  %6368 = vst [vmem:[#allocation46_spill] sm:$0xff] %v2857_v1  ;;  %v2905_v0 = vmul.f32 %v2822_v53, %v2843_v61  ;;  %v2917_v1 = vmul.f32 %v2826_v54, %v2863_v20 }
  0x27   :  { %6369 = vst [vmem:[#allocation47_spill] sm:$0xff] %v2861_v2  ;;  %6370 = vst [vmem:[#allocation48_spill] sm:$0xff] %v2867_v21  ;;  %v2897_v2 = vrot.slane %v2696_v13, %v2797_v45  ;;  %v2901_v21 = vmul.f32 %v2801_v46, %v2863_v20 }
  0x28   :  { %6371 = vst [vmem:[#allocation49_spill] sm:$0xff] %v2871_v22  ;;  %6372 = vst [vmem:[#allocation50_spill] sm:$0xff] %v2875_v23  ;;  %v2913_v22 = vrot.slane %v2711_v15, %v2797_v45 }
  0x29   :  { %6373 = vst [vmem:[#allocation51_spill] sm:$0xff] %v2879_v25  ;;  %6374 = vst [vmem:[#allocation52_spill] sm:$0xff] %v2883_v27  ;;  %v709_v27 = vld [vmem:[#allocation2 + $0x24] sm:$0xff] }
  0x2a   :  { %6375 = vst [vmem:[#allocation53_spill] sm:$0xff] %v2887_v28  ;;  %6376 = vst [vmem:[#allocation54_spill] sm:$0xff] %v2893_v39  ;;  %v2951_v28 = vmul.f32 %v2897_v2, %v553_v35  ;;  %v2971_v35 = vmul.f32 %v2913_v22, %v555_v63  ;;  %v2989_v58 = vmul.f32 %v2925_v43, %v709_v27 }
  0x2b   :  { %6377 = vst [vmem:[#allocation55_spill] sm:$0xff] %v2897_v2  ;;  %6378 = vst [vmem:[#allocation56_spill] sm:$0xff] %v2901_v21  ;;  %v2948_v21 = vmul.f32 %v2893_v39, %v401_v38 }
  0x2c   :  { %6379 = vst [vmem:[#allocation57_spill] sm:$0xff] %v2905_v0  ;;  %6380 = vst [vmem:[#allocation58_spill] sm:$0xff] %v2909_v41  ;;  %v707_v41 = vld [vmem:[#allocation2 + $0x4] sm:$0xff]  ;;  %v2945_v0 = vmul.f32 %v2879_v25, %v401_v38  ;;  %v2968_v38 = vrot.slane %v2696_v13, %v2807_v48 }
  0x2d   :  { %6381 = vst [vmem:[#allocation59_spill] sm:$0xff] %v2913_v22  ;;  %6382 = vst [vmem:[#allocation60_spill] sm:$0xff] %v2917_v1  ;;  %v2942_v1 = vmul.f32 %v2879_v25, %v400_v34  ;;  %v2960_v34 = vmul.f32 %v2913_v22, %v554_v59 }
  0x2e   :  { %6383 = vst [vmem:[#allocation61_spill] sm:$0xff] %v2921_v44  ;;  %6384 = vst [vmem:[#allocation62_spill] sm:$0xff] %v2925_v43 }
  0x2f   :  { %6385 = vst [vmem:[#allocation63_spill] sm:$0xff] %v2929_v42  ;;  %6386 = vst [vmem:[#allocation64_spill] sm:$0xff] %v2933_v17  ;;  %v2954_v17 = vmul.f32 %v2897_v2, %v554_v59  ;;  %v862_v59 = vld [vmem:[#allocation2 + $0x15] sm:$0xff] }
  0x30   :  { %6387 = vst [vmem:[#allocation65_spill] sm:$0xff] %v2936_v16  ;;  %6388 = vst [vmem:[#allocation66_spill] sm:$0xff] %v2939_v14  ;;  %v708_v16 = vld [vmem:[#allocation2 + $0x14] sm:$0xff]  ;;  %v2957_v14 = vmul.f32 %v2897_v2, %v555_v63 }
  0x31   :  { %6389 = vst [vmem:[#allocation67_spill] sm:$0xff] %v2942_v1  ;;  %6390 = vst [vmem:[#allocation68_spill] sm:$0xff] %v2945_v0  ;;  %v2964_v0 = vrot.slane %v2751_v30, %v2804_v47  ;;  %v2986_v1 = vmul.f32 %v2925_v43, %v708_v16 }
  0x32   :  { %6391 = vst [vmem:[#allocation69_spill] sm:$0xff] %v2948_v21  ;;  %6392 = vst [vmem:[#allocation70_spill] sm:$0xff] %v2951_v28  ;;  %v2977_v28 = vmul.f32 %v2925_v43, %v707_v41  ;;  %v2983_v21 = vrot.slane %v2711_v15, %v2807_v48  ;;  %v2997_v41 = vrot.slane %v2696_v13, %v2810_v49 }
  0x33   :  { %6393 = vst [vmem:[#allocation71_spill] sm:$0xff] %v2954_v17  ;;  %6394 = vst [vmem:[#allocation72_spill] sm:$0xff] %v2957_v14  ;;  %v2974_v17 = vmul.f32 %v2921_v44, %v555_v63  ;;  %v861_v14 = vld [vmem:[#allocation2 + $0x5] sm:$0xff]  ;;  %v2993_v63 = vrot.slane %v2751_v30, %v2807_v48  ;;  %v3014_v52 = vmul.f32 %v2964_v0, %v709_v27 }
  0x34   :  { %6395 = vst [vmem:[#allocation73_spill] sm:$0xff] %v2960_v34  ;;  %6396 = vst [vmem:[#allocation74_spill] sm:$0xff] %v2964_v0  ;;  %v2979_v34 = vld [vmem:[#allocation2 + $0x25] sm:$0xff]  ;;  %v3017_v13 = vmul.f32 %v2968_v38, %v861_v14  ;;  %v3039_v14 = vrot.slane %v2633_v4, %v2771_v36 }
  0x35   :  { %6397 = vst [vmem:[#allocation75_spill] sm:$0xff] %v2968_v38  ;;  %6398 = vst [vmem:[#allocation76_spill] sm:$0xff] %v2971_v35  ;;  %v1015_v35 = vld [vmem:[#allocation2 + $0x6] sm:$0xff] }
  0x36   :  { %6399 = vst [vmem:[#allocation77_spill] sm:$0xff] %v2974_v17  ;;  %6400 = vst [vmem:[#allocation78_spill] sm:$0xff] %v2977_v28  ;;  %v3000_v28 = vmul.f32 %v2929_v42, %v708_v16  ;;  %v3003_v17 = vmul.f32 %v2929_v42, %v709_v27  ;;  %v3020_v16 = vmul.f32 %v2968_v38, %v862_v59 }
  0x37   :  { %6401 = vst [vmem:[#allocation79_spill] sm:$0xff] %v2983_v21  ;;  %6402 = vst [vmem:[#allocation80_spill] sm:$0xff] %v2986_v1  ;;  %v3007_v1 = vrot.slane %v2711_v15, %v2810_v49  ;;  %v3027_v15 = vmul.f32 %v2983_v21, %v862_v59  ;;  %v3035_v27 = vrot.slane %v2628_v3, %v2771_v36 }
  0x38   :  { %6403 = vst [vmem:[#allocation81_spill] sm:$0xff] %v2989_v58  ;;  %6404 = vst [vmem:[#allocation82_spill] sm:$0xff] %v2993_v63  ;;  %v3011_v58 = vrot.slane %v2751_v30, %v2810_v49  ;;  %v3031_v30 = vmul.f32 %v2983_v21, %v2979_v34  ;;  %v3049_v59 = vmul.f32 %v2997_v41, %v1016_v57 }
  0x39   :  { %6405 = vst [vmem:[#allocation83_spill] sm:$0xff] %v2997_v41  ;;  %6406 = vst [vmem:[#allocation84_spill] sm:$0xff] %v3000_v28  ;;  %v1017_v28 = vld [vmem:[#allocation2 + $0x26] sm:$0xff]  ;;  %v3059_v4 = vmul.f32 %v3007_v1, %v1016_v57  ;;  %v3079_v57 = vrot.slane %v2766_v33, %v2771_v36  ;;  %v3107_v56 = vmul.f32 %v3039_v14, %v2863_v20 }
  0x3a   :  { %6407 = vst [vmem:[#allocation85_spill] sm:$0xff] %v3003_v17  ;;  %6408 = vst [vmem:[#allocation86_spill] sm:$0xff] %v3007_v1  ;;  %v3024_v17 = vmul.f32 %v2968_v38, %v2979_v34 }
  0x3b   :  { %6409 = vst [vmem:[#allocation87_spill] sm:$0xff] %v3011_v58  ;;  %6410 = vst [vmem:[#allocation88_spill] sm:$0xff] %v3014_v52  ;;  %v3103_v52 = vld [vmem:[#allocation2 + $0xd1] sm:$0xff] }
  0x3c   :  { %6411 = vst [vmem:[#allocation89_spill] sm:$0xff] %v3017_v13  ;;  %6412 = vst [vmem:[#allocation90_spill] sm:$0xff] %v3020_v16  ;;  %v3043_v16 = vmul.f32 %v2993_v63, %v2979_v34  ;;  %v3063_v13 = vrot.slane %v2756_v31, %v2771_v36 }
  0x3d   :  { %6413 = vst [vmem:[#allocation91_spill] sm:$0xff] %v3024_v17  ;;  %6414 = vst [vmem:[#allocation92_spill] sm:$0xff] %v3027_v15  ;;  %v3046_v17 = vmul.f32 %v2997_v41, %v1015_v35  ;;  %v3056_v15 = vmul.f32 %v2997_v41, %v1017_v28  ;;  %v3067_v35 = vrot.slane %v2761_v32, %v2771_v36 }
  0x3e   :  { %6415 = vst [vmem:[#allocation93_spill] sm:$0xff] %v3031_v30  ;;  %6416 = vst [vmem:[#allocation94_spill] sm:$0xff] %v3035_v27  ;;  %v3053_v30 = vrot.slane %v2660_v7, %v2771_v36  ;;  %v3075_v7 = vmul.f32 %v3011_v58, %v1017_v28 }
  0x3f   :  { %6417 = vst [vmem:[#allocation95_spill] sm:$0xff] %v3039_v14  ;;  %6418 = vst [vmem:[#allocation96_spill] sm:$0xff] %v3043_v16  ;;  %v3089_v16 = vmul.f32 %v3035_v27, %v2841_v60 }
  0x40   :  { %6419 = vst [vmem:[#allocation97_spill] sm:$0xff] %v3046_v17  ;;  %6420 = vst [vmem:[#allocation98_spill] sm:$0xff] %v3049_v59  ;;  %v3069_v17 = vld [vmem:[#allocation2 + $0xb1] sm:$0xff]  ;;  %v3072_v59 = vmul.f32 %v3007_v1, %v1017_v28  ;;  %v3097_v28 = vmul.f32 %v3035_v27, %v2863_v20  ;;  %v3111_v60 = vmul.f32 %v3053_v30, %v2863_v20 }
  0x41   :  { %6421 = vst [vmem:[#allocation99_spill] sm:$0xff] %v3053_v30  ;;  %6422 = vst [vmem:[#allocation100_spill] sm:$0xff] %v3056_v15  ;;  %v3085_v15 = vld [vmem:[#allocation2 + $0xc1] sm:$0xff]  ;;  %v3131_v20 = vmul.f32 %v3067_v35, %v3069_v17  ;;  %v3141_v30 = vld [vmem:[#allocation2 + $0xd2] sm:$0xff] }
  0x42   :  { %6423 = vst [vmem:[#allocation101_spill] sm:$0xff] %v3059_v4  ;;  %6424 = vst [vmem:[#allocation102_spill] sm:$0xff] %v3063_v13  ;;  %v3083_v4 = vrot.slane %v2628_v3, %v2774_v37 }
  0x43   :  { %6425 = vst [vmem:[#allocation103_spill] sm:$0xff] %v3067_v35  ;;  %6426 = vst [vmem:[#allocation104_spill] sm:$0xff] %v3072_v59  ;;  %v3093_v59 = vmul.f32 %v3035_v27, %v2843_v61  ;;  %v3159_v27 = vrot.slane %v2761_v32, %v2797_v45 }
  0x44   :  { %6427 = vst [vmem:[#allocation105_spill] sm:$0xff] %v3075_v7  ;;  %6428 = vst [vmem:[#allocation106_spill] sm:$0xff] %v3079_v57  ;;  %v3101_v7 = vmul.f32 %v3039_v14, %v2843_v61  ;;  %v3121_v61 = vld [vmem:[#allocation2 + $0xb2] sm:$0xff] }
  0x45   :  { %6429 = vst [vmem:[#allocation107_spill] sm:$0xff] %v3083_v4  ;;  %6430 = vst [vmem:[#allocation108_spill] sm:$0xff] %v3085_v15  ;;  %v3143_v14 = vld [vmem:[#allocation2 + $0xb3] sm:$0xff] }
  0x46   :  { %6431 = vst [vmem:[#allocation109_spill] sm:$0xff] %v3089_v16  ;;  %6432 = vst [vmem:[#allocation110_spill] sm:$0xff] %v3093_v59  ;;  %v3115_v59 = vrot.slane %v2756_v31, %v2774_v37  ;;  %v3127_v16 = vmul.f32 %v3063_v13, %v3069_v17  ;;  %v3147_v13 = vmul.f32 %v3067_v35, %v3085_v15 }
  0x47   :  { %6433 = vst [vmem:[#allocation111_spill] sm:$0xff] %v3097_v28  ;;  %6434 = vst [vmem:[#allocation112_spill] sm:$0xff] %v3101_v7  ;;  %v3119_v28 = vrot.slane %v2761_v32, %v2774_v37  ;;  %v3123_v7 = vld [vmem:[#allocation2 + $0xc2] sm:$0xff] }
  0x48   :  { %6435 = vst [vmem:[#allocation113_spill] sm:$0xff] %v3103_v52  ;;  %6436 = vst [vmem:[#allocation114_spill] sm:$0xff] %v3107_v56  ;;  %v3139_v56 = vrot.slane %v2756_v31, %v2797_v45 }
  0x49   :  { %6437 = vst [vmem:[#allocation115_spill] sm:$0xff] %v3111_v60  ;;  %6438 = vst [vmem:[#allocation116_spill] sm:$0xff] %v3115_v59  ;;  %v3135_v60 = vrot.slane %v2766_v33, %v2774_v37 }
  0x4a   :  { %6439 = vst [vmem:[#allocation117_spill] sm:$0xff] %v3119_v28  ;;  %6440 = vst [vmem:[#allocation118_spill] sm:$0xff] %v3123_v7 }
  0x4b   :  { %6441 = vst [vmem:[#allocation119_spill] sm:$0xff] %v3127_v16  ;;  %6442 = vst [vmem:[#allocation120_spill] sm:$0xff] %v3131_v20  ;;  %v3151_v16 = vmul.f32 %v3079_v57, %v3069_v17  ;;  %v3155_v20 = vmul.f32 %v3079_v57, %v3085_v15 }
  0x4c   :  { %6443 = vst [vmem:[#allocation121_spill] sm:$0xff] %v3135_v60  ;;  %6444 = vst [vmem:[#allocation122_spill] sm:$0xff] %v3139_v56 }
  0x4d   :  { %6445 = vst [vmem:[#allocation123_spill] sm:$0xff] %v3141_v30  ;;  %6446 = vst [vmem:[#allocation124_spill] sm:$0xff] %v3147_v13 }
  0x4e   :  { %6447 = vst [vmem:[#allocation125_spill] sm:$0xff] %v3151_v16  ;;  %6448 = vst [vmem:[#allocation126_spill] sm:$0xff] %v3155_v20 }
  0x4f   :  { %6449 = vst [vmem:[#allocation127_spill] sm:$0xff] %v3159_v27 }
  0x50   :  { %8 = vsyncpa [#allocation5], 0  ;;  %v3161_v51 = vld [vmem:[#allocation2 + $0xc3] sm:$0xff]  ;;  %v3165_v19 = vmul.f32 %v3079_v57, %v3103_v52  ;;  %v3169_v13 = vmul.f32 %v3083_v4, %v2889_v29  ;;  %v3173_v16 = vrot.slane %v2766_v33, %v2797_v45  ;;  %v3177_v20 = vrot.slane %v2756_v31, %v2804_v47  ;;  %v3197_v57 = vld [vmem:[#allocation2 + $0x50] sm:$0xff] }
  0x51   :  { %6450 = vst [vmem:[#allocation128_spill] sm:$0xff] %v3161_v51  ;;  %v3179_v35 = vld [vmem:[#allocation2 + $0x40] sm:$0xff]  ;;  %v3183_v18 = vmul.f32 %v3115_v59, %v3121_v61  ;;  %v3191_v29 = vmul.f32 %v3119_v28, %v3123_v7  ;;  %6460 = vst [vmem:[#allocation138_spill] sm:$0xff] %v3197_v57  ;;  %v3201_v59 = vmul.f32 %v3135_v60, %v3121_v61  ;;  %v3381_v8 = vld [vmem:[#allocation2 + $0x74] sm:$0xff]  ;;  %vm63_vm2 = vcmask 713728  }
  0x52   :  { %6451 = vst [vmem:[#allocation129_spill] sm:$0xff] %v3165_v19  ;;  %6452 = vst [vmem:[#allocation130_spill] sm:$0xff] %v3169_v13  ;;  %v3187_v19 = vmul.f32 %v3119_v28, %v3121_v61  ;;  %v3195_v13 = vrot.slane %v2628_v3, %v2807_v48  ;;  %v249_v31 = vld [vmem:[#allocation2 + $0x41] sm:$0xff]  ;;  %v3213_v3 = vmul.f32 %v3139_v56, %v3143_v14  ;;  %v250_v56 = vld [vmem:[#allocation2 + $0x51] sm:$0xff] }
  0x53   :  { %6453 = vst [vmem:[#allocation131_spill] sm:$0xff] %v3173_v16  ;;  %6454 = vst [vmem:[#allocation132_spill] sm:$0xff] %v3177_v20  ;;  %v403_v20 = vld [vmem:[#allocation2 + $0x42] sm:$0xff]  ;;  %v3217_v52 = vmul.f32 %v3159_v27, %v3143_v14  ;;  %v3383_v5 = vld [vmem:[#allocation2 + $0x75] sm:$0xff] }
  0x54   :  { %6455 = vst [vmem:[#allocation133_spill] sm:$0xff] %v3179_v35  ;;  %6456 = vst [vmem:[#allocation134_spill] sm:$0xff] %v3183_v18  ;;  %v3205_v18 = vmul.f32 %v3135_v60, %v3123_v7  ;;  %v711_v28 = vld [vmem:[#allocation2 + $0x44] sm:$0xff]  ;;  %v3247_v12 = vmul.f32 %v2875_v23, %v403_v20  ;;  %v3266_v20 = vmul.f32 %v2822_v53, %v250_v56 }
  0x55   :  { %6457 = vst [vmem:[#allocation135_spill] sm:$0xff] %v3187_v19  ;;  %6458 = vst [vmem:[#allocation136_spill] sm:$0xff] %v3191_v29  ;;  %v3209_v19 = vmul.f32 %v3135_v60, %v3141_v30  ;;  %v557_v29 = vld [vmem:[#allocation2 + $0x43] sm:$0xff]  ;;  %v404_v60 = vld [vmem:[#allocation2 + $0x52] sm:$0xff]  ;;  %v3233_v30 = vrot.slane %v2766_v33, %v2804_v47 }
  0x56   :  { %6459 = vst [vmem:[#allocation137_spill] sm:$0xff] %v3195_v13  ;;  %6461 = vst [vmem:[#allocation139_spill] sm:$0xff] %v3201_v59  ;;  %v865_v4 = vld [vmem:[#allocation2 + $0x45] sm:$0xff]  ;;  %v3221_v59 = vmul.f32 %v3159_v27, %v3161_v51  ;;  %v712_v27 = vld [vmem:[#allocation2 + $0x54] sm:$0xff]  ;;  %v3250_v33 = vmul.f32 %v2897_v2, %v557_v29  ;;  %v3269_v29 = vmul.f32 %v2879_v25, %v404_v60 }
  0x57   :  { %6462 = vst [vmem:[#allocation140_spill] sm:$0xff] %v3205_v18  ;;  %6463 = vst [vmem:[#allocation141_spill] sm:$0xff] %v3209_v19  ;;  %v3225_v18 = vmul.f32 %v3173_v16, %v3161_v51  ;;  %v3229_v19 = vrot.slane %v2761_v32, %v2804_v47  ;;  %v558_v16 = vld [vmem:[#allocation2 + $0x53] sm:$0xff]  ;;  %v3258_v11 = vmul.f32 %v2968_v38, %v865_v4 }
  0x58   :  { %6464 = vst [vmem:[#allocation142_spill] sm:$0xff] %v3213_v3  ;;  %6465 = vst [vmem:[#allocation143_spill] sm:$0xff] %v3217_v52  ;;  %v1019_v3 = vld [vmem:[#allocation2 + $0x46] sm:$0xff]  ;;  %v121_v52 = vmul.f32 %v2738_v24, %v3179_v35  ;;  %v866_v32 = vld [vmem:[#allocation2 + $0x55] sm:$0xff] }
  0x59   :  { %6466 = vst [vmem:[#allocation144_spill] sm:$0xff] %v3221_v59  ;;  %6467 = vst [vmem:[#allocation145_spill] sm:$0xff] %v3225_v18  ;;  %v3238_v59 = vmul.f32 %v2801_v46, %v249_v31  ;;  %v133_v18 = vmul.f32 %v2743_v26, %v3197_v57  ;;  %v1020_v31 = vld [vmem:[#allocation2 + $0x56] sm:$0xff]  ;;  %v3255_v35 = vld [vmem:[#allocation2 + $0x60] sm:$0xff]  ;;  %v3261_v10 = vmul.f32 %v2997_v41, %v1019_v3 }
  0x5a   :  { %6468 = vst [vmem:[#allocation146_spill] sm:$0xff] %v3229_v19  ;;  %6469 = vst [vmem:[#allocation147_spill] sm:$0xff] %v3233_v30  ;;  %v3244_v19 = vmul.f32 %v3195_v13, %v2979_v34  ;;  %v3253_v30 = vmul.f32 %v2925_v43, %v711_v28  ;;  %v122_v34 = vmul.f32 %v2738_v24, %v3197_v57  ;;  %v251_v3 = vld [vmem:[#allocation2 + $0x61] sm:$0xff] }
  0x5b   :  { %6470 = vst [vmem:[#allocation148_spill] sm:$0xff] %v3238_v59  ;;  %6472 = vst [vmem:[#allocation150_spill] sm:$0xff] %v3247_v12  ;;  %v3272_v28 = vmul.f32 %v2913_v22, %v558_v16  ;;  %v3278_v4 = vmul.f32 %v2983_v21, %v866_v32  ;;  %v405_v13 = vld [vmem:[#allocation2 + $0x62] sm:$0xff]  ;;  %v3291_v12 = vmul.f32 %v2875_v23, %v404_v60 }
  0x5c   :  { %6471 = vst [vmem:[#allocation149_spill] sm:$0xff] %v3244_v19  ;;  %6473 = vst [vmem:[#allocation151_spill] sm:$0xff] %v3250_v33  ;;  %v3275_v19 = vmul.f32 %v2929_v42, %v712_v27  ;;  %v3286_v33 = vmul.f32 %v2801_v46, %v250_v56  ;;  %v713_v57 = vld [vmem:[#allocation2 + $0x64] sm:$0xff]  ;;  %v3303_v56 = vmul.f32 %v2997_v41, %v1020_v31 }
  0x5d   :  { %6474 = vst [vmem:[#allocation152_spill] sm:$0xff] %v3253_v30  ;;  %6475 = vst [vmem:[#allocation153_spill] sm:$0xff] %v3255_v35  ;;  %v3283_v30 = vmul.f32 %v3007_v1, %v1020_v31  ;;  %v3310_v9 = vmul.f32 %v2826_v54, %v251_v3  ;;  %v3313_v60 = vmul.f32 %v2893_v39, %v405_v13 }
  0x5e   :  { %6476 = vst [vmem:[#allocation154_spill] sm:$0xff] %v3258_v11  ;;  %6477 = vst [vmem:[#allocation155_spill] sm:$0xff] %v3261_v10  ;;  %v559_v10 = vld [vmem:[#allocation2 + $0x63] sm:$0xff]  ;;  %v3280_v11 = vadd.f32 %v133_v18, %v121_v52  ;;  %v3297_v18 = vmul.f32 %v2925_v43, %v712_v27  ;;  %v3300_v52 = vmul.f32 %v2968_v38, %v866_v32 }
  0x5f   :  { %6478 = vst [vmem:[#allocation156_spill] sm:$0xff] %v3266_v20  ;;  %6479 = vst [vmem:[#allocation157_spill] sm:$0xff] %v3269_v29  ;;  %v867_v29 = vld [vmem:[#allocation2 + $0x65] sm:$0xff]  ;;  %v3319_v27 = vmul.f32 %v2921_v44, %v559_v10  ;;  %v3322_v32 = vmul.f32 %v2964_v0, %v713_v57 }
  0x60   :  { %6480 = vst [vmem:[#allocation158_spill] sm:$0xff] %v3272_v28  ;;  %6481 = vst [vmem:[#allocation159_spill] sm:$0xff] %v3275_v19  ;;  %v134_v28 = vmul.f32 %v2743_v26, %v3255_v35  ;;  %v1021_v19 = vld [vmem:[#allocation2 + $0x66] sm:$0xff]  ;;  %v3325_v31 = vmul.f32 %v2993_v63, %v867_v29  ;;  %v3389_v62 = vmul.f32 %v2968_v38, %v867_v29 }
  0x61   :  { %6482 = vst [vmem:[#allocation160_spill] sm:$0xff] %v3278_v4  ;;  %6483 = vst [vmem:[#allocation161_spill] sm:$0xff] %v3283_v30  ;;  %v3294_v4 = vmul.f32 %v2897_v2, %v558_v16  ;;  %v3307_v30 = vmul.f32 %v2780_v40, %v3255_v35  ;;  %v95_v16 = vld [vmem:[%s6073_s1 + $0x18] sm:$0x7f] }
  0x62   :  { %6484 = vst [vmem:[#allocation162_spill] sm:$0xff] %v3286_v33  ;;  %6485 = vst [vmem:[#allocation163_spill] sm:$0xff] %v3291_v12  ;;  %v252_v12 = vld [vmem:[#allocation2 + $0x71] sm:$0xff]  ;;  %v3386_v33 = vrot.slane %v95_v16, %v2810_v49 }
  0x63   :  { %6486 = vst [vmem:[#allocation164_spill] sm:$0xff] %v3294_v4  ;;  %6487 = vst [vmem:[#allocation165_spill] sm:$0xff] %v3297_v18  ;;  %v3334_v18 = vadd.f32 %v134_v28, %v122_v34  ;;  %v3337_v4 = vmul.f32 %v2801_v46, %v251_v3  ;;  %v3355_v34 = vmul.f32 %v2897_v2, %v559_v10  ;;  %v3357_v28 = vld [vmem:[#allocation2 + $0x70] sm:$0xff] }
  0x64   :  { %6488 = vst [vmem:[#allocation166_spill] sm:$0xff] %v3300_v52  ;;  %6489 = vst [vmem:[#allocation167_spill] sm:$0xff] %v3303_v56  ;;  %v3328_v56 = vmul.f32 %v3011_v58, %v1021_v19  ;;  %v3332_v52 = vmul.f32 %v2738_v24, %v3255_v35  ;;  %v3352_v35 = vrot.slane %v95_v16, %v2771_v36 }
  0x65   :  { %6490 = vst [vmem:[#allocation168_spill] sm:$0xff] %v3310_v9  ;;  %6491 = vst [vmem:[#allocation169_spill] sm:$0xff] %v3313_v60  ;;  %v3362_v60 = vrot.slane %v95_v16, %v2774_v37 }
  0x66   :  { %6492 = vst [vmem:[#allocation170_spill] sm:$0xff] %v3319_v27  ;;  %6493 = vst [vmem:[#allocation171_spill] sm:$0xff] %v3322_v32  ;;  %v3340_v27 = vmul.f32 %v2822_v53, %v251_v3  ;;  %v3343_v32 = vmul.f32 %v2875_v23, %v405_v13  ;;  %v3359_v3 = vld [vmem:[#allocation2 + $0x72] sm:$0xff] }
  0x67   :  { %6494 = vst [vmem:[#allocation172_spill] sm:$0xff] %v3325_v31  ;;  %6495 = vst [vmem:[#allocation173_spill] sm:$0xff] %v3328_v56  ;;  %v3346_v31 = vmul.f32 %v2879_v25, %v405_v13  ;;  %v3349_v56 = vrot.slane %v95_v16, %v2655_v6  ;;  %v3365_v13 = vrot.slane %v95_v16, %v2804_v47 }
  0x68   :  { %6496 = vst [vmem:[#allocation174_spill] sm:$0xff] %v3337_v4  ;;  %6497 = vst [vmem:[#allocation175_spill] sm:$0xff] %v3340_v27  ;;  %v3374_v27 = vmul.f32 %v2925_v43, %v713_v57  ;;  %v3379_v4 = vld [vmem:[#allocation2 + $0x73] sm:$0xff] }
  0x69   :  { %6498 = vst [vmem:[#allocation176_spill] sm:$0xff] %v3343_v32  ;;  %6499 = vst [vmem:[#allocation177_spill] sm:$0xff] %v3346_v31  ;;  %v3368_v31 = vrot.slane %v95_v16, %v2807_v48  ;;  %v3371_v32 = vmul.f32 %v2913_v22, %v559_v10  ;;  %v3392_v10 = vmul.f32 %v2983_v21, %v867_v29 }
  0x6a   :  { %6500 = vst [vmem:[#allocation178_spill] sm:$0xff] %v3352_v35  ;;  %6501 = vst [vmem:[#allocation179_spill] sm:$0xff] %v3355_v34  ;;  %v3377_v34 = vmul.f32 %v2929_v42, %v713_v57  ;;  %v3398_v57 = vrot.slane %v95_v16, %v2797_v45  ;;  %v3407_v9 = vmul.f32 %v3349_v56, %v3357_v28 }
  0x6b   :  { %6502 = vst [vmem:[#allocation180_spill] sm:$0xff] %v3357_v28  ;;  %6503 = vst [vmem:[#allocation181_spill] sm:$0xff] %v3359_v3  ;;  %v3414_v29 = vmul.f32 %v2738_v24, %v3357_v28  ;;  %v3418_v16 = vmul.f32 %v3362_v60, %v3359_v3  ;;  %v135_v24 = vmul.f32 %v2743_v26, %v3357_v28 }
  0x6c   :  { %6504 = vst [vmem:[#allocation182_spill] sm:$0xff] %v3362_v60  ;;  %6505 = vst [vmem:[#allocation183_spill] sm:$0xff] %v3365_v13 }
  0x6d   :  { %6506 = vst [vmem:[#allocation184_spill] sm:$0xff] %v3368_v31  ;;  %6507 = vst [vmem:[#allocation185_spill] sm:$0xff] %v3371_v32  ;;  %v3403_v32 = vmul.f32 %v3007_v1, %v1021_v19  ;;  %v143_v55 = vadd.f32 %v135_v24, %v3332_v52 }
  0x6e   :  { %6508 = vst [vmem:[#allocation186_spill] sm:$0xff] %v3374_v27  ;;  %6509 = vst [vmem:[#allocation187_spill] sm:$0xff] %v3377_v34  ;;  %v3395_v27 = vmul.f32 %v2997_v41, %v1021_v19  ;;  %v3400_v34 = vld [vmem:[#allocation2 + $0x76] sm:$0xff]  ;;  %v3426_v19 = vmul.f32 %v3365_v13, %v3381_v8 }
  0x6f   :  { %6510 = vst [vmem:[#allocation188_spill] sm:$0xff] %v3379_v4  ;;  %6511 = vst [vmem:[#allocation189_spill] sm:$0xff] %v3381_v8 }
  0x70   :  { %6512 = vst [vmem:[#allocation190_spill] sm:$0xff] %v3383_v5  ;;  %6513 = vst [vmem:[#allocation191_spill] sm:$0xff] %v3386_v33 }
  0x71   :  { %6514 = vst [vmem:[#allocation192_spill] sm:$0xff] %v3389_v62  ;;  %6515 = vst [vmem:[#allocation193_spill] sm:$0xff] %v3392_v10  ;;  %v3410_v62 = vmul.f32 %v3352_v35, %v252_v12  ;;  %v3434_v10 = vmul.f32 %v3386_v33, %v3400_v34 }
  0x72   :  { %6516 = vst [vmem:[#allocation194_spill] sm:$0xff] %v3395_v27  ;;  %6517 = vst [vmem:[#allocation195_spill] sm:$0xff] %v3398_v57  ;;  %v3422_v27 = vmul.f32 %v3398_v57, %v3379_v4 }
  0x73   :  { %6518 = vst [vmem:[#allocation196_spill] sm:$0xff] %v3400_v34  ;;  %6519 = vst [vmem:[#allocation197_spill] sm:$0xff] %v3403_v32  ;;  %v3430_v32 = vmul.f32 %v3368_v31, %v3383_v5 }
  0x74   :  { %6520 = vst [vmem:[#allocation198_spill] sm:$0xff] %v3410_v62  ;;  %6521 = vst [vmem:[#allocation199_spill] sm:$0xff] %v3418_v16  ;;  %v154_v16 = vmul.f32 %v2780_v40, %v3357_v28  ;;  %v3444_v62 = vmul.f32 %v2822_v53, %v252_v12  ;;  %v3459_v28 = vmul.f32 %v2893_v39, %v3359_v3 }
  0x75   :  { %6522 = vst [vmem:[#allocation200_spill] sm:$0xff] %v3422_v27  ;;  %6523 = vst [vmem:[#allocation201_spill] sm:$0xff] %v3426_v19  ;;  %v3441_v27 = vmul.f32 %v2801_v46, %v252_v12  ;;  %v3447_v19 = vmul.f32 %v2826_v54, %v252_v12  ;;  %v3463_v46 = vmul.f32 %v2897_v2, %v3379_v4 }
  0x76   :  { %6524 = vst [vmem:[#allocation202_spill] sm:$0xff] %v3430_v32  ;;  %6525 = vst [vmem:[#allocation203_spill] sm:$0xff] %v3434_v10  ;;  %v3451_v32 = vmul.f32 %v2875_v23, %v3359_v3  ;;  %v3455_v10 = vmul.f32 %v2879_v25, %v3359_v3  ;;  %v3467_v12 = vmul.f32 %v2913_v22, %v3379_v4 }
  0x77   :  { %6526 = vst [vmem:[#allocation204_spill] sm:$0xff] %v3441_v27  ;;  %6527 = vst [vmem:[#allocation205_spill] sm:$0xff] %v3444_v62  ;;  %v3471_v23 = vmul.f32 %v2921_v44, %v3379_v4  ;;  %v3478_v3 = vmul.f32 %v2925_v43, %v3381_v8  ;;  %v3482_v2 = vmul.f32 %v2929_v42, %v3381_v8 }
  0x78   :  { %6528 = vst [vmem:[#allocation206_spill] sm:$0xff] %v3447_v19  ;;  %6529 = vst [vmem:[#allocation207_spill] sm:$0xff] %v3451_v32  ;;  %v3490_v4 = vmul.f32 %v2968_v38, %v3383_v5  ;;  %v3499_v43 = vmul.f32 %v2983_v21, %v3383_v5  ;;  %v3511_v38 = vmul.f32 %v3007_v1, %v3400_v34 }
  0x79   :  { %6530 = vst [vmem:[#allocation208_spill] sm:$0xff] %v3455_v10  ;;  %6531 = vst [vmem:[#allocation209_spill] sm:$0xff] %v3459_v28  ;;  %v96_v10 = vld [vmem:[%s6073_s1 + $0x20] sm:$0x7f]  ;;  %v3537_v28 = vld [vmem:[%s6073_s1 + $0x30] sm:$0x7f] }
  0x7a   :  { %6532 = vst [vmem:[#allocation210_spill] sm:$0xff] %v3463_v46  ;;  %6533 = vst [vmem:[#allocation211_spill] sm:$0xff] %v3467_v12  ;;  %v3486_v46 = vmul.f32 %v2964_v0, %v3381_v8  ;;  %v3507_v8 = vmul.f32 %v2997_v41, %v3400_v34  ;;  %v3528_v41 = vrot.slane %v96_v10, %v2774_v37  ;;  %v1023_v12 = vld [vmem:[#allocation2 + $0x86] sm:$0xff] }
  0x7b   :  { %6534 = vst [vmem:[#allocation212_spill] sm:$0xff] %v3471_v23  ;;  %6535 = vst [vmem:[#allocation213_spill] sm:$0xff] %v3478_v3  ;;  %v3495_v23 = vld [vmem:[%s6073_s1 + $0x28] sm:$0x7f]  ;;  %v3545_v32 = vrot.slane %v96_v10, %v2804_v47  ;;  %v3548_v19 = vrot.slane %v96_v10, %v2807_v48  ;;  %v3551_v62 = vrot.slane %v96_v10, %v2810_v49 }
  0x7c   :  { %6536 = vst [vmem:[#allocation214_spill] sm:$0xff] %v3482_v2  ;;  %6537 = vst [vmem:[#allocation215_spill] sm:$0xff] %v3486_v46  ;;  %v3503_v2 = vmul.f32 %v2993_v63, %v3383_v5  ;;  %v3513_v46 = vld [vmem:[#allocation2 + $0x82] sm:$0xff]  ;;  %v3522_v5 = vrot.slane %v96_v10, %v2655_v6  ;;  %v3566_v51 = vrot.slane %v3495_v23, %v2810_v49 }
  0x7d   :  { %6538 = vst [vmem:[#allocation216_spill] sm:$0xff] %v3490_v4  ;;  %6539 = vst [vmem:[#allocation217_spill] sm:$0xff] %v3499_v43  ;;  %v253_v4 = vld [vmem:[#allocation2 + $0x81] sm:$0xff]  ;;  %v3519_v43 = vmul.f32 %v3011_v58, %v3400_v34  ;;  %v3562_v59 = vmul.f32 %v3528_v41, %v3513_v46  ;;  %v3588_v15 = vrot.slane %v3537_v28, %v2810_v49 }
  0x7e   :  { %6540 = vst [vmem:[#allocation218_spill] sm:$0xff] %v3503_v2  ;;  %6541 = vst [vmem:[#allocation219_spill] sm:$0xff] %v3507_v8  ;;  %v3515_v3 = vld [vmem:[#allocation2 + $0x83] sm:$0xff]  ;;  %v3525_v2 = vrot.slane %v96_v10, %v2771_v36  ;;  %v3609_v24 = vmul.f32 %v2826_v54, %v253_v4  ;;  %v3612_v52 = vmul.f32 %v3352_v35, %v253_v4 }
  0x7f   :  { %6542 = vst [vmem:[#allocation220_spill] sm:$0xff] %v3511_v38  ;;  %6543 = vst [vmem:[#allocation221_spill] sm:$0xff] %v3513_v46  ;;  %v3530_v8 = vld [vmem:[#allocation2 + $0x84] sm:$0xff]  ;;  %v3603_v49 = vmul.f32 %v3588_v15, %v1023_v12 }
  0x80   :  { %6544 = vst [vmem:[#allocation222_spill] sm:$0xff] %v3515_v3  ;;  %6545 = vst [vmem:[#allocation223_spill] sm:$0xff] %v3519_v43  ;;  %v3532_v38 = vld [vmem:[#allocation2 + $0x85] sm:$0xff]  ;;  %v3542_v43 = vrot.slane %v96_v10, %v2797_v45  ;;  %v3558_v20 = vmul.f32 %v3525_v2, %v253_v4  ;;  %v3574_v10 = vmul.f32 %v3545_v32, %v3530_v8 }
  0x81   :  { %6546 = vst [vmem:[#allocation224_spill] sm:$0xff] %v3522_v5  ;;  %6547 = vst [vmem:[#allocation225_spill] sm:$0xff] %v3525_v2  ;;  %v3539_v34 = vld [vmem:[#allocation2 + $0x80] sm:$0xff] }
  0x82   :  { %6548 = vst [vmem:[#allocation226_spill] sm:$0xff] %v3528_v41  ;;  %6549 = vst [vmem:[#allocation227_spill] sm:$0xff] %v3530_v8  ;;  %v3555_v27 = vmul.f32 %v3522_v5, %v3539_v34  ;;  %v3570_v7 = vmul.f32 %v3542_v43, %v3515_v3 }
  0x83   :  { %6550 = vst [vmem:[#allocation228_spill] sm:$0xff] %v3532_v38  ;;  %6551 = vst [vmem:[#allocation229_spill] sm:$0xff] %v3537_v28  ;;  %v3606_v28 = vmul.f32 %v2822_v53, %v253_v4  ;;  %v3630_v53 = vmul.f32 %v3362_v60, %v3513_v46  ;;  %v3632_v4 = vld [vmem:[#allocation2 + $0xb5] sm:$0xff] }
  0x84   :  { %6552 = vst [vmem:[#allocation230_spill] sm:$0xff] %v3539_v34  ;;  %6553 = vst [vmem:[#allocation231_spill] sm:$0xff] %v3542_v43 }
  0x85   :  { %6554 = vst [vmem:[#allocation232_spill] sm:$0xff] %v3545_v32  ;;  %6555 = vst [vmem:[#allocation233_spill] sm:$0xff] %v3548_v19 }
  0x86   :  { %6556 = vst [vmem:[#allocation234_spill] sm:$0xff] %v3551_v62  ;;  %6557 = vst [vmem:[#allocation235_spill] sm:$0xff] %v3555_v27  ;;  %v3578_v27 = vmul.f32 %v3548_v19, %v3532_v38 }
  0x87   :  { %6558 = vst [vmem:[#allocation236_spill] sm:$0xff] %v3558_v20  ;;  %6559 = vst [vmem:[#allocation237_spill] sm:$0xff] %v3562_v59  ;;  %v3581_v20 = vmul.f32 %v3551_v62, %v1023_v12  ;;  %v3584_v59 = vmul.f32 %v3566_v51, %v1023_v12 }
  0x88   :  { %6560 = vst [vmem:[#allocation238_spill] sm:$0xff] %v3566_v51  ;;  %6561 = vst [vmem:[#allocation239_spill] sm:$0xff] %v3570_v7  ;;  %v136_v7 = vmul.f32 %v2743_v26, %v3539_v34  ;;  %v3636_v26 = vmul.f32 %v3528_v41, %v3121_v61 }
  0x89   :  { %6562 = vst [vmem:[#allocation240_spill] sm:$0xff] %v3574_v10  ;;  %6563 = vst [vmem:[#allocation241_spill] sm:$0xff] %v3578_v27  ;;  %v155_v10 = vmul.f32 %v2780_v40, %v3539_v34  ;;  %v162_v27 = vadd.f32 %v154_v16, %v3334_v18  ;;  %v3614_v18 = vld [vmem:[#allocation2 + $0xb4] sm:$0xff]  ;;  %v3618_v16 = vmul.f32 %v3525_v2, %v3069_v17 }
  0x8a   :  { %6564 = vst [vmem:[#allocation242_spill] sm:$0xff] %v3581_v20  ;;  %6565 = vst [vmem:[#allocation243_spill] sm:$0xff] %v3584_v59  ;;  %v174_v20 = vmul.f32 %v3349_v56, %v3539_v34  ;;  %v3600_v59 = vmul.f32 %v3522_v5, %v2812_v50  ;;  %v3622_v34 = vmul.f32 %v2879_v25, %v3513_v46 }
  0x8b   :  { %6566 = vst [vmem:[#allocation244_spill] sm:$0xff] %v3588_v15  ;;  %6567 = vst [vmem:[#allocation245_spill] sm:$0xff] %v3603_v49  ;;  %v3626_v49 = vmul.f32 %v2893_v39, %v3513_v46  ;;  %v3644_v25 = vmul.f32 %v2921_v44, %v3515_v3  ;;  %v1026_v46 = vld [vmem:[#allocation2 + $0xb6] sm:$0xff] }
  0x8c   :  { %6568 = vst [vmem:[#allocation246_spill] sm:$0xff] %v3609_v24  ;;  %6569 = vst [vmem:[#allocation247_spill] sm:$0xff] %v3612_v52  ;;  %v563_v52 = vld [vmem:[#allocation2 + $0xa3] sm:$0xff] }
  0x8d   :  { %6570 = vst [vmem:[#allocation248_spill] sm:$0xff] %v3618_v16  ;;  %6571 = vst [vmem:[#allocation249_spill] sm:$0xff] %v3622_v34  ;;  %v3640_v16 = vmul.f32 %v2913_v22, %v3515_v3  ;;  %v3652_v34 = vmul.f32 %v3542_v43, %v3143_v14  ;;  %v3660_v22 = vmul.f32 %v2964_v0, %v3530_v8 }
  0x8e   :  { %6572 = vst [vmem:[#allocation250_spill] sm:$0xff] %v3626_v49  ;;  %6573 = vst [vmem:[#allocation251_spill] sm:$0xff] %v3630_v53  ;;  %v3648_v49 = vmul.f32 %v3398_v57, %v3515_v3  ;;  %v1027_v53 = vld [vmem:[#allocation2 + $0xc6] sm:$0xff]  ;;  %v1028_v3 = vld [vmem:[#allocation2 + $0xd6] sm:$0xff] }
  0x8f   :  { %6574 = vst [vmem:[#allocation252_spill] sm:$0xff] %v3636_v26  ;;  %6575 = vst [vmem:[#allocation253_spill] sm:$0xff] %v3640_v16  ;;  %v3656_v26 = vmul.f32 %v2929_v42, %v3530_v8  ;;  %v3676_v42 = vmul.f32 %v2993_v63, %v3532_v38 }
  0x90   :  { %6576 = vst [vmem:[#allocation254_spill] sm:$0xff] %v3644_v25  ;;  %6577 = vst [vmem:[#allocation255_spill] sm:$0xff] %v3648_v49  ;;  %v3664_v25 = vmul.f32 %v3365_v13, %v3530_v8  ;;  %v3668_v49 = vmul.f32 %v3545_v32, %v3614_v18  ;;  %v3684_v8 = vmul.f32 %v3548_v19, %v3632_v4 }
  0x91   :  { %6578 = vst [vmem:[#allocation256_spill] sm:$0xff] %v3652_v34  ;;  %6579 = vst [vmem:[#allocation257_spill] sm:$0xff] %v3656_v26  ;;  %v3672_v34 = vmul.f32 %v2983_v21, %v3532_v38  ;;  %v3693_v21 = vmul.f32 %v3386_v33, %v1023_v12  ;;  %v3766_v26 = vrot.slane %v3495_v23, %v2774_v37 }
  0x92   :  { %6580 = vst [vmem:[#allocation258_spill] sm:$0xff] %v3660_v22  ;;  %6581 = vst [vmem:[#allocation259_spill] sm:$0xff] %v3664_v25  ;;  %v3680_v22 = vmul.f32 %v3368_v31, %v3532_v38  ;;  %v3687_v25 = vmul.f32 %v3007_v1, %v1023_v12  ;;  %v3701_v38 = vmul.f32 %v3566_v51, %v1026_v46 }
  0x93   :  { %6582 = vst [vmem:[#allocation260_spill] sm:$0xff] %v3668_v49  ;;  %6583 = vst [vmem:[#allocation261_spill] sm:$0xff] %v3672_v34  ;;  %v3690_v49 = vmul.f32 %v3011_v58, %v1023_v12  ;;  %v3695_v34 = vld [vmem:[#allocation2 + $0x90] sm:$0xff]  ;;  %v3707_v1 = vmul.f32 %v3588_v15, %v1026_v46  ;;  %v3715_v12 = vmul.f32 %v3588_v15, %v1028_v3 }
  0x94   :  { %6584 = vst [vmem:[#allocation262_spill] sm:$0xff] %v3676_v42  ;;  %6585 = vst [vmem:[#allocation263_spill] sm:$0xff] %v3680_v22  ;;  %v3698_v42 = vmul.f32 %v3551_v62, %v1026_v46  ;;  %v3704_v22 = vmul.f32 %v3566_v51, %v1027_v53  ;;  %v175_v46 = vmul.f32 %v3349_v56, %v3695_v34 }
  0x95   :  { %6586 = vst [vmem:[#allocation264_spill] sm:$0xff] %v3684_v8  ;;  %6587 = vst [vmem:[#allocation265_spill] sm:$0xff] %v3687_v25  ;;  %v3709_v25 = vld [vmem:[#allocation2 + $0x91] sm:$0xff]  ;;  %v3730_v3 = vrot.slane %v3495_v23, %v2655_v6 }
  0x96   :  { %6588 = vst [vmem:[#allocation266_spill] sm:$0xff] %v3690_v49  ;;  %6589 = vst [vmem:[#allocation267_spill] sm:$0xff] %v3693_v21  ;;  %v3712_v49 = vmul.f32 %v3588_v15, %v1027_v53  ;;  %v144_v21 = vadd.f32 %v136_v7, %v3414_v29  ;;  %v3718_v8 = vld [vmem:[#allocation2 + $0x92] sm:$0xff]  ;;  %v3738_v7 = vmul.f32 %v3352_v35, %v3709_v25 }
  0x97   :  { %6590 = vst [vmem:[#allocation268_spill] sm:$0xff] %v3695_v34  ;;  %6591 = vst [vmem:[#allocation269_spill] sm:$0xff] %v3698_v42  ;;  %v163_v42 = vadd.f32 %v155_v10, %v143_v55  ;;  %v3726_v53 = vld [vmem:[#allocation2 + $0x93] sm:$0xff]  ;;  %v3734_v55 = vmul.f32 %v2826_v54, %v3709_v25  ;;  %v3748_v29 = vrot.slane %v3495_v23, %v2771_v36 }
  0x98   :  { %6592 = vst [vmem:[#allocation270_spill] sm:$0xff] %v3701_v38  ;;  %6593 = vst [vmem:[#allocation271_spill] sm:$0xff] %v3704_v22  ;;  %v182_v38 = vadd.f32 %v174_v20, %v162_v27  ;;  %v156_v22 = vmul.f32 %v2780_v40, %v3695_v34  ;;  %v3742_v20 = vmul.f32 %v3525_v2, %v3709_v25  ;;  %v3744_v27 = vld [vmem:[#allocation2 + $0x94] sm:$0xff] }
  0x99   :  { %6594 = vst [vmem:[#allocation272_spill] sm:$0xff] %v3707_v1  ;;  %6595 = vst [vmem:[#allocation273_spill] sm:$0xff] %v3709_v25  ;;  %v194_v1 = vmul.f32 %v3522_v5, %v3695_v34  ;;  %v3752_v10 = vmul.f32 %v2893_v39, %v3718_v8  ;;  %v213_v54 = vmul.f32 %v3730_v3, %v3695_v34 }
  0x9a   :  { %6596 = vst [vmem:[#allocation274_spill] sm:$0xff] %v3712_v49  ;;  %6597 = vst [vmem:[#allocation275_spill] sm:$0xff] %v3715_v12  ;;  %v3756_v12 = vmul.f32 %v3362_v60, %v3718_v8  ;;  %v3760_v49 = vmul.f32 %v3528_v41, %v3718_v8  ;;  %v3770_v16 = vmul.f32 %v2921_v44, %v3726_v53 }
  0x9b   :  { %6598 = vst [vmem:[#allocation276_spill] sm:$0xff] %v3718_v8  ;;  %6599 = vst [vmem:[#allocation277_spill] sm:$0xff] %v3726_v53  ;;  %v3774_v39 = vmul.f32 %v3398_v57, %v3726_v53  ;;  %v3784_v34 = vmul.f32 %v3542_v43, %v3726_v53  ;;  %v3792_v44 = vmul.f32 %v2964_v0, %v3744_v27 }
  0x9c   :  { %6600 = vst [vmem:[#allocation278_spill] sm:$0xff] %v3730_v3  ;;  %6601 = vst [vmem:[#allocation279_spill] sm:$0xff] %v3734_v55  ;;  %v3808_v40 = vrot.slane %v3495_v23, %v2804_v47 }
  0x9d   :  { %6602 = vst [vmem:[#allocation280_spill] sm:$0xff] %v3738_v7  ;;  %6603 = vst [vmem:[#allocation281_spill] sm:$0xff] %v3742_v20  ;;  %v409_v20 = vld [vmem:[#allocation2 + $0xa2] sm:$0xff] }
  0x9e   :  { %6604 = vst [vmem:[#allocation282_spill] sm:$0xff] %v3744_v27  ;;  %6605 = vst [vmem:[#allocation283_spill] sm:$0xff] %v3748_v29 }
  0x9f   :  { %6606 = vst [vmem:[#allocation284_spill] sm:$0xff] %v3752_v10  ;;  %6607 = vst [vmem:[#allocation285_spill] sm:$0xff] %v3756_v12  ;;  %v3776_v12 = vld [vmem:[#allocation2 + $0x95] sm:$0xff]  ;;  %v3788_v10 = vrot.slane %v3495_v23, %v2797_v45 }
  0xa0   :  { %6608 = vst [vmem:[#allocation286_spill] sm:$0xff] %v3760_v49  ;;  %6609 = vst [vmem:[#allocation287_spill] sm:$0xff] %v3766_v26  ;;  %v3780_v49 = vmul.f32 %v3748_v29, %v3709_v25  ;;  %v3800_v25 = vmul.f32 %v3365_v13, %v3744_v27 }
  0xa1   :  { %6610 = vst [vmem:[#allocation288_spill] sm:$0xff] %v3770_v16  ;;  %6611 = vst [vmem:[#allocation289_spill] sm:$0xff] %v3774_v39  ;;  %v1024_v16 = vld [vmem:[#allocation2 + $0x96] sm:$0xff]  ;;  %v3796_v39 = vmul.f32 %v3766_v26, %v3718_v8  ;;  %v3812_v0 = vmul.f32 %v3788_v10, %v3726_v53  ;;  %v3816_v8 = vmul.f32 %v2993_v63, %v3776_v12 }
  0xa2   :  { %6612 = vst [vmem:[#allocation290_spill] sm:$0xff] %v3776_v12  ;;  %6613 = vst [vmem:[#allocation291_spill] sm:$0xff] %v3784_v34  ;;  %v3804_v34 = vmul.f32 %v3545_v32, %v3744_v27  ;;  %v3832_v53 = vrot.slane %v3495_v23, %v2807_v48  ;;  %v161_v63 = vadd.f32 %v3307_v30, %v3280_v11  ;;  %v3856_v30 = vld [vmem:[#allocation2 + $0xc4] sm:$0xff] }
  0xa3   :  { %6614 = vst [vmem:[#allocation292_spill] sm:$0xff] %v3788_v10  ;;  %6615 = vst [vmem:[#allocation293_spill] sm:$0xff] %v3792_v44  ;;  %v3820_v44 = vmul.f32 %v3368_v31, %v3776_v12 }
  0xa4   :  { %6616 = vst [vmem:[#allocation294_spill] sm:$0xff] %v3796_v39  ;;  %6617 = vst [vmem:[#allocation295_spill] sm:$0xff] %v3800_v25  ;;  %v3824_v25 = vmul.f32 %v3548_v19, %v3776_v12  ;;  %v3853_v23 = vmul.f32 %v3832_v53, %v3776_v12  ;;  %v181_v11 = vadd.f32 %v3407_v9, %v161_v63  ;;  %v6638_v63 = vld [vmem:[#allocation229_spill] sm:$0xff]  ;;  %v6639_v12 = vld [vmem:[#allocation118_spill] sm:$0xff] }
  0xa5   :  { %6618 = vst [vmem:[#allocation296_spill] sm:$0xff] %v3804_v34  ;;  %6619 = vst [vmem:[#allocation297_spill] sm:$0xff] %v3808_v40  ;;  %v3828_v34 = vmul.f32 %v3808_v40, %v3744_v27  ;;  %v3849_v27 = vmul.f32 %v3588_v15, %v1024_v16  ;;  %v3891_v39 = vmul.f32 %v3788_v10, %v3143_v14 }
  0xa6   :  { %6620 = vst [vmem:[#allocation298_spill] sm:$0xff] %v3812_v0  ;;  %6621 = vst [vmem:[#allocation299_spill] sm:$0xff] %v3816_v8  ;;  %v3835_v0 = vmul.f32 %v3011_v58, %v1024_v16  ;;  %v3843_v8 = vmul.f32 %v3551_v62, %v1024_v16  ;;  %v164_v58 = vadd.f32 %v156_v22, %v144_v21  ;;  %v109_v21 = vld [vmem:[#allocation2 + $0xa0] sm:$0xff] }
  0xa7   :  { %6622 = vst [vmem:[#allocation300_spill] sm:$0xff] %v3820_v44  ;;  %6623 = vst [vmem:[#allocation301_spill] sm:$0xff] %v3824_v25  ;;  %v3840_v44 = vmul.f32 %v3386_v33, %v1024_v16  ;;  %v3846_v25 = vmul.f32 %v3566_v51, %v1024_v16  ;;  %v3868_v16 = vmul.f32 %v3748_v29, %v3069_v17  ;;  %v6637_v22 = vld [vmem:[#allocation235_spill] sm:$0xff] }
  0xa8   :  { %6624 = vst [vmem:[#allocation302_spill] sm:$0xff] %v3828_v34  ;;  %6625 = vst [vmem:[#allocation303_spill] sm:$0xff] %v3832_v53  ;;  %v6632_v34 = vld [vmem:[#allocation38_spill] sm:$0xff]  ;;  %v176_v7 = vmul.f32 %v3349_v56, %v109_v21  ;;  %v214_v55 = vmul.f32 %v3730_v3, %v109_v21 }
  0xa9   :  { %6626 = vst [vmem:[#allocation304_spill] sm:$0xff] %v3835_v0  ;;  %6627 = vst [vmem:[#allocation305_spill] sm:$0xff] %v3840_v44  ;;  %v183_v0 = vadd.f32 %v175_v46, %v163_v42  ;;  %v202_v44 = vadd.f32 %v194_v1, %v182_v38  ;;  %v6634_v42 = vld [vmem:[#allocation108_spill] sm:$0xff]  ;;  %v3878_v1 = vmul.f32 %v3766_v26, %v3121_v61 }
  0xaa   :  { %6628 = vst [vmem:[#allocation306_spill] sm:$0xff] %v3843_v8  ;;  %6629 = vst [vmem:[#allocation307_spill] sm:$0xff] %v3846_v25  ;;  %v3860_v8 = vmul.f32 %v3730_v3, %v2812_v50  ;;  %v3864_v25 = vmul.f32 %v3730_v3, %v6632_v34  ;;  %v3874_v9 = vmul.f32 %v3748_v29, %v6634_v42 }
  0xab   :  { %6630 = vst [vmem:[#allocation308_spill] sm:$0xff] %v3849_v27  ;;  %6631 = vst [vmem:[#allocation309_spill] sm:$0xff] %v3853_v23  ;;  %v3870_v27 = vld [vmem:[#allocation2 + $0xc5] sm:$0xff]  ;;  %v201_v38 = vadd.f32 %v6637_v22, %v181_v11  ;;  %v3883_v46 = vrot.slane %v6638_v63, %v2655_v6  ;;  %v3887_v23 = vmul.f32 %v3766_v26, %v6639_v12 }
  0xac   :  { %6633 = vst [vmem:[#allocation38_spill] sm:$0xff] %v3868_v16  ;;  %6635 = vst [vmem:[#allocation108_spill] sm:$0xff] %v3874_v9  ;;  %v6642_v9 = vld [vmem:[#allocation128_spill] sm:$0xff]  ;;  %v3903_v22 = vmul.f32 %v3808_v40, %v3856_v30  ;;  %v3907_v6 = vmul.f32 %v3832_v53, %v3632_v4 }
  0xad   :  { %6636 = vst [vmem:[#allocation310_spill] sm:$0xff] %v3878_v1  ;;  %6640 = vst [vmem:[#allocation235_spill] sm:$0xff] %v3887_v23  ;;  %v3895_v16 = vmul.f32 %v3788_v10, %v6642_v9  ;;  %v3899_v1 = vmul.f32 %v3808_v40, %v3614_v18  ;;  %v255_v11 = vld [vmem:[#allocation2 + $0xa1] sm:$0xff]  ;;  %v221_v23 = vadd.f32 %v213_v54, %v201_v38 }
  0xae   :  { %6641 = vst [vmem:[#allocation229_spill] sm:$0xff] %v3891_v39  ;;  %6645 = vst [vmem:[#allocation311_spill] sm:$0xff] %v3903_v22  ;;  %v233_v39 = vmul.f32 %v3883_v46, %v109_v21  ;;  %v3918_v24 = vmul.f32 %v3352_v35, %v255_v11  ;;  %v3921_v54 = vmul.f32 %v3525_v2, %v255_v11  ;;  %v6650_v2 = vld [vmem:[#allocation148_spill] sm:$0xff] }
  0xaf   :  { %6643 = vst [vmem:[#allocation118_spill] sm:$0xff] %v3895_v16  ;;  %6644 = vst [vmem:[#allocation128_spill] sm:$0xff] %v3899_v1  ;;  %v3912_v16 = vmul.f32 %v3832_v53, %v3870_v27  ;;  %v195_v1 = vmul.f32 %v3522_v5, %v109_v21  ;;  %v3925_v38 = vrot.slane %v6638_v63, %v2771_v36 }
  0xb0   :  { %6646 = vst [vmem:[#allocation312_spill] sm:$0xff] %v3907_v6  ;;  %v241_v22 = vadd.f32 %v233_v39, %v221_v23  ;;  %v3931_v6 = vmul.f32 %v3362_v60, %v409_v20  ;;  %v3934_v21 = vmul.f32 %v3528_v41, %v409_v20  ;;  %v3938_v39 = vrot.slane %v6638_v63, %v2774_v37  ;;  %v717_v23 = vld [vmem:[#allocation2 + $0xa4] sm:$0xff] }
  0xb1   :  { %6647 = vst [vmem:[#allocation313_spill] sm:$0xff] %v3912_v16  ;;  %6648 = vst [vmem:[#allocation314_spill] sm:$0xff] %v3925_v38  ;;  %v3928_v16 = vmul.f32 %v3748_v29, %v255_v11  ;;  %v3942_v3 = vmul.f32 %v3925_v38, %v255_v11  ;;  %v3945_v36 = vmul.f32 %v3766_v26, %v409_v20  ;;  %v871_v11 = vld [vmem:[#allocation2 + $0xa5] sm:$0xff] }
  0xb2   :  { %6649 = vst [vmem:[#allocation315_spill] sm:$0xff] %v3938_v39  ;;  %v275_v35 = vadd.f32 %v6650_v2, %v241_v22  ;;  %v3948_v29 = vmul.f32 %v3398_v57, %v563_v52  ;;  %v3951_v60 = vmul.f32 %v3938_v39, %v409_v20  ;;  %v3954_v41 = vmul.f32 %v3542_v43, %v563_v52  ;;  %v6656_v22 = vld [vmem:[#allocation156_spill] sm:$0xff] }
  0xb3   :  { %6651 = vst [vmem:[#allocation148_spill] sm:$0xff] %v3945_v36  ;;  %v3957_v37 = vmul.f32 %v3788_v10, %v563_v52  ;;  %v3961_v2 = vrot.slane %v6638_v63, %v2797_v45  ;;  %v3965_v5 = vmul.f32 %v3365_v13, %v717_v23  ;;  %v3968_v57 = vmul.f32 %v3545_v32, %v717_v23  ;;  %v6657_v45 = vld [vmem:[#allocation168_spill] sm:$0xff]  ;;  %v6702_v32 = vld [vmem:[#allocation39_spill] sm:$0xff]  ;;  %v6703_v13 = vld [vmem:[#allocation38_spill] sm:$0xff] }
  0xb4   :  { %6652 = vst [vmem:[#allocation316_spill] sm:$0xff] %v3948_v29  ;;  %6653 = vst [vmem:[#allocation317_spill] sm:$0xff] %v3954_v41  ;;  %v295_v26 = vadd.f32 %v6656_v22, %v275_v35  ;;  %v184_v20 = vadd.f32 %v176_v7, %v164_v58  ;;  %v203_v41 = vadd.f32 %v195_v1, %v183_v0  ;;  %v6662_v0 = vld [vmem:[#allocation198_spill] sm:$0xff]  ;;  %v6663_v7 = vld [vmem:[#allocation43_spill] sm:$0xff] }
  0xb5   :  { %6654 = vst [vmem:[#allocation318_spill] sm:$0xff] %v3957_v37  ;;  %6655 = vst [vmem:[#allocation319_spill] sm:$0xff] %v3961_v2  ;;  %v3971_v43 = vmul.f32 %v3961_v2, %v563_v52  ;;  %v222_v10 = vadd.f32 %v214_v55, %v202_v44  ;;  %v234_v37 = vmul.f32 %v3883_v46, %v2812_v50 }
  0xb6   :  { %v315_v29 = vadd.f32 %v6657_v45, %v295_v26  ;;  %v3977_v36 = vmul.f32 %v3808_v40, %v717_v23  ;;  %v3981_v35 = vrot.slane %v6638_v63, %v2804_v47  ;;  %v3984_v22 = vmul.f32 %v3368_v31, %v871_v11  ;;  %v1025_v26 = vld [vmem:[#allocation2 + $0xa6] sm:$0xff]  ;;  %v6701_v40 = vld [vmem:[#allocation34_spill] sm:$0xff] }
  0xb7   :  { %v3987_v58 = vmul.f32 %v3548_v19, %v871_v11  ;;  %v3990_v44 = vmul.f32 %v3832_v53, %v871_v11  ;;  %v3994_v50 = vrot.slane %v6638_v63, %v2807_v48  ;;  %v235_v45 = vmul.f32 %v3883_v46, %v6632_v34  ;;  %v6664_v63 = vld [vmem:[#allocation236_spill] sm:$0xff] }
  0xb8   :  { %6658 = vst [vmem:[#allocation156_spill] sm:$0xff] %v3981_v35  ;;  %v335_v52 = vadd.f32 %v6662_v0, %v315_v29  ;;  %v4000_v55 = vmul.f32 %v3981_v35, %v717_v23  ;;  %v236_v1 = vmul.f32 %v3883_v46, %v6663_v7  ;;  %v204_v47 = vadd.f32 %v3600_v59, %v184_v20  ;;  %v6669_v59 = vld [vmem:[#allocation7_spill] sm:$0xff]  ;;  %v6671_v20 = vld [vmem:[#allocation10_spill] sm:$0xff] }
  0xb9   :  { %6659 = vst [vmem:[#allocation168_spill] sm:$0xff] %v3987_v58  ;;  %6660 = vst [vmem:[#allocation320_spill] sm:$0xff] %v3990_v44  ;;  %v223_v53 = vadd.f32 %v3860_v8, %v203_v41  ;;  %v242_v19 = vadd.f32 %v234_v37, %v222_v10  ;;  %v4008_v31 = vmul.f32 %v3386_v33, %v1025_v26  ;;  %v2585_v23 = vmov -inf   ;;  %v6670_v10 = vld [vmem:[#allocation9_spill] sm:$0xff]  ;;  %v6672_v0 = vld [vmem:[#allocation11_spill] sm:$0xff] }
  0xba   :  { %6661 = vst [vmem:[#allocation321_spill] sm:$0xff] %v3994_v50  ;;  %v355_v48 = vadd.f32 %v6664_v63, %v335_v52  ;;  %v4011_v34 = vmul.f32 %v3551_v62, %v1025_v26  ;;  %v224_v29 = vadd.f32 %v3864_v25, %v204_v47  ;;  %65 = vst.msk [vmem:[#allocation3 + $0x10] sm:$0xff] %vm23_vm0, %v2585_v23  ;;  %v6668_v25 = vld [vmem:[#allocation162_spill] sm:$0xff]  ;;  %v6674_v52 = vld [vmem:[#allocation13_spill] sm:$0xff] }
  0xbb   :  { %6665 = vst [vmem:[#allocation198_spill] sm:$0xff] %v4008_v31  ;;  %62 = vst.msk [vmem:[#allocation3] sm:$0xff] %vm23_vm0, %v2585_v23  ;;  %v4035_v8 = vmul.f32 %v3994_v50, %v871_v11  ;;  %v4038_v37 = vmul.f32 %v3566_v51, %v1025_v26  ;;  %v243_v47 = vadd.f32 %v235_v45, %v223_v53  ;;  %v6673_v11 = vld [vmem:[#allocation12_spill] sm:$0xff]  ;;  %v6675_v53 = vld [vmem:[#allocation17_spill] sm:$0xff] }
  0xbc   :  { %6666 = vst [vmem:[#allocation43_spill] sm:$0xff] %v4011_v34  ;;  %67 = vst.msk [vmem:[#allocation3 + $0x20] sm:$0xff] %vm23_vm0, %v2585_v23  ;;  %v276_v41 = vadd.f32 %v6668_v25, %v242_v19  ;;  %v6676_v19 = vld [vmem:[#allocation18_spill] sm:$0xff]  ;;  %v375_v45 = vadd.f32 %v3780_v49, %v355_v48  ;;  %v4059_v7 = vmul.f32 %v3588_v15, %v1025_v26  ;;  %v6681_v26 = vld [vmem:[#allocation204_spill] sm:$0xff] }
  0xbd   :  { %69 = vst.msk [vmem:[#allocation3 + $0x30] sm:$0xff] %vm23_vm0, %v2585_v23  ;;  %71 = vst.msk [vmem:[#allocation3 + $0x40] sm:$0xff] %vm23_vm0, %v2585_v23  ;;  %v388_v63 = vmul.f32 %v3925_v38, %v3069_v17  ;;  %v566_v25 = vld [vmem:[#allocation2 + $0xd3] sm:$0xff]  ;;  %v4072_v49 = vmul.f32 %v3938_v39, %v3121_v61  ;;  %v4076_v17 = vmul.f32 %v3938_v39, %v6639_v12  ;;  %v6692_v15 = vld [vmem:[#allocation280_spill] sm:$0xff] }
  0xbe   :  { %73 = vst.msk [vmem:[#allocation3 + $0x50] sm:$0xff] %vm23_vm0, %v2585_v23  ;;  %75 = vst.msk [vmem:[#allocation3 + $0x60] sm:$0xff] %vm23_vm0, %v2585_v23  ;;  %v395_v48 = vadd.f32 %v3942_v3, %v375_v45  ;;  %v6683_v3 = vld [vmem:[#allocation205_spill] sm:$0xff]  ;;  %v6684_v45 = vld [vmem:[#allocation206_spill] sm:$0xff]  ;;  %v4092_v12 = vmul.f32 %v3961_v2, %v6642_v9 }
  0xbf   :  { %77 = vst.msk [vmem:[#allocation3 + $0x70] sm:$0xff] %vm23_vm0, %v2585_v23  ;;  %79 = vst.msk [vmem:[#allocation3 + $0x80] sm:$0xff] %vm23_vm0, %v2585_v23  ;;  %v6697_v33 = vld [vmem:[#allocation133_spill] sm:$0xff]  ;;  %v6708_v34 = vld [vmem:[#allocation163_spill] sm:$0xff] }
  0xc0   :  { %81 = vst.msk [vmem:[#allocation3 + $0x90] sm:$0xff] %vm23_vm0, %v2585_v23  ;;  %6667 = vst [vmem:[#allocation236_spill] sm:$0xff] %v4038_v37  ;;  %v6707_v37 = vld [vmem:[#allocation108_spill] sm:$0xff] }
  0xc1   :  { %66 = vst.msk [vmem:[#allocation3 + $0x18] sm:$0x3] %vm63_vm2, %v2585_v23  ;;  %64 = vst.msk [vmem:[#allocation3 + $0x8] sm:$0x3] %vm63_vm2, %v2585_v23 }
  0xc2   :  { %68 = vst.msk [vmem:[#allocation3 + $0x28] sm:$0x3] %vm63_vm2, %v2585_v23  ;;  %70 = vst.msk [vmem:[#allocation3 + $0x38] sm:$0x3] %vm63_vm2, %v2585_v23 }
  0xc3   :  { %72 = vst.msk [vmem:[#allocation3 + $0x48] sm:$0x3] %vm63_vm2, %v2585_v23  ;;  %74 = vst.msk [vmem:[#allocation3 + $0x58] sm:$0x3] %vm63_vm2, %v2585_v23 }
  0xc4   :  { %76 = vst.msk [vmem:[#allocation3 + $0x68] sm:$0x3] %vm63_vm2, %v2585_v23  ;;  %78 = vst.msk [vmem:[#allocation3 + $0x78] sm:$0x3] %vm63_vm2, %v2585_v23 }
  0xc5   :  { %80 = vst.msk [vmem:[#allocation3 + $0x88] sm:$0x3] %vm63_vm2, %v2585_v23  ;;  %82 = vst.msk [vmem:[#allocation3 + $0x98] sm:$0x3] %vm63_vm2, %v2585_v23  ;;  %v244_v23 = vadd.f32 %v236_v1, %v224_v29  ;;  %v6682_v29 = vld [vmem:[#allocation123_spill] sm:$0xff] }
  0xc6   :  { %84 = vst.msk [vmem:[#allocation3 + $0x11] sm:$0xff] %vm23_vm0, %v6669_v59  ;;  %85 = vst.msk [vmem:[#allocation3 + $0x21] sm:$0xff] %vm23_vm0, %v6670_v10  ;;  %v389_v59 = vmul.f32 %v3925_v38, %v6634_v42  ;;  %v6678_v10 = vld [vmem:[#allocation113_spill] sm:$0xff] }
  0xc7   :  { %86 = vst.msk [vmem:[#allocation3 + $0x31] sm:$0xff] %vm23_vm0, %v6671_v20  ;;  %87 = vst.msk [vmem:[#allocation3 + $0x41] sm:$0xff] %vm23_vm0, %v6672_v0  ;;  %v390_v20 = vmul.f32 %v3925_v38, %v6678_v10  ;;  %v6679_v0 = vld [vmem:[#allocation174_spill] sm:$0xff]  ;;  %v278_v1 = vadd.f32 %v6681_v26, %v244_v23  ;;  %v4095_v23 = vmul.f32 %v3961_v2, %v566_v25  ;;  %v4098_v26 = vld [vmem:[#allocation2 + $0x30] sm:$0xff] }
  0xc8   :  { %88 = vst.msk [vmem:[#allocation3 + $0x51] sm:$0xff] %vm23_vm0, %v6673_v11  ;;  %89 = vst.msk [vmem:[#allocation3 + $0x61] sm:$0xff] %vm23_vm0, %v6674_v52  ;;  %v277_v11 = vadd.f32 %v6679_v0, %v243_v47  ;;  %v6680_v52 = vld [vmem:[#allocation175_spill] sm:$0xff]  ;;  %v720_v42 = vld [vmem:[#allocation2 + $0xd4] sm:$0xff]  ;;  %v4085_v47 = vmul.f32 %v3961_v2, %v3143_v14  ;;  %v4102_v14 = vmul.f32 %v3981_v35, %v3614_v18 }
  0xc9   :  { %90 = vst.msk [vmem:[#allocation3 + $0x71] sm:$0xff] %vm23_vm0, %v6675_v53  ;;  %91 = vst.msk [vmem:[#allocation3 + $0x81] sm:$0xff] %vm23_vm0, %v6676_v19  ;;  %v296_v53 = vadd.f32 %v6680_v52, %v276_v41  ;;  %v4081_v19 = vmul.f32 %v3938_v39, %v6682_v29  ;;  %v6685_v10 = vld [vmem:[#allocation150_spill] sm:$0xff]  ;;  %v298_v52 = vadd.f32 %v3606_v28, %v278_v1  ;;  %v6687_v29 = vld [vmem:[#allocation247_spill] sm:$0xff] }
  0xca   :  { %6677 = vst [vmem:[#allocation162_spill] sm:$0xff] %v4059_v7  ;;  %v297_v41 = vadd.f32 %v6683_v3, %v277_v11  ;;  %v429_v0 = vadd.f32 %v6685_v10, %v395_v48  ;;  %v4106_v11 = vmul.f32 %v3981_v35, %v3856_v30  ;;  %v874_v3 = vld [vmem:[#allocation2 + $0xd5] sm:$0xff]  ;;  %v4112_v10 = vmul.f32 %v3981_v35, %v720_v42  ;;  %v6690_v18 = vld [vmem:[#allocation279_spill] sm:$0xff] }
  0xcb   :  { %v316_v61 = vadd.f32 %v6684_v45, %v296_v53  ;;  %v6686_v53 = vld [vmem:[#allocation246_spill] sm:$0xff]  ;;  %v6688_v45 = vld [vmem:[#allocation157_spill] sm:$0xff]  ;;  %v4116_v28 = vmul.f32 %v3994_v50, %v3632_v4  ;;  %v318_v1 = vadd.f32 %v6690_v18, %v298_v52  ;;  %v4121_v30 = vmul.f32 %v3994_v50, %v3870_v27  ;;  %v6696_v27 = vld [vmem:[#allocation19_spill] sm:$0xff] }
  0xcc   :  { %v317_v48 = vadd.f32 %v6686_v53, %v297_v41  ;;  %v449_v25 = vadd.f32 %v6688_v45, %v429_v0  ;;  %v6693_v53 = vld [vmem:[#allocation281_spill] sm:$0xff]  ;;  %v120_v18 = vmul.f32 %v6696_v27, %v4098_v26  ;;  %v6704_v2 = vld [vmem:[#allocation35_spill] sm:$0xff] }
  0xcd   :  { %v336_v9 = vadd.f32 %v6687_v29, %v316_v61  ;;  %6689 = vst [vmem:[#allocation7_spill] sm:$0xff] %v4116_v28  ;;  %6691 = vst [vmem:[#allocation9_spill] sm:$0xff] %v4121_v30  ;;  %v6694_v29 = vld [vmem:[#allocation20_spill] sm:$0xff]  ;;  %v6695_v45 = vld [vmem:[#allocation169_spill] sm:$0xff]  ;;  %v338_v51 = vadd.f32 %v3918_v24, %v318_v1 }
  0xce   :  { %v337_v41 = vadd.f32 %v6692_v15, %v317_v48  ;;  %v131_v0 = vmul.f32 %v6694_v29, %v4098_v26  ;;  %v469_v42 = vadd.f32 %v6695_v45, %v449_v25  ;;  %v4129_v62 = vld [vmem:[#allocation3 + $0x20] sm:$0xff]  ;;  %v4131_v4 = vld [vmem:[#allocation3 + $0x30] sm:$0xff]  ;;  %v132_v15 = vmul.f32 %v6694_v29, %v6697_v33  ;;  %v6700_v45 = vld [vmem:[#allocation248_spill] sm:$0xff] }
  0xcf   :  { %v356_v61 = vadd.f32 %v6693_v53, %v336_v9  ;;  %v4133_v52 = vld [vmem:[#allocation3 + $0x40] sm:$0xff]  ;;  %v4140_v48 = vmul.f32 %v3994_v50, %v874_v3  ;;  %v1194_v24 = vmax.f32 %v4129_v62, %v4131_v4  ;;  %v358_v35 = vadd.f32 %v6700_v45, %v338_v51  ;;  %v4173_v38 = vld [vmem:[#allocation3 + $0x31] sm:$0xff] }
  0xd0   :  { %v357_v9 = vadd.f32 %v3921_v54, %v337_v41  ;;  %v6699_v1 = vld [vmem:[#allocation199_spill] sm:$0xff]  ;;  %v1195_v27 = vmax.f32 %v4131_v4, %v4133_v52  ;;  %v138_v29 = vadd.f32 %v6702_v32, %v6701_v40  ;;  %v139_v54 = vadd.f32 %v131_v0, %v6704_v2  ;;  %v1183_v32 = vld [vmem:[#allocation3 + $0x10] sm:$0xff]  ;;  %v6709_v2 = vld [vmem:[#allocation138_spill] sm:$0xff] }
  0xd1   :  { %6698 = vst [vmem:[#allocation10_spill] sm:$0xff] %v4140_v48  ;;  %v376_v25 = vadd.f32 %v3928_v16, %v356_v61  ;;  %v489_v53 = vadd.f32 %v6699_v1, %v469_v42  ;;  %v6705_v16 = vld [vmem:[#allocation24_spill] sm:$0xff]  ;;  %v6706_v61 = vld [vmem:[#allocation237_spill] sm:$0xff]  ;;  %v378_v42 = vadd.f32 %v6707_v37, %v358_v35  ;;  %v140_v1 = vadd.f32 %v132_v15, %v120_v18  ;;  %v1182_v40 = vld [vmem:[#allocation3] sm:$0xff] }
  0xd2   :  { %v377_v3 = vadd.f32 %v6703_v13, %v357_v9  ;;  %v150_v41 = vmul.f32 %v6705_v16, %v4098_v26  ;;  %v151_v51 = vmul.f32 %v6705_v16, %v6697_v33  ;;  %v1187_v13 = vld [vmem:[#allocation3 + $0x50] sm:$0xff]  ;;  %v152_v0 = vmul.f32 %v6705_v16, %v6709_v2  ;;  %v6710_v9 = vld [vmem:[#allocation294_spill] sm:$0xff]  ;;  %v4165_v35 = vld [vmem:[#allocation3 + $0x21] sm:$0xff] }
  0xd3   :  { %v396_v50 = vadd.f32 %v388_v63, %v376_v25  ;;  %v509_v39 = vadd.f32 %v6706_v61, %v489_v53  ;;  %v1202_v63 = vmax.f32 %v1194_v24, %v4133_v52  ;;  %v398_v53 = vadd.f32 %v390_v20, %v378_v42  ;;  %v6711_v37 = vld [vmem:[#allocation40_spill] sm:$0xff]  ;;  %v6712_v18 = vld [vmem:[#allocation41_spill] sm:$0xff]  ;;  %v6715_v20 = vld [vmem:[#allocation207_spill] sm:$0xff] }
  0xd4   :  { %v397_v45 = vadd.f32 %v389_v59, %v377_v3  ;;  %v1203_v61 = vmax.f32 %v1195_v27, %v1187_v13  ;;  %v4169_v15 = vadd.f32 %v6712_v18, %v6711_v37  ;;  %v6713_v59 = vld [vmem:[#allocation176_spill] sm:$0xff]  ;;  %v4175_v24 = vadd.f32 %v150_v41, %v138_v29  ;;  %v1188_v42 = vld [vmem:[#allocation3 + $0x60] sm:$0xff]  ;;  %v6717_v48 = vld [vmem:[#allocation209_spill] sm:$0xff] }
  0xd5   :  { %v430_v31 = vadd.f32 %v6708_v34, %v396_v50  ;;  %v529_v25 = vadd.f32 %v6710_v9, %v509_v39  ;;  %v6714_v34 = vld [vmem:[#allocation177_spill] sm:$0xff]  ;;  %v4177_v7 = vadd.f32 %v151_v51, %v139_v54  ;;  %v432_v27 = vadd.f32 %v6715_v20, %v398_v53  ;;  %v6716_v37 = vld [vmem:[#allocation208_spill] sm:$0xff]  ;;  %v6718_v54 = vld [vmem:[#allocation151_spill] sm:$0xff] }
  0xd6   :  { %v431_v50 = vadd.f32 %v6713_v59, %v397_v45  ;;  %v1192_v16 = vmax.f32 %v1182_v40, %v1183_v32  ;;  %v4181_v9 = vadd.f32 %v152_v0, %v140_v1  ;;  %v1189_v59 = vld [vmem:[#allocation3 + $0x70] sm:$0xff]  ;;  %v4188_v29 = vmul.f32 %v3349_v56, %v4098_v26  ;;  %v6720_v0 = vld [vmem:[#allocation250_spill] sm:$0xff]  ;;  %v6723_v20 = vld [vmem:[#allocation284_spill] sm:$0xff] }
  0xd7   :  { %v450_v3 = vadd.f32 %v6714_v34, %v430_v31  ;;  %v549_v39 = vadd.f32 %v3951_v60, %v529_v25  ;;  %v1220_v31 = vmax.f32 %v1202_v63, %v4165_v35  ;;  %v6719_v60 = vld [vmem:[#allocation249_spill] sm:$0xff]  ;;  %v1221_v40 = vmax.f32 %v1203_v61, %v4173_v38  ;;  %v6722_v26 = vld [vmem:[#allocation158_spill] sm:$0xff] }
  0xd8   :  { %v451_v18 = vadd.f32 %v6716_v37, %v431_v50  ;;  %v452_v51 = vadd.f32 %v6719_v60, %v432_v27  ;;  %v4195_v1 = vmul.f32 %v3349_v56, %v6697_v33  ;;  %v1190_v50 = vld [vmem:[#allocation3 + $0x80] sm:$0xff]  ;;  %v1196_v63 = vmax.f32 %v4133_v52, %v1187_v13  ;;  %v6724_v27 = vld [vmem:[#allocation285_spill] sm:$0xff]  ;;  %v6726_v52 = vld [vmem:[#allocation170_spill] sm:$0xff] }
  0xd9   :  { %v470_v45 = vadd.f32 %v6717_v48, %v450_v3  ;;  %v583_v41 = vadd.f32 %v6718_v54, %v549_v39  ;;  %v6721_v48 = vld [vmem:[#allocation251_spill] sm:$0xff]  ;;  %v1197_v34 = vmax.f32 %v1187_v13, %v1188_v42  ;;  %v1198_v37 = vmax.f32 %v1188_v42, %v1189_v59  ;;  %v6725_v54 = vld [vmem:[#allocation286_spill] sm:$0xff]  ;;  %v1191_v30 = vld [vmem:[#allocation3 + $0x90] sm:$0xff] }
  0xda   :  { %v471_v25 = vadd.f32 %v6720_v0, %v451_v18  ;;  %v472_v39 = vadd.f32 %v6723_v20, %v452_v51  ;;  %v4204_v61 = vmul.f32 %v3349_v56, %v6709_v2  ;;  %v1193_v18 = vmax.f32 %v1183_v32, %v4129_v62  ;;  %v6727_v20 = vld [vmem:[#allocation148_spill] sm:$0xff]  ;;  %v1213_v58 = vld [vmem:[#allocation3 + $0x51] sm:$0xff] }
  0xdb   :  { %v490_v53 = vadd.f32 %v6721_v48, %v470_v45  ;;  %v603_v3 = vadd.f32 %v6722_v26, %v583_v41  ;;  %v1212_v45 = vld [vmem:[#allocation3 + $0x41] sm:$0xff]  ;;  %v1228_v0 = vmax.f32 %v1220_v31, %v4173_v38  ;;  %v1199_v48 = vmax.f32 %v1189_v59, %v1190_v50 }
  0xdc   :  { %v491_v33 = vadd.f32 %v6724_v27, %v471_v25  ;;  %v492_v41 = vadd.f32 %v3931_v6, %v472_v39  ;;  %v1229_v51 = vmax.f32 %v1221_v40, %v1212_v45  ;;  %v1204_v28 = vmax.f32 %v1196_v63, %v1188_v42  ;;  %v6728_v27 = vld [vmem:[#allocation200_spill] sm:$0xff]  ;;  %v6731_v42 = vld [vmem:[#allocation239_spill] sm:$0xff] }
  0xdd   :  { %v510_v60 = vadd.f32 %v6725_v54, %v490_v53  ;;  %v623_v13 = vadd.f32 %v6726_v52, %v603_v3  ;;  %v1205_v25 = vmax.f32 %v1197_v34, %v1189_v59  ;;  %v6729_v54 = vld [vmem:[#allocation252_spill] sm:$0xff]  ;;  %v1200_v44 = vmax.f32 %v1192_v16, %v4129_v62  ;;  %v6730_v3 = vld [vmem:[#allocation310_spill] sm:$0xff]  ;;  %v6732_v63 = vld [vmem:[#allocation235_spill] sm:$0xff] }
  0xde   :  { %v511_v26 = vadd.f32 %v3934_v21, %v491_v33  ;;  %v512_v32 = vadd.f32 %v6729_v54, %v492_v41  ;;  %v1206_v31 = vmax.f32 %v1198_v37, %v1190_v50  ;;  %v1208_v40 = vld [vmem:[#allocation3 + $0x1] sm:$0xff]  ;;  %v1201_v21 = vmax.f32 %v1193_v18, %v4131_v4  ;;  %v4228_v4 = vld [vmem:[#allocation3 + $0x32] sm:$0xff] }
  0xdf   :  { %v530_v2 = vadd.f32 %v6727_v20, %v510_v60  ;;  %v643_v53 = vadd.f32 %v6728_v27, %v623_v13  ;;  %v4220_v39 = vld [vmem:[#allocation3 + $0x61] sm:$0xff]  ;;  %v1236_v33 = vmax.f32 %v1228_v0, %v1212_v45  ;;  %v1209_v60 = vld [vmem:[#allocation3 + $0x11] sm:$0xff]  ;;  %v1207_v13 = vmax.f32 %v1199_v48, %v1191_v30 }
  0xe0   :  { %v531_v52 = vadd.f32 %v6730_v3, %v511_v26  ;;  %v532_v34 = vadd.f32 %v6732_v63, %v512_v32  ;;  %v1237_v41 = vmax.f32 %v1229_v51, %v1213_v58  ;;  %v4224_v62 = vld [vmem:[#allocation3 + $0x22] sm:$0xff]  ;;  %v1222_v26 = vmax.f32 %v1204_v28, %v1212_v45  ;;  %v6734_v18 = vld [vmem:[#allocation298_spill] sm:$0xff]  ;;  %v6736_v51 = vld [vmem:[#allocation185_spill] sm:$0xff] }
  0xe1   :  { %v550_v6 = vadd.f32 %v4072_v49, %v530_v2  ;;  %v663_v59 = vadd.f32 %v6731_v42, %v643_v53  ;;  %v6733_v50 = vld [vmem:[#allocation164_spill] sm:$0xff]  ;;  %v1215_v49 = vld [vmem:[#allocation3 + $0x71] sm:$0xff]  ;;  %v1223_v20 = vmax.f32 %v1205_v25, %v1213_v58  ;;  %v1218_v27 = vmax.f32 %v1200_v44, %v1208_v40  ;;  %v6735_v30 = vld [vmem:[#allocation179_spill] sm:$0xff] }
  0xe2   :  { %v551_v16 = vadd.f32 %v4076_v17, %v531_v52  ;;  %v552_v2 = vadd.f32 %v4081_v19, %v532_v34  ;;  %v1224_v53 = vmax.f32 %v1206_v31, %v4220_v39  ;;  %v1219_v32 = vmax.f32 %v1201_v21, %v1209_v60  ;;  %v6737_v28 = vld [vmem:[#allocation210_spill] sm:$0xff]  ;;  %v6739_v19 = vld [vmem:[#allocation212_spill] sm:$0xff]  ;;  %v6741_v21 = vld [vmem:[#allocation253_spill] sm:$0xff] }
  0xe3   :  { %v584_v37 = vadd.f32 %v6733_v50, %v550_v6  ;;  %v683_v0 = vadd.f32 %v6734_v18, %v663_v59  ;;  %v1254_v17 = vmax.f32 %v1236_v33, %v4224_v62  ;;  %v1225_v25 = vmax.f32 %v1207_v13, %v1215_v49  ;;  %v6738_v6 = vld [vmem:[#allocation211_spill] sm:$0xff]  ;;  %v6740_v63 = vld [vmem:[#allocation152_spill] sm:$0xff]  ;;  %v6742_v50 = vld [vmem:[#allocation254_spill] sm:$0xff] }
  0xe4   :  { %v585_v48 = vadd.f32 %v6735_v30, %v551_v16  ;;  %v586_v45 = vadd.f32 %v6737_v28, %v552_v2  ;;  %v1255_v52 = vmax.f32 %v1237_v41, %v4228_v4  ;;  %v1216_v40 = vld [vmem:[#allocation3 + $0x81] sm:$0xff]  ;;  %v1230_v31 = vmax.f32 %v1222_v26, %v1213_v58 }
  0xe5   :  { %v604_v54 = vadd.f32 %v6736_v51, %v584_v37  ;;  %v703_v3 = vadd.f32 %v3971_v43, %v683_v0  ;;  %v1231_v59 = vmax.f32 %v1223_v20, %v4220_v39  ;;  %v4244_v33 = vmax.f32 %v1218_v27, %v1209_v60  ;;  %v6743_v13 = vld [vmem:[#allocation255_spill] sm:$0xff]  ;;  %v6745_v20 = vld [vmem:[#allocation288_spill] sm:$0xff]  ;;  %v6746_v60 = vld [vmem:[#allocation289_spill] sm:$0xff] }
  0xe6   :  { %v605_v42 = vadd.f32 %v6738_v6, %v585_v48  ;;  %v606_v16 = vadd.f32 %v6741_v21, %v586_v45  ;;  %v1232_v43 = vmax.f32 %v1224_v53, %v1215_v49  ;;  %v4249_v41 = vmax.f32 %v1219_v32, %v4165_v35  ;;  %v1246_v0 = vld [vmem:[#allocation3 + $0x42] sm:$0xff] }
  0xe7   :  { %v624_v44 = vadd.f32 %v6739_v19, %v604_v54  ;;  %v737_v34 = vadd.f32 %v6740_v63, %v703_v3  ;;  %v1262_v2 = vmax.f32 %v1254_v17, %v4228_v4  ;;  %v6744_v58 = vld [vmem:[#allocation159_spill] sm:$0xff]  ;;  %v4254_v48 = vmax.f32 %v1225_v25, %v1216_v40  ;;  %v4258_v3 = vld [vmem:[#allocation3 + $0x91] sm:$0xff] }
  0xe8   :  { %v625_v37 = vadd.f32 %v6742_v50, %v605_v42  ;;  %v626_v30 = vadd.f32 %v6745_v20, %v606_v16  ;;  %v1263_v51 = vmax.f32 %v1255_v52, %v1246_v0  ;;  %v6747_v53 = vld [vmem:[#allocation291_spill] sm:$0xff]  ;;  %v1238_v28 = vmax.f32 %v1230_v31, %v4220_v39  ;;  %v6749_v42 = vld [vmem:[#allocation316_spill] sm:$0xff]  ;;  %v4265_v25 = vld [vmem:[#allocation3 + $0x52] sm:$0xff] }
  0xe9   :  { %v644_v18 = vadd.f32 %v6743_v13, %v624_v44  ;;  %v757_v26 = vadd.f32 %v6744_v58, %v737_v34  ;;  %v1239_v32 = vmax.f32 %v1231_v59, %v1215_v49  ;;  %v6748_v45 = vld [vmem:[#allocation171_spill] sm:$0xff]  ;;  %v1234_v19 = vmax.f32 %v4244_v33, %v4165_v35  ;;  %v6750_v52 = vld [vmem:[#allocation317_spill] sm:$0xff]  ;;  %v6751_v34 = vld [vmem:[#allocation318_spill] sm:$0xff] }
  0xea   :  { %v645_v27 = vadd.f32 %v6746_v60, %v625_v37  ;;  %v646_v17 = vadd.f32 %v6749_v42, %v626_v30  ;;  %v1240_v44 = vmax.f32 %v1232_v43, %v1216_v40  ;;  %v1235_v16 = vmax.f32 %v4249_v41, %v4173_v38  ;;  %v4271_v50 = vld [vmem:[#allocation3 + $0x62] sm:$0xff]  ;;  %v6752_v49 = vld [vmem:[#allocation201_spill] sm:$0xff]  ;;  %v6756_v60 = vld [vmem:[#allocation118_spill] sm:$0xff] }
  0xeb   :  { %v664_v54 = vadd.f32 %v6747_v53, %v644_v18  ;;  %v777_v6 = vadd.f32 %v6748_v45, %v757_v26  ;;  %v4273_v39 = vmax.f32 %v1262_v2, %v1246_v0  ;;  %v6753_v59 = vld [vmem:[#allocation256_spill] sm:$0xff]  ;;  %v1241_v40 = vmax.f32 %v4254_v48, %v4258_v3  ;;  %v6754_v13 = vld [vmem:[#allocation229_spill] sm:$0xff]  ;;  %v6800_v3 = vld [vmem:[#allocation262_spill] sm:$0xff] }
  0xec   :  { %v665_v63 = vadd.f32 %v6750_v52, %v645_v27  ;;  %v666_v37 = vadd.f32 %v6753_v59, %v646_v17  ;;  %v4280_v43 = vmax.f32 %v1263_v51, %v4265_v25  ;;  %v4284_v26 = vmax.f32 %v1238_v28, %v1246_v0  ;;  %v6755_v2 = vld [vmem:[#allocation240_spill] sm:$0xff]  ;;  %v6759_v28 = vld [vmem:[#allocation302_spill] sm:$0xff] }
  0xed   :  { %v684_v21 = vadd.f32 %v6751_v34, %v664_v54  ;;  %v797_v31 = vadd.f32 %v6752_v49, %v777_v6  ;;  %v4287_v20 = vmax.f32 %v1239_v32, %v4265_v25  ;;  %v4292_v53 = vmax.f32 %v1240_v44, %v4271_v50  ;;  %v6757_v54 = vld [vmem:[#allocation153_spill] sm:$0xff]  ;;  %v6762_v49 = vld [vmem:[#allocation224_spill] sm:$0xff]  ;;  %v6850_v38 = vld [vmem:[#allocation66_spill] sm:$0xff] }
  0xee   :  { %v685_v18 = vadd.f32 %v6754_v13, %v665_v63  ;;  %v686_v27 = vadd.f32 %v6756_v60, %v666_v37  ;;  %v172_v51 = vmul.f32 %v3349_v56, %v6757_v54  ;;  %v6758_v6 = vld [vmem:[#allocation165_spill] sm:$0xff]  ;;  %v178_v0 = vadd.f32 %v4195_v1, %v4175_v24  ;;  %v6760_v56 = vld [vmem:[#allocation186_spill] sm:$0xff]  ;;  %v6848_v35 = vld [vmem:[#allocation64_spill] sm:$0xff] }
  0xef   :  { %v704_v58 = vadd.f32 %v4085_v47, %v684_v21  ;;  %v817_v30 = vadd.f32 %v6755_v2, %v797_v31  ;;  %v177_v47 = vadd.f32 %v4188_v29, %v4169_v15  ;;  %v179_v44 = vadd.f32 %v4204_v61, %v4177_v7  ;;  %v2509_v21 = vld [vmem:[#allocation2 + $0x40] sm:$0xff]  ;;  %v2510_v15 = vld [vmem:[#allocation2 + $0x50] sm:$0xff]  ;;  %v6764_v7 = vld [vmem:[#allocation180_spill] sm:$0xff] }
  0xf0   :  { %v705_v45 = vadd.f32 %v4092_v12, %v685_v18  ;;  %v706_v17 = vadd.f32 %v4095_v23, %v686_v27  ;;  %v180_v52 = vadd.f32 %v172_v51, %v4181_v9  ;;  %v6761_v12 = vld [vmem:[#allocation187_spill] sm:$0xff]  ;;  %v189_v31 = vmul.f32 %v2509_v21, %v6762_v49  ;;  %v6763_v1 = vld [vmem:[#allocation213_spill] sm:$0xff]  ;;  %v6765_v61 = vld [vmem:[#allocation214_spill] sm:$0xff] }
  0xf1   :  { %v738_v42 = vadd.f32 %v6758_v6, %v704_v58  ;;  %v837_v32 = vadd.f32 %v6759_v28, %v817_v30  ;;  %v190_v29 = vmul.f32 %v2510_v15, %v6762_v49  ;;  %v2511_v23 = vld [vmem:[#allocation2 + $0x60] sm:$0xff]  ;;  %v192_v9 = vmul.f32 %v6762_v49, %v6764_v7  ;;  %v6767_v60 = vld [vmem:[#allocation154_spill] sm:$0xff]  ;;  %v6768_v54 = vld [vmem:[#allocation257_spill] sm:$0xff] }
  0xf2   :  { %v739_v63 = vadd.f32 %v6760_v56, %v705_v45  ;;  %v740_v59 = vadd.f32 %v6763_v1, %v706_v17  ;;  %v191_v37 = vmul.f32 %v2511_v23, %v6762_v49  ;;  %v6766_v18 = vld [vmem:[#allocation215_spill] sm:$0xff]  ;;  %v197_v2 = vadd.f32 %v189_v31, %v177_v47  ;;  %v6769_v6 = vld [vmem:[#allocation258_spill] sm:$0xff]  ;;  %v6772_v21 = vld [vmem:[#allocation160_spill] sm:$0xff] }
  0xf3   :  { %v758_v34 = vadd.f32 %v6761_v12, %v738_v42  ;;  %v857_v24 = vadd.f32 %v4000_v55, %v837_v32  ;;  %v198_v30 = vadd.f32 %v190_v29, %v178_v0  ;;  %v200_v55 = vadd.f32 %v192_v9, %v180_v52  ;;  %v6770_v28 = vld [vmem:[#allocation259_spill] sm:$0xff]  ;;  %v6771_v17 = vld [vmem:[#allocation278_spill] sm:$0xff]  ;;  %v6773_v49 = vld [vmem:[#allocation293_spill] sm:$0xff] }
  0xf4   :  { %v759_v13 = vadd.f32 %v6765_v61, %v739_v63  ;;  %v760_v51 = vadd.f32 %v6768_v54, %v740_v59  ;;  %v199_v45 = vadd.f32 %v191_v37, %v179_v44  ;;  %v209_v56 = vmul.f32 %v2510_v15, %v6771_v17  ;;  %v6774_v0 = vld [vmem:[#allocation230_spill] sm:$0xff]  ;;  %v6775_v44 = vld [vmem:[#allocation295_spill] sm:$0xff]  ;;  %v6776_v29 = vld [vmem:[#allocation296_spill] sm:$0xff] }
  0xf5   :  { %v778_v58 = vadd.f32 %v6766_v18, %v758_v34  ;;  %v891_v27 = vadd.f32 %v6767_v60, %v857_v24  ;;  %v210_v12 = vmul.f32 %v2511_v23, %v6771_v17  ;;  %v211_v47 = vmul.f32 %v6771_v17, %v6764_v7  ;;  %v6777_v37 = vld [vmem:[#allocation172_spill] sm:$0xff]  ;;  %v6778_v54 = vld [vmem:[#allocation202_spill] sm:$0xff] }
  0xf6   :  { %v779_v42 = vadd.f32 %v6769_v6, %v759_v13  ;;  %v780_v34 = vadd.f32 %v6773_v49, %v760_v51  ;;  %v212_v31 = vmul.f32 %v6771_v17, %v6774_v0  ;;  %v217_v1 = vadd.f32 %v209_v56, %v197_v2  ;;  %v6779_v6 = vld [vmem:[#allocation260_spill] sm:$0xff]  ;;  %v6784_v49 = vld [vmem:[#allocation166_spill] sm:$0xff] }
  0xf7   :  { %v798_v32 = vadd.f32 %v6770_v28, %v778_v58  ;;  %v911_v63 = vadd.f32 %v6772_v21, %v891_v27  ;;  %v218_v59 = vadd.f32 %v210_v12, %v198_v30  ;;  %v219_v61 = vadd.f32 %v211_v47, %v199_v45  ;;  %v248_v45 = vld [vmem:[#allocation2 + $0x31] sm:$0xff] }
  0xf8   :  { %v799_v52 = vadd.f32 %v6775_v44, %v779_v42  ;;  %v800_v9 = vadd.f32 %v3965_v5, %v780_v34  ;;  %v220_v13 = vadd.f32 %v212_v31, %v200_v55  ;;  %v229_v60 = vmul.f32 %v2511_v23, %v3883_v46  ;;  %v6780_v42 = vld [vmem:[#allocation268_spill] sm:$0xff]  ;;  %v4351_v47 = vld [vmem:[#allocation3 + $0x72] sm:$0xff] }
  0xf9   :  { %v818_v24 = vadd.f32 %v6776_v29, %v798_v32  ;;  %v931_v15 = vadd.f32 %v6777_v37, %v911_v63  ;;  %v230_v27 = vmul.f32 %v3883_v46, %v6764_v7  ;;  %v231_v30 = vmul.f32 %v3883_v46, %v6774_v0  ;;  %v6781_v55 = vld [vmem:[#allocation128_spill] sm:$0xff]  ;;  %v6782_v32 = vld [vmem:[#allocation241_spill] sm:$0xff]  ;;  %v6783_v7 = vld [vmem:[#allocation311_spill] sm:$0xff] }
  0xfa   :  { %v819_v18 = vadd.f32 %v3968_v57, %v799_v52  ;;  %v820_v2 = vadd.f32 %v6779_v6, %v800_v9  ;;  %v232_v5 = vmul.f32 %v3883_v46, %v6780_v42  ;;  %v237_v28 = vadd.f32 %v229_v60, %v217_v1  ;;  %v6785_v46 = vld [vmem:[#allocation30_spill] sm:$0xff]  ;;  %v6786_v31 = vld [vmem:[#allocation52_spill] sm:$0xff]  ;;  %v6787_v52 = vld [vmem:[#allocation309_spill] sm:$0xff] }
  0xfb   :  { %v838_v58 = vadd.f32 %v3977_v36, %v818_v24  ;;  %v951_v51 = vadd.f32 %v6778_v54, %v931_v15  ;;  %v238_v23 = vadd.f32 %v230_v27, %v218_v59  ;;  %v239_v12 = vadd.f32 %v231_v30, %v219_v61  ;;  %v6788_v24 = vld [vmem:[#allocation53_spill] sm:$0xff]  ;;  %v6789_v59 = vld [vmem:[#allocation56_spill] sm:$0xff]  ;;  %v6795_v30 = vld [vmem:[#allocation218_spill] sm:$0xff] }
  0xfc   :  { %v839_v57 = vadd.f32 %v6781_v55, %v819_v18  ;;  %v840_v56 = vadd.f32 %v6783_v7, %v820_v2  ;;  %v240_v21 = vadd.f32 %v232_v5, %v220_v13  ;;  %v266_v0 = vmul.f32 %v6785_v46, %v248_v45  ;;  %v6790_v15 = vld [vmem:[#allocation192_spill] sm:$0xff]  ;;  %v6791_v61 = vld [vmem:[#allocation193_spill] sm:$0xff] }
  0xfd   :  { %v858_v36 = vadd.f32 %v4102_v14, %v838_v58  ;;  %v971_v17 = vadd.f32 %v6782_v32, %v951_v51  ;;  %v271_v44 = vadd.f32 %v6786_v31, %v237_v28  ;;  %v272_v1 = vadd.f32 %v6788_v24, %v238_v23  ;;  %v6792_v60 = vld [vmem:[#allocation216_spill] sm:$0xff]  ;;  %v6794_v6 = vld [vmem:[#allocation217_spill] sm:$0xff]  ;;  %v6799_v23 = vld [vmem:[#allocation58_spill] sm:$0xff] }
  0xfe   :  { %v859_v63 = vadd.f32 %v4106_v11, %v839_v57  ;;  %v860_v29 = vadd.f32 %v4112_v10, %v840_v56  ;;  %v273_v37 = vadd.f32 %v6789_v59, %v239_v12  ;;  %v1264_v13 = vmax.f32 %v4284_v26, %v4265_v25  ;;  %v6793_v54 = vld [vmem:[#allocation36_spill] sm:$0xff]  ;;  %v6796_v26 = vld [vmem:[#allocation57_spill] sm:$0xff] }
  0xff   :  { %v892_v34 = vadd.f32 %v6784_v49, %v858_v36  ;;  %v991_v14 = vadd.f32 %v6787_v52, %v971_v17  ;;  %v274_v18 = vadd.f32 %v266_v0, %v240_v21  ;;  %v4369_v10 = vmax.f32 %v1241_v40, %v4351_v47  ;;  %v2512_v5 = vld [vmem:[#allocation2 + $0x41] sm:$0xff]  ;;  %v6798_v36 = vld [vmem:[#allocation261_spill] sm:$0xff] }
 0x100   :  { %v893_v9 = vadd.f32 %v6790_v15, %v859_v63  ;;  %v894_v27 = vadd.f32 %v6792_v60, %v860_v29  ;;  %v285_v51 = vmul.f32 %v6793_v54, %v248_v45  ;;  %v286_v25 = vmul.f32 %v2512_v5, %v6793_v54  ;;  %v6801_v17 = vld [vmem:[#allocation263_spill] sm:$0xff]  ;;  %v6802_v21 = vld [vmem:[#allocation161_spill] sm:$0xff]  ;;  %v6807_v59 = vld [vmem:[#allocation60_spill] sm:$0xff] }
 0x101   :  { %v912_v11 = vadd.f32 %v6791_v61, %v892_v34  ;;  %v1011_v58 = vadd.f32 %v4035_v8, %v991_v14  ;;  %v291_v55 = vadd.f32 %v6796_v26, %v271_v44  ;;  %v6797_v8 = vld [vmem:[#allocation155_spill] sm:$0xff]  ;;  %v292_v32 = vadd.f32 %v6799_v23, %v272_v1  ;;  %v6804_v46 = vld [vmem:[#allocation37_spill] sm:$0xff]  ;;  %v6805_v44 = vld [vmem:[#allocation300_spill] sm:$0xff] }
 0x102   :  { %v913_v2 = vadd.f32 %v6794_v6, %v893_v9  ;;  %v914_v28 = vadd.f32 %v6798_v36, %v894_v27  ;;  %v293_v48 = vadd.f32 %v285_v51, %v273_v37  ;;  %v4382_v56 = vmax.f32 %v1264_v13, %v4271_v50  ;;  %v6803_v49 = vld [vmem:[#allocation299_spill] sm:$0xff]  ;;  %v6806_v14 = vld [vmem:[#allocation301_spill] sm:$0xff]  ;;  %v6810_v60 = vld [vmem:[#allocation320_spill] sm:$0xff] }
 0x103   :  { %v932_v42 = vadd.f32 %v6795_v30, %v912_v11  ;;  %v1045_v57 = vadd.f32 %v6797_v8, %v1011_v58  ;;  %v294_v12 = vadd.f32 %v286_v25, %v274_v18  ;;  %v304_v0 = vmul.f32 %v6804_v46, %v248_v45  ;;  %v2513_v24 = vld [vmem:[#allocation2 + $0x51] sm:$0xff]  ;;  %v6809_v18 = vld [vmem:[#allocation168_spill] sm:$0xff] }
 0x104   :  { %v933_v40 = vadd.f32 %v6800_v3, %v913_v2  ;;  %v934_v34 = vadd.f32 %v6803_v49, %v914_v28  ;;  %v305_v31 = vmul.f32 %v2512_v5, %v6804_v46  ;;  %v306_v1 = vmul.f32 %v2513_v24, %v6804_v46  ;;  %v6808_v15 = vld [vmem:[#allocation173_spill] sm:$0xff]  ;;  %v6811_v51 = vld [vmem:[#allocation178_spill] sm:$0xff]  ;;  %v6812_v2 = vld [vmem:[#allocation264_spill] sm:$0xff] }
 0x105   :  { %v952_v7 = vadd.f32 %v6801_v17, %v932_v42  ;;  %v1065_v63 = vadd.f32 %v6802_v21, %v1045_v57  ;;  %v311_v37 = vadd.f32 %v6807_v59, %v291_v55  ;;  %v312_v11 = vadd.f32 %v304_v0, %v292_v32  ;;  %v6813_v42 = vld [vmem:[#allocation203_spill] sm:$0xff]  ;;  %v6814_v8 = vld [vmem:[#allocation312_spill] sm:$0xff]  ;;  %v6820_v46 = vld [vmem:[#allocation225_spill] sm:$0xff] }
 0x106   :  { %v953_v52 = vadd.f32 %v6805_v44, %v933_v40  ;;  %v954_v61 = vadd.f32 %v3984_v22, %v934_v34  ;;  %v313_v13 = vadd.f32 %v305_v31, %v293_v48  ;;  %v314_v54 = vadd.f32 %v306_v1, %v294_v12  ;;  %v6815_v22 = vld [vmem:[#allocation7_spill] sm:$0xff]  ;;  %v6816_v48 = vld [vmem:[#allocation313_spill] sm:$0xff]  ;;  %v6817_v40 = vld [vmem:[#allocation242_spill] sm:$0xff] }
 0x107   :  { %v972_v29 = vadd.f32 %v6806_v14, %v952_v7  ;;  %v1085_v9 = vadd.f32 %v6808_v15, %v1065_v63  ;;  %v323_v6 = vmul.f32 %v6811_v51, %v248_v45  ;;  %v324_v26 = vmul.f32 %v2512_v5, %v6811_v51  ;;  %v2514_v28 = vld [vmem:[#allocation2 + $0x61] sm:$0xff]  ;;  %v6818_v12 = vld [vmem:[#allocation9_spill] sm:$0xff]  ;;  %v6821_v31 = vld [vmem:[#allocation10_spill] sm:$0xff] }
 0x108   :  { %v973_v58 = vadd.f32 %v6809_v18, %v953_v52  ;;  %v974_v30 = vadd.f32 %v6812_v2, %v954_v61  ;;  %v325_v55 = vmul.f32 %v2513_v24, %v6811_v51  ;;  %v326_v23 = vmul.f32 %v2514_v28, %v6811_v51  ;;  %v6819_v63 = vld [vmem:[#allocation167_spill] sm:$0xff]  ;;  %v6823_v59 = vld [vmem:[#allocation194_spill] sm:$0xff]  ;;  %v6824_v15 = vld [vmem:[#allocation197_spill] sm:$0xff] }
 0x109   :  { %v992_v27 = vadd.f32 %v6810_v60, %v972_v29  ;;  %v1105_v25 = vadd.f32 %v6813_v42, %v1085_v9  ;;  %v331_v32 = vadd.f32 %v323_v6, %v311_v37  ;;  %v332_v17 = vadd.f32 %v324_v26, %v312_v11  ;;  %v6822_v52 = vld [vmem:[#allocation307_spill] sm:$0xff]  ;;  %v2515_v11 = vld [vmem:[#allocation2 + $0x71] sm:$0xff]  ;;  %v6827_v6 = vld [vmem:[#allocation220_spill] sm:$0xff] }
 0x10a   :  { %v993_v57 = vadd.f32 %v6814_v8, %v973_v58  ;;  %v994_v3 = vadd.f32 %v6816_v48, %v974_v30  ;;  %v333_v7 = vadd.f32 %v325_v55, %v313_v13  ;;  %v334_v34 = vadd.f32 %v326_v23, %v314_v54  ;;  %v4418_v61 = vld [vmem:[%s6074_s2] ss:$0 sm:$0xff]  ;;  %v6826_v60 = vld [vmem:[#allocation162_spill] sm:$0xff]  ;;  %v6830_v8 = vld [vmem:[#allocation265_spill] sm:$0xff] }
 0x10b   :  { %v1012_v36 = vadd.f32 %v6815_v22, %v992_v27  ;;  %v1125_v45 = vadd.f32 %v6817_v40, %v1105_v25  ;;  %v343_v0 = vmul.f32 %v2512_v5, %v6820_v46  ;;  %v344_v29 = vmul.f32 %v2513_v24, %v6820_v46  ;;  %v6825_v18 = vld [vmem:[#allocation219_spill] sm:$0xff] }
 0x10c   :  { %v1013_v21 = vadd.f32 %v6818_v12, %v993_v57  ;;  %v1014_v44 = vadd.f32 %v6821_v31, %v994_v3  ;;  %v345_v1 = vmul.f32 %v2514_v28, %v6820_v46  ;;  %v346_v5 = vmul.f32 %v2515_v11, %v6820_v46  ;;  %v6828_v30 = vld [vmem:[#allocation223_spill] sm:$0xff]  ;;  %v6833_v12 = vld [vmem:[#allocation304_spill] sm:$0xff] }
 0x10d   :  { %v1046_v49 = vadd.f32 %v6819_v63, %v1012_v36  ;;  %v1145_v14 = vadd.f32 %v6822_v52, %v1125_v45  ;;  %v351_v13 = vadd.f32 %v343_v0, %v331_v32  ;;  %v352_v54 = vadd.f32 %v344_v29, %v332_v17  ;;  %v6829_v26 = vld [vmem:[#allocation283_spill] sm:$0xff]  ;;  %v6831_v32 = vld [vmem:[#allocation266_spill] sm:$0xff] }
 0x10e   :  { %v1047_v37 = vadd.f32 %v6823_v59, %v1013_v21  ;;  %v1048_v58 = vadd.f32 %v6825_v18, %v1014_v44  ;;  %v353_v51 = vadd.f32 %v345_v1, %v333_v7  ;;  %v354_v25 = vadd.f32 %v346_v5, %v334_v34  ;;  %v6832_v3 = vld [vmem:[#allocation267_spill] sm:$0xff]  ;;  %v6834_v34 = vld [vmem:[#allocation305_spill] sm:$0xff]  ;;  %v6835_v0 = vld [vmem:[#allocation306_spill] sm:$0xff] }
 0x10f   :  { %v1066_v9 = vadd.f32 %v6824_v15, %v1046_v49  ;;  %v1165_v27 = vadd.f32 %v6826_v60, %v1145_v14  ;;  %v363_v55 = vmul.f32 %v2513_v24, %v6829_v26  ;;  %v364_v36 = vmul.f32 %v2514_v28, %v6829_v26  ;;  %v2516_v45 = vld [vmem:[#allocation2 + $0x81] sm:$0xff]  ;;  %v6836_v52 = vld [vmem:[#allocation314_spill] sm:$0xff] }
 0x110   :  { %v1067_v2 = vadd.f32 %v6827_v6, %v1047_v37  ;;  %v1068_v57 = vadd.f32 %v6830_v8, %v1048_v58  ;;  %v365_v23 = vmul.f32 %v2515_v11, %v6829_v26  ;;  %v366_v17 = vmul.f32 %v2516_v45, %v6829_v26  ;;  %v6837_v29 = vld [vmem:[#allocation198_spill] sm:$0xff]  ;;  %v1242_v18 = vld [vmem:[#allocation3 + $0x2] sm:$0xff] }
 0x111   :  { %v1086_v42 = vadd.f32 %v6828_v30, %v1066_v9  ;;  %v1178_v22 = vadd.f32 %v4418_v61, %v1165_v27  ;;  %v371_v7 = vadd.f32 %v363_v55, %v351_v13  ;;  %v372_v63 = vadd.f32 %v364_v36, %v352_v54  ;;  %v6838_v9 = vld [vmem:[#allocation43_spill] sm:$0xff]  ;;  %v6839_v13 = vld [vmem:[#allocation236_spill] sm:$0xff]  ;;  %v1243_v58 = vld [vmem:[#allocation3 + $0x12] sm:$0xff] }
 0x112   :  { %v1087_v48 = vadd.f32 %v6831_v32, %v1067_v2  ;;  %v1088_v21 = vadd.f32 %v6833_v12, %v1068_v57  ;;  %v373_v49 = vadd.f32 %v365_v23, %v353_v51  ;;  %v374_v44 = vadd.f32 %v366_v17, %v354_v25  ;;  %v1250_v60 = vld [vmem:[#allocation3 + $0x82] sm:$0xff]  ;;  %v6840_v54 = vld [vmem:[#allocation273_spill] sm:$0xff]  ;;  %v6842_v25 = vld [vmem:[#allocation270_spill] sm:$0xff] }
 0x113   :  { %v1106_v40 = vadd.f32 %v6832_v3, %v1086_v42  ;;  %v1280_v24 = vadd.f32 %v4382_v56, %v1178_v22  ;;  %v383_v14 = vmul.f32 %v2514_v28, %v6836_v52  ;;  %v384_v37 = vmul.f32 %v2515_v11, %v6836_v52  ;;  %v6841_v51 = vld [vmem:[#allocation269_spill] sm:$0xff]  ;;  %v6843_v55 = vld [vmem:[#allocation272_spill] sm:$0xff]  ;;  %v6846_v17 = vld [vmem:[#allocation50_spill] sm:$0xff] }
 0x114   :  { %v1107_v46 = vadd.f32 %v6834_v34, %v1087_v48  ;;  %v1108_v1 = vadd.f32 %v6837_v29, %v1088_v21  ;;  %v385_v15 = vmul.f32 %v2516_v45, %v6836_v52  ;;  %v1265_v27 = vmax.f32 %v4287_v20, %v4271_v50  ;;  %v4449_v42 = vld [vmem:[#allocation2 + $0x32] sm:$0xff]  ;;  %v6844_v20 = vld [vmem:[#allocation271_spill] sm:$0xff] }
 0x115   :  { %v1126_v31 = vadd.f32 %v6835_v0, %v1106_v40  ;;  %v1288_v59 = vmax.f32 %v1280_v24, 0.0  ;;  %v386_v28 = vmul.f32 %v6836_v52, %v6840_v54  ;;  %v391_v11 = vadd.f32 %v383_v14, %v371_v7  ;;  %v6845_v48 = vld [vmem:[#allocation274_spill] sm:$0xff]  ;;  %v6847_v12 = vld [vmem:[#allocation275_spill] sm:$0xff] }
 0x116   :  { %v1127_v5 = vadd.f32 %v6838_v9, %v1107_v46  ;;  %v1128_v6 = vadd.f32 %v6841_v51, %v1108_v1  ;;  %v392_v2 = vadd.f32 %v384_v37, %v372_v63  ;;  %v393_v30 = vadd.f32 %v385_v15, %v373_v49  ;;  %v1251_v40 = vld [vmem:[#allocation3 + $0x92] sm:$0xff]  ;;  %v6851_v0 = vld [vmem:[#allocation51_spill] sm:$0xff]  ;;  %v6853_v9 = vld [vmem:[#allocation68_spill] sm:$0xff] }
 0x117   :  { %v1146_v56 = vadd.f32 %v6839_v13, %v1126_v31  ;;  %1296 = vst.msk [vmem:[#allocation2 + $0x73] sm:$0xff] %vm23_vm0, %v1288_v59  ;;  %v1266_v57 = vmax.f32 %v4292_v53, %v4351_v47  ;;  %v394_v50 = vadd.f32 %v386_v28, %v374_v44  ;;  %v1252_v36 = vmax.f32 %v1234_v19, %v1242_v18  ;;  %v6849_v19 = vld [vmem:[#allocation65_spill] sm:$0xff]  ;;  %v2517_v29 = vld [vmem:[#allocation2 + $0x42] sm:$0xff] }
 0x118   :  { %v1147_v26 = vadd.f32 %v6842_v25, %v1127_v5  ;;  %v1148_v22 = vadd.f32 %v6844_v20, %v1128_v6  ;;  %v1253_v23 = vmax.f32 %v1235_v16, %v1243_v58  ;;  %v1267_v32 = vmax.f32 %v4369_v10, %v1250_v60  ;;  %v6852_v37 = vld [vmem:[#allocation67_spill] sm:$0xff]  ;;  %v6861_v25 = vld [vmem:[#allocation54_spill] sm:$0xff] }
 0x119   :  { %v1166_v8 = vadd.f32 %v6843_v55, %v1146_v56  ;;  %v1273_v53 = vmax.f32 %v1265_v27, %v4351_v47  ;;  %v420_v7 = vmul.f32 %v6846_v17, %v4449_v42  ;;  %v425_v33 = vadd.f32 %v6848_v35, %v391_v11  ;;  %v4484_v18 = vld [vmem:[%s6073_s1 + $0x40] sm:$0x7f]  ;;  %v4493_v27 = vld [vmem:[%s6073_s1 + $0x48] sm:$0x7f]  ;;  %v4504_v11 = vld [vmem:[%s6073_s1 + $0x38] sm:$0x7f] }
 0x11a   :  { %v1167_v3 = vadd.f32 %v6845_v48, %v1147_v26  ;;  %v1168_v21 = vadd.f32 %v6847_v12, %v1148_v22  ;;  %v426_v24 = vadd.f32 %v6849_v19, %v392_v2  ;;  %v427_v41 = vadd.f32 %v6850_v38, %v393_v30  ;;  %6854 = vst [vmem:[#allocation11_spill] sm:$0xff] %v4484_v18  ;;  %v6859_v2 = vld [vmem:[#allocation29_spill] sm:$0xff] }
 0x11b   :  { %v1179_v45 = vadd.f32 %v4418_v61, %v1166_v8  ;;  %v1274_v10 = vmax.f32 %v1266_v57, %v1250_v60  ;;  %v428_v49 = vadd.f32 %v420_v7, %v394_v50  ;;  %v1260_v46 = vmax.f32 %v1252_v36, %v1243_v58  ;;  %v6855_v58 = vld [vmem:[#allocation23_spill] sm:$0xff]  ;;  %6856 = vst [vmem:[#allocation12_spill] sm:$0xff] %v4493_v27  ;;  %v2521_v20 = vld [vmem:[#allocation2 + $0x52] sm:$0xff] }
 0x11c   :  { %v1180_v16 = vadd.f32 %v4418_v61, %v1167_v3  ;;  %v1181_v34 = vadd.f32 %v4418_v61, %v1168_v21  ;;  %v1275_v47 = vmax.f32 %v1267_v32, %v1251_v40  ;;  %v439_v31 = vmul.f32 %v6851_v0, %v4449_v42  ;;  %6858 = vst [vmem:[#allocation17_spill] sm:$0xff] %v4504_v11  ;;  %v6865_v40 = vld [vmem:[#allocation14_spill] sm:$0xff]  ;;  %v6867_v21 = vld [vmem:[#allocation15_spill] sm:$0xff] }
 0x11d   :  { %v1281_v63 = vadd.f32 %v1273_v53, %v1179_v45  ;;  %v1261_v44 = vmax.f32 %v1253_v23, %v4224_v62  ;;  %v440_v1 = vmul.f32 %v2517_v29, %v6851_v0  ;;  %v445_v15 = vadd.f32 %v6852_v37, %v425_v33  ;;  %v6864_v23 = vld [vmem:[#allocation69_spill] sm:$0xff]  ;;  %v6866_v7 = vld [vmem:[#allocation182_spill] sm:$0xff]  ;;  %v6869_v33 = vld [vmem:[#allocation16_spill] sm:$0xff] }
 0x11e   :  { %v1282_v52 = vadd.f32 %v1274_v10, %v1180_v16  ;;  %v1283_v59 = vadd.f32 %v1275_v47, %v1181_v34  ;;  %v446_v5 = vadd.f32 %v6853_v9, %v426_v24  ;;  %v447_v13 = vadd.f32 %v439_v31, %v427_v41  ;;  %v4499_v6 = vld [vmem:[#allocation2 + $0x70] sm:$0xff]  ;;  %v6871_v24 = vld [vmem:[#allocation26_spill] sm:$0xff]  ;;  %v6873_v41 = vld [vmem:[#allocation27_spill] sm:$0xff] }
 0x11f   :  { %v1289_v14 = vmax.f32 %v1281_v63, 0.0  ;;  %v4488_v60 = vrot.slane %v4484_v18, %v6855_v58  ;;  %v4497_v54 = vrot.slane %v4493_v27, %v6855_v58  ;;  %v448_v28 = vadd.f32 %v440_v1, %v428_v49  ;;  %v4535_v53 = vld [vmem:[#allocation2 + $0x72] sm:$0xff]  ;;  %v6878_v34 = vld [vmem:[#allocation95_spill] sm:$0xff] }
 0x120   :  { %v1290_v56 = vmax.f32 %v1282_v52, 0.0  ;;  %v1291_v51 = vmax.f32 %v1283_v59, 0.0  ;;  %v4508_v30 = vrot.slane %v4504_v11, %v6859_v2  ;;  %v458_v26 = vmul.f32 %v6861_v25, %v4449_v42  ;;  %v6877_v63 = vld [vmem:[#allocation94_spill] sm:$0xff]  ;;  %v6885_v59 = vld [vmem:[#allocation107_spill] sm:$0xff] }
 0x121   :  { %1297 = vst.msk [vmem:[#allocation2 + $0x83] sm:$0xff] %vm23_vm0, %v1289_v14  ;;  %6857 = vst [vmem:[#allocation13_spill] sm:$0xff] %v4497_v54  ;;  %v459_v55 = vmul.f32 %v2517_v29, %v6861_v25  ;;  %v4514_v8 = vmax.f32 %v1260_v46, %v4224_v62  ;;  %v4519_v57 = vrot.slane %v4484_v18, %v6859_v2  ;;  %v4530_v62 = vld [vmem:[#allocation2 + $0x71] sm:$0xff] }
 0x122   :  { %6860 = vst [vmem:[#allocation18_spill] sm:$0xff] %v4508_v30  ;;  %1298 = vst.msk [vmem:[#allocation2 + $0x93] sm:$0xff] %vm23_vm0, %v1290_v56  ;;  %v4523_v50 = vrot.slane %v4493_v27, %v6859_v2  ;;  %v460_v22 = vmul.f32 %v2521_v20, %v6861_v25  ;;  %v4527_v36 = vmax.f32 %v1261_v44, %v4228_v4  ;;  %v4568_v47 = vld [vmem:[#allocation2 + $0x73] sm:$0xff]  ;;  %v6881_v44 = vld [vmem:[#allocation99_spill] sm:$0xff] }
 0x123   :  { %6862 = vst [vmem:[#allocation113_spill] sm:$0xff] %v4519_v57  ;;  %1299 = vst.msk [vmem:[#allocation2 + $0xa3] sm:$0xff] %vm23_vm0, %v1291_v51  ;;  %v465_v32 = vadd.f32 %v6864_v23, %v445_v15  ;;  %v466_v48 = vadd.f32 %v458_v26, %v446_v5  ;;  %v467_v3 = vadd.f32 %v459_v55, %v447_v13  ;;  %v6883_v14 = vld [vmem:[#allocation102_spill] sm:$0xff]  ;;  %v2522_v25 = vld [vmem:[#allocation2 + $0x62] sm:$0xff] }
 0x124   :  { %6863 = vst [vmem:[#allocation174_spill] sm:$0xff] %v4523_v50  ;;  %v1333_v45 = vmul.f32 %v6865_v40, %v4499_v6  ;;  %v468_v17 = vadd.f32 %v460_v22, %v448_v28  ;;  %v477_v12 = vmul.f32 %v6866_v7, %v4449_v42  ;;  %v478_v4 = vmul.f32 %v2517_v29, %v6866_v7  ;;  %v6875_v42 = vld [vmem:[#allocation28_spill] sm:$0xff]  ;;  %v6890_v55 = vld [vmem:[#allocation226_spill] sm:$0xff] }
 0x125   :  { %v4542_v35 = vmul.f32 %v6867_v21, %v4499_v6  ;;  %v4546_v19 = vmul.f32 %v6869_v33, %v4499_v6  ;;  %v4550_v38 = vmul.f32 %v6871_v24, %v4499_v6  ;;  %v4554_v16 = vmul.f32 %v6873_v41, %v4499_v6  ;;  %6880 = vst [vmem:[#allocation246_spill] sm:$0xff] %v4568_v47 }
 0x126   :  { %v4558_v10 = vmul.f32 %v6875_v42, %v4499_v6  ;;  %v4562_v49 = vmul.f32 %v6877_v63, %v4530_v62  ;;  %v4566_v46 = vmul.f32 %v6878_v34, %v4530_v62  ;;  %v479_v0 = vmul.f32 %v2521_v20, %v6866_v7 }
 0x127   :  { %6868 = vst [vmem:[#allocation175_spill] sm:$0xff] %v4542_v35  ;;  %6870 = vst [vmem:[#allocation204_spill] sm:$0xff] %v4546_v19  ;;  %v4575_v52 = vmul.f32 %v6881_v44, %v4530_v62  ;;  %v4579_v1 = vmul.f32 %v6883_v14, %v4530_v62  ;;  %v4583_v37 = vmul.f32 %v6885_v59, %v4535_v53 }
 0x128   :  { %6872 = vst [vmem:[#allocation123_spill] sm:$0xff] %v4550_v38  ;;  %6874 = vst [vmem:[#allocation205_spill] sm:$0xff] %v4554_v16  ;;  %v4571_v31 = vld [vmem:[#allocation2 + $0x80] sm:$0xff]  ;;  %v485_v15 = vadd.f32 %v477_v12, %v465_v32  ;;  %v4587_v9 = vmul.f32 %v4488_v60, %v4535_v53  ;;  %v4591_v5 = vmul.f32 %v4497_v54, %v4535_v53 }
 0x129   :  { %6876 = vst [vmem:[#allocation206_spill] sm:$0xff] %v4558_v10  ;;  %6879 = vst [vmem:[#allocation150_spill] sm:$0xff] %v4566_v46  ;;  %v486_v13 = vadd.f32 %v478_v4, %v466_v48  ;;  %v487_v56 = vadd.f32 %v479_v0, %v467_v3  ;;  %v1345_v28 = vmul.f32 %v6867_v21, %v4571_v31  ;;  %v4611_v12 = vld [vmem:[#allocation2 + $0x81] sm:$0xff]  ;;  %v6893_v0 = vld [vmem:[#allocation181_spill] sm:$0xff] }
 0x12a   :  { %6882 = vst [vmem:[#allocation247_spill] sm:$0xff] %v4575_v52  ;;  %6884 = vst [vmem:[#allocation157_spill] sm:$0xff] %v4579_v1  ;;  %v4597_v51 = vmul.f32 %v4508_v30, %v4568_v47  ;;  %v480_v26 = vmul.f32 %v2522_v25, %v6866_v7  ;;  %v497_v22 = vmul.f32 %v2517_v29, %v6890_v55  ;;  %v6894_v29 = vld [vmem:[#allocation287_spill] sm:$0xff]  ;;  %v6956_v21 = vld [vmem:[#allocation189_spill] sm:$0xff] }
 0x12b   :  { %6886 = vst [vmem:[#allocation279_spill] sm:$0xff] %v4583_v37  ;;  %6887 = vst [vmem:[#allocation280_spill] sm:$0xff] %v4587_v9  ;;  %v4603_v23 = vmul.f32 %v4519_v57, %v4568_v47  ;;  %v4607_v32 = vmul.f32 %v4523_v50, %v4568_v47  ;;  %v498_v48 = vmul.f32 %v2521_v20, %v6890_v55  ;;  %v4616_v9 = vld [vmem:[#allocation2 + $0x90] sm:$0xff]  ;;  %v4621_v52 = vld [vmem:[#allocation2 + $0xa0] sm:$0xff] }
 0x12c   :  { %6888 = vst [vmem:[#allocation281_spill] sm:$0xff] %v4591_v5  ;;  %6889 = vst [vmem:[#allocation20_spill] sm:$0xff] %v4597_v51  ;;  %v499_v3 = vmul.f32 %v2522_v25, %v6890_v55  ;;  %v488_v4 = vadd.f32 %v480_v26, %v468_v17  ;;  %v500_v7 = vmul.f32 %v6890_v55, %v6893_v0  ;;  %v6929_v38 = vld [vmem:[#allocation195_spill] sm:$0xff] }
 0x12d   :  { %6891 = vst [vmem:[#allocation169_spill] sm:$0xff] %v4603_v23  ;;  %6892 = vst [vmem:[#allocation19_spill] sm:$0xff] %v4607_v32  ;;  %v505_v5 = vadd.f32 %v497_v22, %v485_v15  ;;  %v517_v51 = vmul.f32 %v2521_v20, %v6894_v29  ;;  %v506_v23 = vadd.f32 %v498_v48, %v486_v13  ;;  %v6897_v20 = vld [vmem:[#allocation221_spill] sm:$0xff] }
 0x12e   :  { %v507_v1 = vadd.f32 %v499_v3, %v487_v56  ;;  %v518_v10 = vmul.f32 %v2522_v25, %v6894_v29  ;;  %v519_v32 = vmul.f32 %v6894_v29, %v6893_v0  ;;  %v1353_v37 = vadd.f32 %v1345_v28, %v1333_v45  ;;  %v4641_v45 = vld [vmem:[#allocation2 + $0x91] sm:$0xff]  ;;  %v4643_v28 = vld [vmem:[#allocation2 + $0xa1] sm:$0xff] }
 0x12f   :  { %v4625_v17 = vmul.f32 %v6869_v33, %v4571_v31  ;;  %v4629_v15 = vmul.f32 %v6871_v24, %v4571_v31  ;;  %v520_v13 = vmul.f32 %v6894_v29, %v6897_v20  ;;  %v4635_v56 = vmul.f32 %v6873_v41, %v4571_v31 }
 0x130   :  { %v4639_v26 = vmul.f32 %v6875_v42, %v4571_v31  ;;  %v4647_v55 = vmul.f32 %v6878_v34, %v4611_v12  ;;  %v4651_v22 = vmul.f32 %v6881_v44, %v4611_v12  ;;  %v1365_v48 = vmul.f32 %v6869_v33, %v4616_v9  ;;  %v6932_v33 = vld [vmem:[#allocation188_spill] sm:$0xff] }
 0x131   :  { %6895 = vst [vmem:[#allocation133_spill] sm:$0xff] %v4625_v17  ;;  %6896 = vst [vmem:[#allocation199_spill] sm:$0xff] %v4629_v15  ;;  %v4657_v3 = vmul.f32 %v6871_v24, %v4616_v9  ;;  %v4661_v29 = vmul.f32 %v6873_v41, %v4616_v9  ;;  %v4669_v46 = vmul.f32 %v6871_v24, %v4621_v52  ;;  %v6923_v15 = vld [vmem:[#allocation72_spill] sm:$0xff] }
 0x132   :  { %6898 = vst [vmem:[#allocation248_spill] sm:$0xff] %v4635_v56  ;;  %6899 = vst [vmem:[#allocation34_spill] sm:$0xff] %v4639_v26  ;;  %v4665_v26 = vmul.f32 %v6883_v14, %v4611_v12  ;;  %v4677_v16 = vmul.f32 %v6875_v42, %v4616_v9  ;;  %v4681_v34 = vmul.f32 %v6875_v42, %v4621_v52 }
 0x133   :  { %6900 = vst [vmem:[#allocation39_spill] sm:$0xff] %v4651_v22  ;;  %6901 = vst [vmem:[#allocation38_spill] sm:$0xff] %v4657_v3  ;;  %v4673_v22 = vmul.f32 %v6873_v41, %v4621_v52  ;;  %v4691_v56 = vmul.f32 %v6883_v14, %v4641_v45  ;;  %v508_v42 = vadd.f32 %v500_v7, %v488_v4 }
 0x134   :  { %6902 = vst [vmem:[#allocation35_spill] sm:$0xff] %v4661_v29  ;;  %6903 = vst [vmem:[#allocation24_spill] sm:$0xff] %v4665_v26  ;;  %v4683_v29 = vadd.f32 %v1365_v48, %v1353_v37  ;;  %v4687_v26 = vmul.f32 %v6881_v44, %v4641_v45  ;;  %v526_v37 = vadd.f32 %v518_v10, %v506_v23  ;;  %v4701_v48 = vld [vmem:[#allocation2 + $0x82] sm:$0xff] }
 0x135   :  { %6904 = vst [vmem:[#allocation237_spill] sm:$0xff] %v4669_v46  ;;  %6905 = vst [vmem:[#allocation108_spill] sm:$0xff] %v4673_v22  ;;  %v4695_v22 = vmul.f32 %v6883_v14, %v4643_v28  ;;  %v527_v3 = vadd.f32 %v519_v32, %v507_v1  ;;  %v6912_v44 = vld [vmem:[#allocation315_spill] sm:$0xff]  ;;  %v556_v14 = vld [vmem:[#allocation2 + $0x33] sm:$0xff]  ;;  %v528_v10 = vadd.f32 %v520_v13, %v508_v42 }
 0x136   :  { %6906 = vst [vmem:[#allocation163_spill] sm:$0xff] %v4677_v16  ;;  %6907 = vst [vmem:[#allocation138_spill] sm:$0xff] %v4681_v34  ;;  %v6910_v16 = vld [vmem:[#allocation103_spill] sm:$0xff]  ;;  %v525_v34 = vadd.f32 %v517_v51, %v505_v5  ;;  %v537_v63 = vmul.f32 %v2522_v25, %v6912_v44  ;;  %v538_v46 = vmul.f32 %v6912_v44, %v6893_v0  ;;  %v6915_v51 = vld [vmem:[#allocation276_spill] sm:$0xff] }
 0x137   :  { %6908 = vst [vmem:[#allocation294_spill] sm:$0xff] %v4691_v56  ;;  %6909 = vst [vmem:[#allocation40_spill] sm:$0xff] %v4695_v22  ;;  %v4699_v41 = vmul.f32 %v6910_v16, %v4611_v12  ;;  %v539_v56 = vmul.f32 %v6912_v44, %v6897_v20  ;;  %v4710_v22 = vmul.f32 %v6910_v16, %v4641_v45  ;;  %v6916_v25 = vld [vmem:[#allocation106_spill] sm:$0xff]  ;;  %v6920_v42 = vld [vmem:[#allocation55_spill] sm:$0xff] }
 0x138   :  { %v4714_v5 = vmul.f32 %v6910_v16, %v4643_v28  ;;  %v540_v1 = vmul.f32 %v6912_v44, %v6915_v51  ;;  %v4720_v23 = vmul.f32 %v6916_v25, %v4641_v45  ;;  %v545_v32 = vadd.f32 %v537_v63, %v525_v34  ;;  %v6922_v51 = vld [vmem:[#allocation71_spill] sm:$0xff] }
 0x139   :  { %6911 = vst [vmem:[#allocation41_spill] sm:$0xff] %v4699_v41  ;;  %6913 = vst [vmem:[#allocation176_spill] sm:$0xff] %v4710_v22  ;;  %v546_v4 = vadd.f32 %v538_v46, %v526_v37  ;;  %v547_v0 = vadd.f32 %v539_v56, %v527_v3  ;;  %v4724_v7 = vmul.f32 %v6916_v25, %v4643_v28  ;;  %v6924_v63 = vld [vmem:[#allocation59_spill] sm:$0xff] }
 0x13a   :  { %6914 = vst [vmem:[#allocation177_spill] sm:$0xff] %v4714_v5  ;;  %6917 = vst [vmem:[#allocation207_spill] sm:$0xff] %v4720_v23  ;;  %v4728_v20 = vmul.f32 %v4488_v60, %v4701_v48  ;;  %v548_v41 = vadd.f32 %v540_v1, %v528_v10  ;;  %v574_v13 = vmul.f32 %v6920_v42, %v556_v14  ;;  %v6921_v5 = vld [vmem:[#allocation70_spill] sm:$0xff]  ;;  %v2523_v3 = vld [vmem:[#allocation2 + $0x43] sm:$0xff] }
 0x13b   :  { %6918 = vst [vmem:[#allocation208_spill] sm:$0xff] %v4724_v7  ;;  %v579_v44 = vadd.f32 %v6921_v5, %v545_v32  ;;  %v580_v22 = vadd.f32 %v6922_v51, %v546_v4  ;;  %v581_v23 = vadd.f32 %v6923_v15, %v547_v0  ;;  %v593_v34 = vmul.f32 %v6924_v63, %v556_v14  ;;  %v6926_v7 = vld [vmem:[#allocation61_spill] sm:$0xff] }
 0x13c   :  { %6919 = vst [vmem:[#allocation209_spill] sm:$0xff] %v4728_v20  ;;  %v4737_v46 = vmul.f32 %v4497_v54, %v4701_v48  ;;  %v582_v56 = vadd.f32 %v574_v13, %v548_v41  ;;  %v594_v37 = vmul.f32 %v2523_v3, %v6924_v63  ;;  %v612_v10 = vmul.f32 %v6926_v7, %v556_v14  ;;  %v6927_v1 = vld [vmem:[#allocation73_spill] sm:$0xff]  ;;  %v6928_v20 = vld [vmem:[#allocation76_spill] sm:$0xff] }
 0x13d   :  { %v599_v42 = vadd.f32 %v6927_v1, %v579_v44  ;;  %v600_v5 = vadd.f32 %v6928_v20, %v580_v22  ;;  %v601_v32 = vadd.f32 %v593_v34, %v581_v23  ;;  %v613_v4 = vmul.f32 %v2523_v3, %v6926_v7  ;;  %v2524_v0 = vld [vmem:[#allocation2 + $0x53] sm:$0xff]  ;;  %v2525_v1 = vld [vmem:[#allocation2 + $0x63] sm:$0xff] }
 0x13e   :  { %6925 = vst [vmem:[#allocation151_spill] sm:$0xff] %v4737_v46  ;;  %v602_v15 = vadd.f32 %v594_v37, %v582_v56  ;;  %v614_v51 = vmul.f32 %v2524_v0, %v6926_v7  ;;  %v631_v24 = vmul.f32 %v6929_v38, %v556_v14  ;;  %v632_v41 = vmul.f32 %v2523_v3, %v6929_v38  ;;  %v6930_v13 = vld [vmem:[#allocation77_spill] sm:$0xff]  ;;  %v6931_v23 = vld [vmem:[#allocation231_spill] sm:$0xff] }
 0x13f   :  { %v619_v46 = vadd.f32 %v6930_v13, %v599_v42  ;;  %v620_v63 = vadd.f32 %v612_v10, %v600_v5  ;;  %v621_v19 = vadd.f32 %v613_v4, %v601_v32  ;;  %v633_v17 = vmul.f32 %v2524_v0, %v6929_v38  ;;  %v6933_v42 = vld [vmem:[#allocation292_spill] sm:$0xff]  ;;  %v4757_v4 = vld [vmem:[#allocation2 + $0x92] sm:$0xff] }
 0x140   :  { %v622_v44 = vadd.f32 %v614_v51, %v602_v15  ;;  %v634_v22 = vmul.f32 %v2525_v1, %v6929_v38  ;;  %v651_v20 = vmul.f32 %v2523_v3, %v6931_v23  ;;  %v652_v34 = vmul.f32 %v2524_v0, %v6931_v23  ;;  %v6935_v51 = vld [vmem:[#allocation319_spill] sm:$0xff] }
 0x141   :  { %v639_v56 = vadd.f32 %v631_v24, %v619_v46  ;;  %v640_v7 = vadd.f32 %v632_v41, %v620_v63  ;;  %v641_v37 = vadd.f32 %v633_v17, %v621_v19  ;;  %v653_v14 = vmul.f32 %v2525_v1, %v6931_v23  ;;  %v6934_v19 = vld [vmem:[#allocation222_spill] sm:$0xff] }
 0x142   :  { %v642_v35 = vadd.f32 %v634_v22, %v622_v44  ;;  %v654_v10 = vmul.f32 %v6931_v23, %v6932_v33  ;;  %v671_v5 = vmul.f32 %v2524_v0, %v6933_v42  ;;  %v672_v32 = vmul.f32 %v2525_v1, %v6933_v42  ;;  %v4766_v0 = vld [vmem:[#allocation2 + $0xa2] sm:$0xff] }
 0x143   :  { %v659_v38 = vadd.f32 %v651_v20, %v639_v56  ;;  %v660_v15 = vadd.f32 %v652_v34, %v640_v7  ;;  %v661_v3 = vadd.f32 %v653_v14, %v641_v37  ;;  %v673_v24 = vmul.f32 %v6933_v42, %v6932_v33  ;;  %v710_v20 = vld [vmem:[#allocation2 + $0x34] sm:$0xff]  ;;  %v6937_v34 = vld [vmem:[#allocation116_spill] sm:$0xff] }
 0x144   :  { %v662_v46 = vadd.f32 %v654_v10, %v642_v35  ;;  %v674_v17 = vmul.f32 %v6933_v42, %v6934_v19  ;;  %v691_v41 = vmul.f32 %v2525_v1, %v6935_v51  ;;  %v692_v13 = vmul.f32 %v6935_v51, %v6932_v33  ;;  %v6939_v7 = vld [vmem:[#allocation277_spill] sm:$0xff] }
 0x145   :  { %v679_v63 = vadd.f32 %v671_v5, %v659_v38  ;;  %v680_v44 = vadd.f32 %v672_v32, %v660_v15  ;;  %v681_v22 = vadd.f32 %v673_v24, %v661_v3  ;;  %v693_v23 = vmul.f32 %v6935_v51, %v6934_v19  ;;  %v6942_v32 = vld [vmem:[#allocation117_spill] sm:$0xff]  ;;  %v6944_v3 = vld [vmem:[#allocation62_spill] sm:$0xff] }
 0x146   :  { %v4772_v35 = vmul.f32 %v4497_v54, %v4757_v4  ;;  %v4776_v56 = vmul.f32 %v6937_v34, %v4701_v48  ;;  %v682_v1 = vadd.f32 %v674_v17, %v662_v46  ;;  %v694_v33 = vmul.f32 %v6935_v51, %v6939_v7  ;;  %v6945_v46 = vld [vmem:[#allocation78_spill] sm:$0xff]  ;;  %v6946_v17 = vld [vmem:[#allocation80_spill] sm:$0xff]  ;;  %v6947_v7 = vld [vmem:[#allocation81_spill] sm:$0xff] }
 0x147   :  { %v4782_v37 = vmul.f32 %v6937_v34, %v4757_v4  ;;  %v699_v14 = vadd.f32 %v691_v41, %v679_v63  ;;  %v700_v10 = vadd.f32 %v692_v13, %v680_v44  ;;  %v701_v42 = vadd.f32 %v693_v23, %v681_v22  ;;  %v6948_v41 = vld [vmem:[#allocation63_spill] sm:$0xff]  ;;  %v7001_v54 = vld [vmem:[#allocation238_spill] sm:$0xff] }
 0x148   :  { %6936 = vst [vmem:[#allocation249_spill] sm:$0xff] %v4772_v35  ;;  %6938 = vst [vmem:[#allocation250_spill] sm:$0xff] %v4776_v56  ;;  %v4786_v5 = vmul.f32 %v6937_v34, %v4766_v0  ;;  %v4790_v38 = vmul.f32 %v6942_v32, %v4757_v4  ;;  %v702_v15 = vadd.f32 %v694_v33, %v682_v1  ;;  %v2526_v22 = vld [vmem:[#allocation2 + $0x44] sm:$0xff]  ;;  %v6952_v56 = vld [vmem:[#allocation85_spill] sm:$0xff] }
 0x149   :  { %6940 = vst [vmem:[#allocation251_spill] sm:$0xff] %v4782_v37  ;;  %v728_v24 = vmul.f32 %v6944_v3, %v710_v20  ;;  %v733_v19 = vadd.f32 %v6945_v46, %v699_v14  ;;  %v734_v51 = vadd.f32 %v6946_v17, %v700_v10  ;;  %v735_v37 = vadd.f32 %v6947_v7, %v701_v42  ;;  %v6951_v33 = vld [vmem:[#allocation84_spill] sm:$0xff]  ;;  %v2527_v17 = vld [vmem:[#allocation2 + $0x54] sm:$0xff] }
 0x14a   :  { %6941 = vst [vmem:[#allocation158_spill] sm:$0xff] %v4786_v5  ;;  %6943 = vst [vmem:[#allocation284_spill] sm:$0xff] %v4790_v38  ;;  %v747_v13 = vmul.f32 %v6948_v41, %v710_v20  ;;  %v4799_v63 = vmul.f32 %v6942_v32, %v4766_v0  ;;  %v748_v23 = vmul.f32 %v2526_v22, %v6948_v41  ;;  %v6950_v38 = vld [vmem:[#allocation74_spill] sm:$0xff]  ;;  %v6953_v5 = vld [vmem:[#allocation183_spill] sm:$0xff] }
 0x14b   :  { %v736_v44 = vadd.f32 %v728_v24, %v702_v15  ;;  %v766_v1 = vmul.f32 %v6950_v38, %v710_v20  ;;  %v753_v3 = vadd.f32 %v6951_v33, %v733_v19  ;;  %v754_v14 = vadd.f32 %v6952_v56, %v734_v51  ;;  %v6954_v24 = vld [vmem:[#allocation88_spill] sm:$0xff] }
 0x14c   :  { %6949 = vst [vmem:[#allocation285_spill] sm:$0xff] %v4799_v63  ;;  %v755_v46 = vadd.f32 %v747_v13, %v735_v37  ;;  %v767_v10 = vmul.f32 %v2526_v22, %v6950_v38  ;;  %v768_v7 = vmul.f32 %v2527_v17, %v6950_v38  ;;  %v785_v35 = vmul.f32 %v6953_v5, %v710_v20  ;;  %v2528_v33 = vld [vmem:[#allocation2 + $0x64] sm:$0xff] }
 0x14d   :  { %v756_v42 = vadd.f32 %v748_v23, %v736_v44  ;;  %v786_v15 = vmul.f32 %v2526_v22, %v6953_v5  ;;  %v773_v63 = vadd.f32 %v6954_v24, %v753_v3  ;;  %v774_v41 = vadd.f32 %v766_v1, %v754_v14  ;;  %v6955_v37 = vld [vmem:[#allocation232_spill] sm:$0xff]  ;;  %v6957_v3 = vld [vmem:[#allocation297_spill] sm:$0xff] }
 0x14e   :  { %v775_v27 = vadd.f32 %v767_v10, %v755_v46  ;;  %v787_v18 = vmul.f32 %v2527_v17, %v6953_v5  ;;  %v788_v56 = vmul.f32 %v2528_v33, %v6953_v5  ;;  %v805_v51 = vmul.f32 %v2526_v22, %v6955_v37  ;;  %v4819_v10 = vld [vmem:[#allocation2 + $0x83] sm:$0xff] }
 0x14f   :  { %v776_v19 = vadd.f32 %v768_v7, %v756_v42  ;;  %v806_v13 = vmul.f32 %v2527_v17, %v6955_v37  ;;  %v793_v44 = vadd.f32 %v785_v35, %v773_v63  ;;  %v794_v38 = vadd.f32 %v786_v15, %v774_v41  ;;  %v6959_v7 = vld [vmem:[#allocation156_spill] sm:$0xff] }
 0x150   :  { %v795_v23 = vadd.f32 %v787_v18, %v775_v27  ;;  %v807_v20 = vmul.f32 %v2528_v33, %v6955_v37  ;;  %v808_v1 = vmul.f32 %v6955_v37, %v6956_v21  ;;  %v825_v14 = vmul.f32 %v2527_v17, %v6957_v3  ;;  %v6958_v18 = vld [vmem:[#allocation227_spill] sm:$0xff]  ;;  %v4828_v17 = vld [vmem:[#allocation2 + $0x93] sm:$0xff] }
 0x151   :  { %v796_v40 = vadd.f32 %v788_v56, %v776_v19  ;;  %v826_v46 = vmul.f32 %v2528_v33, %v6957_v3  ;;  %v813_v5 = vadd.f32 %v805_v51, %v793_v44  ;;  %v814_v42 = vadd.f32 %v806_v13, %v794_v38  ;;  %v864_v51 = vld [vmem:[#allocation2 + $0x35] sm:$0xff] }
 0x152   :  { %v815_v22 = vadd.f32 %v807_v20, %v795_v23  ;;  %v827_v35 = vmul.f32 %v6957_v3, %v6956_v21  ;;  %v828_v27 = vmul.f32 %v6957_v3, %v6958_v18  ;;  %v845_v15 = vmul.f32 %v2528_v33, %v6959_v7  ;;  %v6960_v13 = vld [vmem:[#allocation121_spill] sm:$0xff]  ;;  %v6963_v38 = vld [vmem:[#allocation282_spill] sm:$0xff]  ;;  %v4842_v23 = vld [vmem:[#allocation2 + $0xa3] sm:$0xff] }
 0x153   :  { %v816_v63 = vadd.f32 %v808_v1, %v796_v40  ;;  %v846_v24 = vmul.f32 %v6959_v7, %v6956_v21  ;;  %v833_v41 = vadd.f32 %v825_v14, %v813_v5  ;;  %v834_v19 = vadd.f32 %v826_v46, %v814_v42  ;;  %v6966_v5 = vld [vmem:[#allocation122_spill] sm:$0xff] }
 0x154   :  { %v835_v56 = vadd.f32 %v827_v35, %v815_v22  ;;  %v847_v37 = vmul.f32 %v6959_v7, %v6958_v18  ;;  %v4834_v40 = vmul.f32 %v6960_v13, %v4766_v0  ;;  %v4838_v44 = vmul.f32 %v4519_v57, %v4819_v10  ;;  %v6968_v35 = vld [vmem:[#allocation75_spill] sm:$0xff]  ;;  %v6969_v18 = vld [vmem:[#allocation89_spill] sm:$0xff]  ;;  %v6980_v57 = vld [vmem:[#allocation190_spill] sm:$0xff] }
 0x155   :  { %v836_v33 = vadd.f32 %v828_v27, %v816_v63  ;;  %v848_v21 = vmul.f32 %v6959_v7, %v6963_v38  ;;  %v4846_v20 = vmul.f32 %v4523_v50, %v4819_v10  ;;  %v853_v1 = vadd.f32 %v845_v15, %v833_v41  ;;  %v6970_v7 = vld [vmem:[#allocation90_spill] sm:$0xff]  ;;  %v6972_v15 = vld [vmem:[#allocation79_spill] sm:$0xff] }
 0x156   :  { %6961 = vst [vmem:[#allocation286_spill] sm:$0xff] %v4834_v40  ;;  %6962 = vst [vmem:[#allocation170_spill] sm:$0xff] %v4838_v44  ;;  %v854_v3 = vadd.f32 %v846_v24, %v834_v19  ;;  %v855_v14 = vadd.f32 %v847_v37, %v835_v56  ;;  %v4850_v46 = vmul.f32 %v4523_v50, %v4828_v17  ;;  %v6971_v40 = vld [vmem:[#allocation91_spill] sm:$0xff]  ;;  %v6977_v44 = vld [vmem:[#allocation184_spill] sm:$0xff] }
 0x157   :  { %6964 = vst [vmem:[#allocation148_spill] sm:$0xff] %v4846_v20  ;;  %v4854_v42 = vmul.f32 %v6966_v5, %v4828_v17  ;;  %v856_v22 = vadd.f32 %v848_v21, %v836_v33  ;;  %v882_v63 = vmul.f32 %v6968_v35, %v864_v51  ;;  %v887_v27 = vadd.f32 %v6969_v18, %v853_v1  ;;  %v2529_v56 = vld [vmem:[#allocation2 + $0x45] sm:$0xff] }
 0x158   :  { %6965 = vst [vmem:[#allocation200_spill] sm:$0xff] %v4850_v46  ;;  %v888_v38 = vadd.f32 %v6970_v7, %v854_v3  ;;  %v889_v20 = vadd.f32 %v6971_v40, %v855_v14  ;;  %v901_v24 = vmul.f32 %v6972_v15, %v864_v51  ;;  %v4863_v41 = vmul.f32 %v6966_v5, %v4842_v23  ;;  %v6975_v21 = vld [vmem:[#allocation92_spill] sm:$0xff]  ;;  %v6976_v46 = vld [vmem:[#allocation93_spill] sm:$0xff] }
 0x159   :  { %6967 = vst [vmem:[#allocation252_spill] sm:$0xff] %v4854_v42  ;;  %v890_v19 = vadd.f32 %v882_v63, %v856_v22  ;;  %v902_v37 = vmul.f32 %v2529_v56, %v6972_v15  ;;  %v6974_v42 = vld [vmem:[#allocation82_spill] sm:$0xff]  ;;  %v907_v35 = vadd.f32 %v6975_v21, %v887_v27  ;;  %v939_v11 = vmul.f32 %v6977_v44, %v864_v51  ;;  %v6978_v63 = vld [vmem:[#allocation96_spill] sm:$0xff] }
 0x15a   :  { %6973 = vst [vmem:[#allocation310_spill] sm:$0xff] %v4863_v41  ;;  %v920_v33 = vmul.f32 %v6974_v42, %v864_v51  ;;  %v908_v1 = vadd.f32 %v6976_v46, %v888_v38  ;;  %v909_v18 = vadd.f32 %v901_v24, %v889_v20  ;;  %v921_v3 = vmul.f32 %v2529_v56, %v6974_v42  ;;  %v2530_v14 = vld [vmem:[#allocation2 + $0x55] sm:$0xff]  ;;  %v2531_v21 = vld [vmem:[#allocation2 + $0x65] sm:$0xff] }
 0x15b   :  { %v910_v40 = vadd.f32 %v902_v37, %v890_v19  ;;  %v922_v7 = vmul.f32 %v2530_v14, %v6974_v42  ;;  %v940_v22 = vmul.f32 %v2529_v56, %v6977_v44  ;;  %v927_v41 = vadd.f32 %v6978_v63, %v907_v35  ;;  %v6979_v46 = vld [vmem:[#allocation233_spill] sm:$0xff]  ;;  %v6981_v35 = vld [vmem:[#allocation303_spill] sm:$0xff] }
 0x15c   :  { %v928_v15 = vadd.f32 %v920_v33, %v908_v1  ;;  %v929_v5 = vadd.f32 %v921_v3, %v909_v18  ;;  %v941_v47 = vmul.f32 %v2530_v14, %v6977_v44  ;;  %v942_v20 = vmul.f32 %v2531_v21, %v6977_v44 }
 0x15d   :  { %v930_v27 = vadd.f32 %v922_v7, %v910_v40  ;;  %v959_v38 = vmul.f32 %v2529_v56, %v6979_v46  ;;  %v960_v24 = vmul.f32 %v2530_v14, %v6979_v46  ;;  %v947_v19 = vadd.f32 %v939_v11, %v927_v41  ;;  %v1018_v7 = vld [vmem:[#allocation2 + $0x36] sm:$0xff]  ;;  %v6982_v41 = vld [vmem:[#allocation228_spill] sm:$0xff] }
 0x15e   :  { %v948_v42 = vadd.f32 %v940_v22, %v928_v15  ;;  %v949_v37 = vadd.f32 %v941_v47, %v929_v5  ;;  %v961_v51 = vmul.f32 %v2531_v21, %v6979_v46  ;;  %v962_v33 = vmul.f32 %v6979_v46, %v6980_v57  ;;  %v6983_v5 = vld [vmem:[#allocation321_spill] sm:$0xff] }
 0x15f   :  { %v950_v50 = vadd.f32 %v942_v20, %v930_v27  ;;  %v979_v1 = vmul.f32 %v2530_v14, %v6981_v35  ;;  %v980_v18 = vmul.f32 %v2531_v21, %v6981_v35  ;;  %v967_v3 = vadd.f32 %v959_v38, %v947_v19  ;;  %v4893_v14 = vld [vmem:[%s6073_s1 + $0x50] sm:$0x7f] }
 0x160   :  { %v968_v40 = vadd.f32 %v960_v24, %v948_v42  ;;  %v969_v44 = vadd.f32 %v961_v51, %v949_v37  ;;  %v981_v56 = vmul.f32 %v6981_v35, %v6980_v57  ;;  %v982_v47 = vmul.f32 %v6981_v35, %v6982_v41  ;;  %v6988_v35 = vld [vmem:[#allocation8_spill] sm:$0xff] }
 0x161   :  { %v970_v11 = vadd.f32 %v962_v33, %v950_v50  ;;  %v999_v22 = vmul.f32 %v2531_v21, %v6983_v5  ;;  %v1000_v63 = vmul.f32 %v6983_v5, %v6980_v57  ;;  %v987_v15 = vadd.f32 %v979_v1, %v967_v3  ;;  %v6984_v50 = vld [vmem:[#allocation127_spill] sm:$0xff]  ;;  %v6986_v21 = vld [vmem:[#allocation290_spill] sm:$0xff] }
 0x162   :  { %v988_v27 = vadd.f32 %v980_v18, %v968_v40  ;;  %v989_v20 = vadd.f32 %v981_v56, %v969_v44  ;;  %v1001_v46 = vmul.f32 %v6983_v5, %v6982_v41  ;;  %v4899_v38 = vmul.f32 %v6984_v50, %v4842_v23  ;;  %v6987_v57 = vld [vmem:[#allocation83_spill] sm:$0xff]  ;;  %v6989_v3 = vld [vmem:[#allocation86_spill] sm:$0xff]  ;;  %v6996_v50 = vld [vmem:[#allocation104_spill] sm:$0xff] }
 0x163   :  { %v990_v24 = vadd.f32 %v982_v47, %v970_v11  ;;  %v1002_v19 = vmul.f32 %v6983_v5, %v6986_v21  ;;  %v1036_v42 = vmul.f32 %v6987_v57, %v1018_v7  ;;  %v1007_v37 = vadd.f32 %v999_v22, %v987_v15  ;;  %v2532_v44 = vld [vmem:[#allocation2 + $0x46] sm:$0xff]  ;;  %v6991_v47 = vld [vmem:[#allocation97_spill] sm:$0xff]  ;;  %v6992_v5 = vld [vmem:[#allocation98_spill] sm:$0xff] }
 0x164   :  { %6985 = vst [vmem:[#allocation239_spill] sm:$0xff] %v4899_v38  ;;  %v1008_v51 = vadd.f32 %v1000_v63, %v988_v27  ;;  %v1009_v33 = vadd.f32 %v1001_v46, %v989_v20  ;;  %v4906_v1 = vrot.slane %v4893_v14, %v6988_v35  ;;  %v1055_v40 = vmul.f32 %v6989_v3, %v1018_v7  ;;  %v6990_v41 = vld [vmem:[#allocation87_spill] sm:$0xff]  ;;  %v6993_v57 = vld [vmem:[#allocation100_spill] sm:$0xff]  ;;  %v2533_v27 = vld [vmem:[#allocation2 + $0x56] sm:$0xff] }
 0x165   :  { %v1010_v18 = vadd.f32 %v1002_v19, %v990_v24  ;;  %v1056_v56 = vmul.f32 %v2532_v44, %v6989_v3  ;;  %v1074_v11 = vmul.f32 %v6990_v41, %v1018_v7  ;;  %v1041_v38 = vadd.f32 %v6991_v47, %v1007_v37  ;;  %v6994_v46 = vld [vmem:[#allocation191_spill] sm:$0xff]  ;;  %v6995_v35 = vld [vmem:[#allocation101_spill] sm:$0xff] }
 0x166   :  { %v1042_v21 = vadd.f32 %v6992_v5, %v1008_v51  ;;  %v1043_v22 = vadd.f32 %v6993_v57, %v1009_v33  ;;  %v1075_v63 = vmul.f32 %v2532_v44, %v6990_v41  ;;  %v1076_v20 = vmul.f32 %v2533_v27, %v6990_v41  ;;  %v2534_v47 = vld [vmem:[#allocation2 + $0x66] sm:$0xff]  ;;  %v6998_v5 = vld [vmem:[#allocation105_spill] sm:$0xff] }
 0x167   :  { %v1044_v15 = vadd.f32 %v1036_v42, %v1010_v18  ;;  %v1093_v24 = vmul.f32 %v6994_v46, %v1018_v7  ;;  %v1094_v19 = vmul.f32 %v2532_v44, %v6994_v46  ;;  %v1061_v3 = vadd.f32 %v6995_v35, %v1041_v38  ;;  %v6997_v18 = vld [vmem:[#allocation234_spill] sm:$0xff] }
 0x168   :  { %v1062_v30 = vadd.f32 %v6996_v50, %v1042_v21  ;;  %v1063_v13 = vadd.f32 %v1055_v40, %v1043_v22  ;;  %v1385_v37 = vmul.f32 %v4906_v1, %v4621_v52  ;;  %v1095_v33 = vmul.f32 %v2533_v27, %v6994_v46  ;;  %v6999_v52 = vld [vmem:[#allocation196_spill] sm:$0xff] }
 0x169   :  { %v1064_v51 = vadd.f32 %v1056_v56, %v1044_v15  ;;  %v1096_v42 = vmul.f32 %v2534_v47, %v6994_v46  ;;  %v1113_v41 = vmul.f32 %v2532_v44, %v6997_v18  ;;  %v1081_v7 = vadd.f32 %v6998_v5, %v1061_v3  ;;  %v7000_v46 = vld [vmem:[#allocation44_spill] sm:$0xff] }
 0x16a   :  { %v1082_v57 = vadd.f32 %v1074_v11, %v1062_v30  ;;  %v1083_v32 = vadd.f32 %v1075_v63, %v1063_v13  ;;  %v1393_v38 = vadd.f32 %v1385_v37, %v4683_v29  ;;  %v1114_v50 = vmul.f32 %v2533_v27, %v6997_v18 }
 0x16b   :  { %v1084_v35 = vadd.f32 %v1076_v20, %v1064_v51  ;;  %v1115_v40 = vmul.f32 %v2534_v47, %v6997_v18  ;;  %v1116_v56 = vmul.f32 %v6997_v18, %v6999_v52  ;;  %v1101_v21 = vadd.f32 %v1093_v24, %v1081_v7  ;;  %v7002_v20 = vld [vmem:[#allocation46_spill] sm:$0xff]  ;;  %v7003_v18 = vld [vmem:[#allocation244_spill] sm:$0xff]  ;;  %v7005_v7 = vld [vmem:[#allocation49_spill] sm:$0xff] }
 0x16c   :  { %v1102_v22 = vadd.f32 %v1094_v19, %v1082_v57  ;;  %v1103_v15 = vadd.f32 %v1095_v33, %v1083_v32  ;;  %v1413_v34 = vadd.f32 %v7000_v46, %v1393_v38  ;;  %v1133_v3 = vmul.f32 %v2533_v27, %v7001_v54  ;;  %v7004_v19 = vld [vmem:[#allocation22_spill] sm:$0xff] }
 0x16d   :  { %v1104_v44 = vadd.f32 %v1096_v42, %v1084_v35  ;;  %v1134_v30 = vmul.f32 %v2534_v47, %v7001_v54  ;;  %v1135_v29 = vmul.f32 %v7001_v54, %v6999_v52  ;;  %v1121_v13 = vadd.f32 %v1113_v41, %v1101_v21  ;;  %v7006_v41 = vld [vmem:[#allocation131_spill] sm:$0xff] }
 0x16e   :  { %v1122_v11 = vadd.f32 %v1114_v50, %v1102_v22  ;;  %v1123_v63 = vadd.f32 %v1115_v40, %v1103_v15  ;;  %v1433_v37 = vadd.f32 %v7002_v20, %v1413_v34  ;;  %v1153_v24 = vmul.f32 %v2534_v47, %v7003_v18  ;;  %v7008_v34 = vld [vmem:[#allocation243_spill] sm:$0xff]  ;;  %v7010_v22 = vld [vmem:[#allocation308_spill] sm:$0xff] }
 0x16f   :  { %v1124_v51 = vadd.f32 %v1116_v56, %v1104_v44  ;;  %v1154_v32 = vmul.f32 %v7003_v18, %v6999_v52  ;;  %v4942_v33 = vrot.slane %v4893_v14, %v7004_v19  ;;  %v1141_v27 = vadd.f32 %v1133_v3, %v1121_v13  ;;  %v7009_v52 = vld [vmem:[#allocation245_spill] sm:$0xff] }
 0x170   :  { %v1142_v42 = vadd.f32 %v1134_v30, %v1122_v11  ;;  %v1143_v5 = vadd.f32 %v1135_v29, %v1123_v63  ;;  %v1453_v54 = vadd.f32 %v7005_v7, %v1433_v37  ;;  %v4947_v57 = vmul.f32 %v7006_v41, %v4842_v23 }
 0x171   :  { %v1144_v38 = vadd.f32 %v7008_v34, %v1124_v51  ;;  %v4952_v47 = vmul.f32 %v4906_v1, %v4499_v6  ;;  %v4956_v35 = vmul.f32 %v4906_v1, %v4571_v31  ;;  %v1161_v50 = vadd.f32 %v1153_v24, %v1141_v27  ;;  %v7013_v51 = vld [vmem:[#allocation31_spill] sm:$0xff]  ;;  %v2535_v34 = vld [vmem:[#allocation2 + $0x12] sm:$0xff] }
 0x172   :  { %7007 = vst [vmem:[#allocation235_spill] sm:$0xff] %v4947_v57  ;;  %v1162_v40 = vadd.f32 %v1154_v32, %v1142_v42  ;;  %v1163_v56 = vadd.f32 %v7009_v52, %v1143_v5  ;;  %v1487_v21 = vadd.f32 %v4562_v49, %v1453_v54  ;;  %v4963_v46 = vmul.f32 %v4906_v1, %v4616_v9  ;;  %v7018_v42 = vld [vmem:[#allocation119_spill] sm:$0xff] }
 0x173   :  { %v1164_v15 = vadd.f32 %v7010_v22, %v1144_v38  ;;  %v4967_v6 = vmul.f32 %v4942_v33, %v4530_v62  ;;  %v4971_v31 = vrot.slane %v4893_v14, %v6855_v58  ;;  %v1174_v44 = vadd.f32 %v4418_v61, %v1161_v50  ;;  %v1778_v38 = vld [vmem:[#allocation2 + $0x3] sm:$0xff]  ;;  %v1779_v50 = vld [vmem:[#allocation2 + $0x13] sm:$0xff] }
 0x174   :  { %v1175_v3 = vadd.f32 %v4418_v61, %v1162_v40  ;;  %v1176_v49 = vadd.f32 %v4418_v61, %v1163_v56  ;;  %v1507_v30 = vadd.f32 %v4647_v55, %v1487_v21  ;;  %v4980_v9 = vmul.f32 %v4942_v33, %v4611_v12  ;;  %v5066_v21 = vld [vmem:[#allocation2 + $0x23] sm:$0xff] }
 0x175   :  { %7011 = vst [vmem:[#allocation164_spill] sm:$0xff] %v4971_v31  ;;  %v1177_v29 = vadd.f32 %v4418_v61, %v1164_v15  ;;  %v1539_v13 = vmul.f32 %v4942_v33, %v4643_v28  ;;  %v4986_v58 = vrot.slane %v4893_v14, %v6859_v2  ;;  %v1276_v11 = vadd.f32 %v4514_v8, %v1174_v44  ;;  %v7021_v22 = vld [vmem:[#allocation116_spill] sm:$0xff]  ;;  %v7023_v44 = vld [vmem:[#allocation117_spill] sm:$0xff]  ;;  %v7047_v57 = vld [vmem:[#allocation127_spill] sm:$0xff] }
 0x176   :  { %v1277_v63 = vadd.f32 %v4527_v36, %v1175_v3  ;;  %v1278_v20 = vadd.f32 %v4273_v39, %v1176_v49  ;;  %v1527_v55 = vadd.f32 %v4687_v26, %v1507_v30  ;;  %v4995_v37 = vmul.f32 %v4942_v33, %v4641_v45  ;;  %7020 = vst [vmem:[#allocation212_spill] sm:$0xff] %v5066_v21  ;;  %v7026_v30 = vld [vmem:[#allocation121_spill] sm:$0xff] }
 0x177   :  { %7012 = vst [vmem:[#allocation298_spill] sm:$0xff] %v4986_v58  ;;  %v1279_v61 = vadd.f32 %v4280_v43, %v1177_v29  ;;  %v4999_v28 = vrot.slane %v4893_v14, %v7013_v51  ;;  %v5003_v2 = vmul.f32 %v4971_v31, %v4535_v53  ;;  %v1284_v8 = vmax.f32 %v1276_v11, 0.0  ;;  %v5017_v14 = vld [vmem:[#allocation2 + $0x22] sm:$0xff] }
 0x178   :  { %v1285_v36 = vmax.f32 %v1277_v63, 0.0  ;;  %v1286_v18 = vmax.f32 %v1278_v20, 0.0  ;;  %v1547_v39 = vadd.f32 %v1539_v13, %v1527_v55  ;;  %v5007_v43 = vmul.f32 %v4971_v31, %v4701_v48  ;;  %7015 = vst [vmem:[#allocation185_spill] sm:$0xff] %v5017_v14  ;;  %v7030_v63 = vld [vmem:[#allocation18_spill] sm:$0xff] }
 0x179   :  { %7014 = vst [vmem:[#allocation179_spill] sm:$0xff] %v4999_v28  ;;  %v1287_v24 = vmax.f32 %v1279_v61, 0.0  ;;  %v5011_v26 = vmul.f32 %v4971_v31, %v4757_v4  ;;  %v5015_v45 = vmul.f32 %v4971_v31, %v4766_v0  ;;  %1292 = vst.msk [vmem:[#allocation2 + $0x33] sm:$0xff] %vm23_vm0, %v1284_v8  ;;  %v5024_v32 = vmul.f32 %v4986_v58, %v4819_v10  ;;  %v7033_v61 = vld [vmem:[#allocation124_spill] sm:$0xff]  ;;  %v7118_v31 = vld [vmem:[#allocation157_spill] sm:$0xff] }
 0x17a   :  { %1293 = vst.msk [vmem:[#allocation2 + $0x43] sm:$0xff] %vm23_vm0, %v1285_v36  ;;  %1294 = vst.msk [vmem:[#allocation2 + $0x53] sm:$0xff] %vm23_vm0, %v1286_v18  ;;  %v5028_v19 = vmul.f32 %v4986_v58, %v4828_v17  ;;  %v5032_v0 = vmul.f32 %v4986_v58, %v4842_v23  ;;  %v5036_v27 = vmul.f32 %v6910_v16, %v4530_v62  ;;  %v7035_v36 = vld [vmem:[#allocation113_spill] sm:$0xff] }
 0x17b   :  { %7016 = vst [vmem:[#allocation210_spill] sm:$0xff] %v5024_v32  ;;  %1295 = vst.msk [vmem:[#allocation2 + $0x63] sm:$0xff] %vm23_vm0, %v1287_v24  ;;  %v1567_v5 = vadd.f32 %v7018_v42, %v1547_v39  ;;  %v5042_v7 = vmul.f32 %v6916_v25, %v4530_v62  ;;  %v5046_v54 = vmul.f32 %v6916_v25, %v4611_v12  ;;  %v7019_v12 = vld [vmem:[#allocation13_spill] sm:$0xff]  ;;  %v7040_v24 = vld [vmem:[#allocation246_spill] sm:$0xff] }
 0x17c   :  { %7017 = vst [vmem:[#allocation211_spill] sm:$0xff] %v5028_v19  ;;  %v5049_v23 = vmul.f32 %v2535_v34, %v6885_v59  ;;  %v5053_v40 = vmul.f32 %v6885_v59, %v5017_v14  ;;  %v5056_v52 = vmul.f32 %v2535_v34, %v4488_v60  ;;  %v5060_v62 = vmul.f32 %v4488_v60, %v5017_v14 }
 0x17d   :  { %v5064_v56 = vmul.f32 %v7019_v12, %v5017_v14  ;;  %v5070_v15 = vmul.f32 %v7021_v22, %v4535_v53  ;;  %v5074_v3 = vmul.f32 %v7023_v44, %v4535_v53  ;;  %v5078_v49 = vmul.f32 %v7023_v44, %v4701_v48 }
 0x17e   :  { %v5082_v29 = vmul.f32 %v7026_v30, %v4535_v53  ;;  %v5086_v13 = vmul.f32 %v7026_v30, %v4701_v48  ;;  %v5090_v11 = vmul.f32 %v7026_v30, %v4757_v4  ;;  %v5093_v20 = vmul.f32 %v7030_v63, %v1778_v38  ;;  %v7038_v4 = vld [vmem:[#allocation174_spill] sm:$0xff]  ;;  %v7044_v38 = vld [vmem:[#allocation17_spill] sm:$0xff] }
 0x17f   :  { %7022 = vst [vmem:[#allocation152_spill] sm:$0xff] %v5070_v15  ;;  %7024 = vst [vmem:[#allocation253_spill] sm:$0xff] %v5074_v3  ;;  %v5096_v55 = vmul.f32 %v7030_v63, %v1779_v50  ;;  %v1587_v8 = vadd.f32 %v7033_v61, %v1567_v5  ;;  %v5101_v53 = vmul.f32 %v7030_v63, %v5066_v21  ;;  %v7042_v5 = vld [vmem:[#allocation122_spill] sm:$0xff] }
 0x180   :  { %7025 = vst [vmem:[#allocation254_spill] sm:$0xff] %v5078_v49  ;;  %7027 = vst [vmem:[#allocation255_spill] sm:$0xff] %v5082_v29  ;;  %v5104_v18 = vmul.f32 %v7035_v36, %v1779_v50  ;;  %v5108_v48 = vmul.f32 %v7035_v36, %v5066_v21  ;;  %v5112_v39 = vmul.f32 %v7038_v4, %v5066_v21  ;;  %v1311_v61 = vld [vmem:[#allocation2 + $0x30] sm:$0xff]  ;;  %v7061_v36 = vld [vmem:[#allocation42_spill] sm:$0xff] }
 0x181   :  { %7028 = vst [vmem:[#allocation159_spill] sm:$0xff] %v5086_v13  ;;  %7029 = vst [vmem:[#allocation288_spill] sm:$0xff] %v5090_v11  ;;  %v5116_v42 = vmul.f32 %v4986_v58, %v7040_v24  ;;  %v5120_v34 = vmul.f32 %v7042_v5, %v7040_v24  ;;  %v5124_v50 = vrot.slane %v7044_v38, %v7013_v51  ;;  %v7051_v38 = vld [vmem:[#allocation15_spill] sm:$0xff]  ;;  %v7056_v4 = vld [vmem:[#allocation129_spill] sm:$0xff] }
 0x182   :  { %7031 = vst [vmem:[#allocation289_spill] sm:$0xff] %v5093_v20  ;;  %7032 = vst [vmem:[#allocation291_spill] sm:$0xff] %v5096_v55  ;;  %v5128_v32 = vmul.f32 %v7042_v5, %v4819_v10  ;;  %v5132_v28 = vmul.f32 %v7047_v57, %v7040_v24  ;;  %v5136_v21 = vmul.f32 %v7047_v57, %v4819_v10  ;;  %v5145_v5 = vld [vmem:[#allocation2 + $0x60] sm:$0xff]  ;;  %v7066_v49 = vld [vmem:[#allocation21_spill] sm:$0xff] }
 0x183   :  { %7034 = vst [vmem:[#allocation171_spill] sm:$0xff] %v5101_v53  ;;  %7036 = vst [vmem:[#allocation316_spill] sm:$0xff] %v5104_v18  ;;  %v1340_v58 = vmul.f32 %v7051_v38, %v1311_v61  ;;  %v5161_v18 = vadd.f32 %v7056_v4, %v1587_v8  ;;  %v7057_v53 = vld [vmem:[#allocation11_spill] sm:$0xff]  ;;  %v5202_v30 = vld [vmem:[#allocation2 + $0x74] sm:$0xff] }
 0x184   :  { %7037 = vst [vmem:[#allocation317_spill] sm:$0xff] %v5108_v48  ;;  %7039 = vst [vmem:[#allocation318_spill] sm:$0xff] %v5112_v39  ;;  %v1312_v39 = vld [vmem:[#allocation2 + $0x40] sm:$0xff]  ;;  %v5143_v48 = vld [vmem:[#allocation2 + $0x50] sm:$0xff]  ;;  %v5165_v55 = vrot.slane %v7057_v53, %v7013_v51 }
 0x185   :  { %7041 = vst [vmem:[#allocation201_spill] sm:$0xff] %v5116_v42  ;;  %7043 = vst [vmem:[#allocation256_spill] sm:$0xff] %v5120_v34  ;;  %v5140_v34 = vmul.f32 %v7047_v57, %v4828_v17  ;;  %v1956_v42 = vld [vmem:[#allocation2 + $0x4] sm:$0xff]  ;;  %v1341_v4 = vmul.f32 %v7051_v38, %v1312_v39 }
 0x186   :  { %7045 = vst [vmem:[#allocation229_spill] sm:$0xff] %v5124_v50  ;;  %7046 = vst [vmem:[#allocation240_spill] sm:$0xff] %v5128_v32  ;;  %v5149_v32 = vmul.f32 %v7006_v41, %v7040_v24  ;;  %v7059_v24 = vld [vmem:[#allocation12_spill] sm:$0xff] }
 0x187   :  { %7048 = vst [vmem:[#allocation118_spill] sm:$0xff] %v5132_v28  ;;  %7049 = vst [vmem:[#allocation153_spill] sm:$0xff] %v5136_v21  ;;  %v5153_v28 = vmul.f32 %v7006_v41, %v4819_v10  ;;  %v5157_v21 = vmul.f32 %v7006_v41, %v4828_v17  ;;  %v1348_v10 = vadd.f32 %v1340_v58, %v7061_v36  ;;  %v5195_v29 = vld [vmem:[#allocation2 + $0x24] sm:$0xff] }
 0x188   :  { %7050 = vst [vmem:[#allocation165_spill] sm:$0xff] %v5140_v34  ;;  %7052 = vst [vmem:[#allocation302_spill] sm:$0xff] %v5149_v32  ;;  %v7055_v34 = vld [vmem:[#allocation14_spill] sm:$0xff]  ;;  %v5169_v32 = vrot.slane %v7059_v24, %v7013_v51  ;;  %v1342_v51 = vmul.f32 %v7051_v38, %v5143_v48  ;;  %v1378_v58 = vmul.f32 %v4906_v1, %v1311_v61 }
 0x189   :  { %7053 = vst [vmem:[#allocation186_spill] sm:$0xff] %v5153_v28  ;;  %7054 = vst [vmem:[#allocation187_spill] sm:$0xff] %v5157_v21  ;;  %v1329_v57 = vmul.f32 %v7055_v34, %v1311_v61  ;;  %v7062_v28 = vld [vmem:[#allocation16_spill] sm:$0xff]  ;;  %v1330_v17 = vmul.f32 %v7055_v34, %v1312_v39  ;;  %v5175_v21 = vmul.f32 %v5124_v50, %v1956_v42  ;;  %v5184_v24 = vld [vmem:[#allocation2 + $0x14] sm:$0xff] }
 0x18a   :  { %7058 = vst [vmem:[#allocation224_spill] sm:$0xff] %v5165_v55  ;;  %7060 = vst [vmem:[#allocation213_spill] sm:$0xff] %v5169_v32  ;;  %v1359_v20 = vmul.f32 %v7062_v28, %v1311_v61  ;;  %v1331_v8 = vmul.f32 %v7055_v34, %v5143_v48  ;;  %v1332_v53 = vmul.f32 %v7055_v34, %v5145_v5  ;;  %v7064_v34 = vld [vmem:[#allocation175_spill] sm:$0xff] }
 0x18b   :  { %7063 = vst [vmem:[#allocation180_spill] sm:$0xff] %v5175_v21  ;;  %v1343_v36 = vmul.f32 %v7051_v38, %v5145_v5  ;;  %v1360_v42 = vmul.f32 %v7062_v28, %v1312_v39  ;;  %v1361_v21 = vmul.f32 %v7062_v28, %v5143_v48  ;;  %v1349_v41 = vadd.f32 %v1341_v4, %v1329_v57 }
 0x18c   :  { %v1350_v14 = vadd.f32 %v1342_v51, %v1330_v17  ;;  %v1352_v11 = vadd.f32 %v7064_v34, %v1332_v53  ;;  %v1362_v13 = vmul.f32 %v7062_v28, %v5145_v5  ;;  %7065 = vst [vmem:[#allocation214_spill] sm:$0xff] %v5195_v29  ;;  %v1367_v3 = vadd.f32 %v1359_v20, %v7066_v49  ;;  %v7069_v17 = vld [vmem:[#allocation133_spill] sm:$0xff]  ;;  %v7070_v28 = vld [vmem:[#allocation204_spill] sm:$0xff] }
 0x18d   :  { %v1351_v61 = vadd.f32 %v1343_v36, %v1331_v8  ;;  %v1368_v32 = vadd.f32 %v1360_v42, %v1348_v10  ;;  %v5200_v38 = vmul.f32 %v5124_v50, %v5184_v24  ;;  %7068 = vst [vmem:[#allocation154_spill] sm:$0xff] %v5202_v30  ;;  %v1369_v15 = vadd.f32 %v1361_v21, %v1349_v41  ;;  %v7072_v10 = vld [vmem:[#allocation25_spill] sm:$0xff] }
 0x18e   :  { %v1370_v57 = vadd.f32 %v1362_v13, %v1350_v14  ;;  %v1372_v4 = vadd.f32 %v7069_v17, %v1352_v11  ;;  %v1381_v53 = vmul.f32 %v4906_v1, %v5145_v5  ;;  %v1379_v34 = vmul.f32 %v4906_v1, %v1312_v39  ;;  %v1457_v41 = vld [vmem:[#allocation2 + $0x31] sm:$0xff] }
 0x18f   :  { %7067 = vst [vmem:[#allocation215_spill] sm:$0xff] %v5200_v38  ;;  %v1371_v51 = vadd.f32 %v7070_v28, %v1351_v61  ;;  %v1380_v49 = vmul.f32 %v4906_v1, %v5143_v48  ;;  %v5213_v20 = vmul.f32 %v5124_v50, %v5195_v29  ;;  %v1386_v8 = vadd.f32 %v1378_v58, %v7072_v10  ;;  %v7073_v61 = vld [vmem:[#allocation146_spill] sm:$0xff]  ;;  %v7076_v38 = vld [vmem:[#allocation123_spill] sm:$0xff]  ;;  %v7078_v10 = vld [vmem:[#allocation237_spill] sm:$0xff] }
 0x190   :  { %v1389_v14 = vadd.f32 %v1381_v53, %v1369_v15  ;;  %v1390_v21 = vadd.f32 %v4952_v47, %v1370_v57  ;;  %v1392_v13 = vadd.f32 %v4963_v46, %v1372_v4  ;;  %v1387_v11 = vadd.f32 %v1379_v34, %v1367_v3  ;;  %v7075_v1 = vld [vmem:[#allocation26_spill] sm:$0xff]  ;;  %v7077_v50 = vld [vmem:[#allocation199_spill] sm:$0xff] }
 0x191   :  { %7071 = vst [vmem:[#allocation257_spill] sm:$0xff] %v5213_v20  ;;  %v1388_v36 = vadd.f32 %v1380_v49, %v1368_v32  ;;  %v1391_v42 = vadd.f32 %v4956_v35, %v1371_v51  ;;  %v5221_v17 = vmul.f32 %v7073_v61, %v5202_v30  ;;  %v1398_v28 = vmul.f32 %v7075_v1, %v1312_v39  ;;  %v7079_v53 = vld [vmem:[#allocation94_spill] sm:$0xff]  ;;  %v1458_v57 = vld [vmem:[#allocation2 + $0x41] sm:$0xff]  ;;  %v7083_v49 = vld [vmem:[#allocation45_spill] sm:$0xff] }
 0x192   :  { %v1409_v20 = vadd.f32 %v7076_v38, %v1389_v14  ;;  %v1410_v58 = vadd.f32 %v7077_v50, %v1390_v21  ;;  %v1412_v15 = vadd.f32 %v7078_v10, %v1392_v13  ;;  %v1475_v47 = vmul.f32 %v7079_v53, %v1457_v41  ;;  %v7080_v32 = vld [vmem:[#allocation38_spill] sm:$0xff]  ;;  %v7081_v51 = vld [vmem:[#allocation248_spill] sm:$0xff]  ;;  %v7082_v34 = vld [vmem:[#allocation35_spill] sm:$0xff] }
 0x193   :  { %7074 = vst [vmem:[#allocation258_spill] sm:$0xff] %v5221_v17  ;;  %v1399_v46 = vmul.f32 %v7075_v1, %v5143_v48  ;;  %v1400_v35 = vmul.f32 %v7075_v1, %v5145_v5  ;;  %v1411_v3 = vadd.f32 %v7080_v32, %v1391_v42  ;;  %v1406_v4 = vadd.f32 %v1398_v28, %v1386_v8  ;;  %v5236_v14 = vld [vmem:[#allocation2 + $0x51] sm:$0xff]  ;;  %v5238_v21 = vld [vmem:[#allocation2 + $0x61] sm:$0xff] }
 0x194   :  { %v1429_v39 = vadd.f32 %v7081_v51, %v1409_v20  ;;  %v1430_v38 = vadd.f32 %v7082_v34, %v1410_v58  ;;  %v1432_v50 = vadd.f32 %v7083_v49, %v1412_v15  ;;  %v7084_v17 = vld [vmem:[#allocation27_spill] sm:$0xff]  ;;  %v7085_v1 = vld [vmem:[#allocation108_spill] sm:$0xff]  ;;  %v7087_v8 = vld [vmem:[#allocation138_spill] sm:$0xff]  ;;  %v1476_v58 = vmul.f32 %v7079_v53, %v1458_v57 }
 0x195   :  { %v1407_v13 = vadd.f32 %v1399_v46, %v1387_v11  ;;  %v1408_v10 = vadd.f32 %v1400_v35, %v1388_v36  ;;  %v1418_v61 = vmul.f32 %v7084_v17, %v5143_v48  ;;  %v1431_v30 = vadd.f32 %v7085_v1, %v1411_v3  ;;  %v7086_v42 = vld [vmem:[#allocation163_spill] sm:$0xff]  ;;  %v7088_v20 = vld [vmem:[#allocation48_spill] sm:$0xff] }
 0x196   :  { %v1449_v32 = vadd.f32 %v7086_v42, %v1429_v39  ;;  %v1450_v28 = vadd.f32 %v7087_v8, %v1430_v38  ;;  %v1452_v51 = vadd.f32 %v7088_v20, %v1432_v50  ;;  %v1419_v15 = vmul.f32 %v7084_v17, %v5145_v5  ;;  %v7089_v34 = vld [vmem:[#allocation47_spill] sm:$0xff] }
 0x197   :  { %v1451_v49 = vadd.f32 %v7089_v34, %v1431_v30  ;;  %v1477_v11 = vmul.f32 %v7079_v53, %v5236_v14  ;;  %v1478_v48 = vmul.f32 %v7079_v53, %v5238_v21  ;;  %v7090_v35 = vld [vmem:[#allocation95_spill] sm:$0xff]  ;;  %v1426_v38 = vadd.f32 %v1418_v61, %v1406_v4  ;;  %v7091_v30 = vld [vmem:[#allocation205_spill] sm:$0xff]  ;;  %v7095_v4 = vld [vmem:[#allocation28_spill] sm:$0xff] }
 0x198   :  { %v1483_v36 = vadd.f32 %v1475_v47, %v1449_v32  ;;  %v1484_v46 = vadd.f32 %v1476_v58, %v1450_v28  ;;  %v1495_v3 = vmul.f32 %v7090_v35, %v1458_v57  ;;  %v1496_v39 = vmul.f32 %v7090_v35, %v5236_v14  ;;  %v7092_v34 = vld [vmem:[#allocation99_spill] sm:$0xff]  ;;  %v7093_v28 = vld [vmem:[#allocation150_spill] sm:$0xff] }
 0x199   :  { %v1485_v50 = vadd.f32 %v1477_v11, %v1451_v49  ;;  %v1486_v1 = vadd.f32 %v1478_v48, %v1452_v51  ;;  %v1497_v17 = vmul.f32 %v7090_v35, %v5238_v21  ;;  %v1428_v42 = vadd.f32 %v7091_v30, %v1408_v10  ;;  %v7094_v29 = vld [vmem:[#allocation279_spill] sm:$0xff] }
 0x19a   :  { %v1503_v8 = vadd.f32 %v1495_v3, %v1483_v36  ;;  %v1504_v20 = vadd.f32 %v1496_v39, %v1484_v46  ;;  %v1516_v53 = vmul.f32 %v7092_v34, %v5238_v21  ;;  %v1427_v47 = vadd.f32 %v1419_v15, %v1407_v13  ;;  %v7096_v13 = vld [vmem:[#allocation247_spill] sm:$0xff]  ;;  %v7098_v39 = vld [vmem:[#allocation34_spill] sm:$0xff] }
 0x19b   :  { %v1505_v32 = vadd.f32 %v1497_v17, %v1485_v50  ;;  %v1506_v58 = vadd.f32 %v7093_v28, %v1486_v1  ;;  %v1641_v44 = vadd.f32 %v7094_v29, %v5161_v18  ;;  %v1494_v61 = vmul.f32 %v7090_v35, %v1457_v41  ;;  %v7097_v36 = vld [vmem:[#allocation39_spill] sm:$0xff]  ;;  %v7099_v50 = vld [vmem:[#allocation206_spill] sm:$0xff] }
 0x19c   :  { %v1438_v51 = vmul.f32 %v7095_v4, %v5145_v5  ;;  %v1515_v10 = vmul.f32 %v7092_v34, %v5236_v14  ;;  %v1524_v49 = vadd.f32 %v1516_v53, %v1504_v20  ;;  %v1513_v11 = vmul.f32 %v7092_v34, %v1457_v41  ;;  %v5279_v30 = vld [vmem:[#allocation2 + $0x42] sm:$0xff]  ;;  %v5281_v20 = vld [vmem:[#allocation2 + $0x52] sm:$0xff] }
 0x19d   :  { %v1532_v48 = vmul.f32 %v4942_v33, %v1457_v41  ;;  %v1525_v15 = vadd.f32 %v7096_v13, %v1505_v32  ;;  %v1526_v46 = vadd.f32 %v7097_v36, %v1506_v58  ;;  %v1448_v29 = vadd.f32 %v7098_v39, %v1428_v42  ;;  %v7100_v41 = vld [vmem:[#allocation209_spill] sm:$0xff]  ;;  %v7104_v4 = vld [vmem:[#allocation40_spill] sm:$0xff] }
 0x19e   :  { %v1446_v3 = vadd.f32 %v1438_v51, %v1426_v38  ;;  %v1523_v18 = vadd.f32 %v1515_v10, %v1503_v8  ;;  %v1544_v35 = vadd.f32 %v4967_v6, %v1524_v49  ;;  %v1447_v5 = vadd.f32 %v7099_v50, %v1427_v47  ;;  %v7101_v6 = vld [vmem:[#allocation24_spill] sm:$0xff]  ;;  %v7105_v10 = vld [vmem:[#allocation249_spill] sm:$0xff] }
 0x19f   :  { %v1545_v1 = vadd.f32 %v4980_v9, %v1525_v15  ;;  %v1546_v17 = vadd.f32 %v4995_v37, %v1526_v46  ;;  %v1661_v53 = vadd.f32 %v7100_v41, %v1641_v44  ;;  %v1514_v32 = vmul.f32 %v7092_v34, %v1458_v57  ;;  %v5289_v47 = vld [vmem:[#allocation2 + $0x62] sm:$0xff]  ;;  %v7102_v9 = vld [vmem:[#allocation102_spill] sm:$0xff]  ;;  %v7107_v46 = vld [vmem:[#allocation177_spill] sm:$0xff] }
 0x1a0   :  { %v1533_v38 = vmul.f32 %v4942_v33, %v1458_v57  ;;  %v1535_v42 = vmul.f32 %v4942_v33, %v5238_v21  ;;  %v1564_v8 = vadd.f32 %v7101_v6, %v1544_v35  ;;  %v1552_v28 = vmul.f32 %v7102_v9, %v1458_v57  ;;  %v7103_v37 = vld [vmem:[#allocation294_spill] sm:$0xff]  ;;  %v7106_v13 = vld [vmem:[#allocation176_spill] sm:$0xff] }
 0x1a1   :  { %v1565_v58 = vadd.f32 %v7103_v37, %v1545_v1  ;;  %v1566_v51 = vadd.f32 %v7104_v4, %v1546_v17  ;;  %v1681_v49 = vadd.f32 %v7105_v10, %v1661_v53  ;;  %v1630_v15 = vmul.f32 %v6885_v59, %v5279_v30  ;;  %v7108_v35 = vld [vmem:[#allocation120_spill] sm:$0xff]  ;;  %v7110_v53 = vld [vmem:[#allocation109_spill] sm:$0xff]  ;;  %v7111_v6 = vld [vmem:[#allocation110_spill] sm:$0xff] }
 0x1a2   :  { %v1543_v44 = vadd.f32 %v1535_v42, %v1523_v18  ;;  %v1584_v34 = vadd.f32 %v7106_v13, %v1564_v8  ;;  %v1631_v36 = vmul.f32 %v6885_v59, %v5281_v20  ;;  %v1632_v57 = vmul.f32 %v6885_v59, %v5289_v47  ;;  %v7109_v17 = vld [vmem:[#allocation208_spill] sm:$0xff]  ;;  %v7112_v37 = vld [vmem:[#allocation125_spill] sm:$0xff]  ;;  %v7113_v10 = vld [vmem:[#allocation126_spill] sm:$0xff] }
 0x1a3   :  { %v1585_v39 = vadd.f32 %v7107_v46, %v1565_v58  ;;  %v1586_v50 = vadd.f32 %v7108_v35, %v1566_v51  ;;  %v1701_v1 = vadd.f32 %v5015_v45, %v1681_v49  ;;  %v1650_v18 = vmul.f32 %v4488_v60, %v5281_v20  ;;  %v7114_v13 = vld [vmem:[#allocation134_spill] sm:$0xff]  ;;  %v7115_v46 = vld [vmem:[#allocation111_spill] sm:$0xff]  ;;  %v7116_v49 = vld [vmem:[#allocation112_spill] sm:$0xff] }
 0x1a4   :  { %v1604_v41 = vadd.f32 %v7109_v17, %v1584_v34  ;;  %v1480_v42 = vadd.f32 %v7110_v53, %v1446_v3  ;;  %v1481_v8 = vadd.f32 %v7111_v6, %v1447_v5  ;;  %v1482_v35 = vadd.f32 %v7115_v46, %v1448_v29  ;;  %v7117_v17 = vld [vmem:[#allocation114_spill] sm:$0xff]  ;;  %v7119_v5 = vld [vmem:[#allocation136_spill] sm:$0xff] }
 0x1a5   :  { %v1605_v4 = vadd.f32 %v7112_v37, %v1585_v39  ;;  %v1606_v58 = vadd.f32 %v7113_v10, %v1586_v50  ;;  %v1721_v51 = vadd.f32 %v7114_v13, %v1701_v1  ;;  %v1651_v45 = vmul.f32 %v4488_v60, %v5289_v47  ;;  %v7120_v1 = vld [vmem:[#allocation115_spill] sm:$0xff]  ;;  %v7121_v10 = vld [vmem:[#allocation280_spill] sm:$0xff]  ;;  %v7122_v13 = vld [vmem:[#allocation141_spill] sm:$0xff] }
 0x1a6   :  { %v1638_v22 = vadd.f32 %v1630_v15, %v1604_v41  ;;  %v1500_v34 = vadd.f32 %v7116_v49, %v1480_v42  ;;  %v1501_v19 = vadd.f32 %v7117_v17, %v1481_v8  ;;  %v1563_v3 = vadd.f32 %v7118_v31, %v1543_v44 }
 0x1a7   :  { %v1640_v53 = vadd.f32 %v1632_v57, %v1606_v58  ;;  %v1741_v6 = vadd.f32 %v7119_v5, %v1721_v51  ;;  %v1502_v39 = vadd.f32 %v1494_v61, %v1482_v35  ;;  %v1670_v50 = vmul.f32 %v7019_v12, %v5289_v47  ;;  %v7123_v58 = vld [vmem:[#allocation151_spill] sm:$0xff]  ;;  %v7124_v35 = vld [vmem:[#allocation20_spill] sm:$0xff] }
 0x1a8   :  { %v1520_v37 = vadd.f32 %v7120_v1, %v1500_v34  ;;  %v1521_v29 = vadd.f32 %v1513_v11, %v1501_v19  ;;  %v1534_v15 = vmul.f32 %v4942_v33, %v5236_v14  ;;  %v1639_v41 = vadd.f32 %v1631_v36, %v1605_v4  ;;  %v7125_v11 = vld [vmem:[#allocation41_spill] sm:$0xff] }
 0x1a9   :  { %v1660_v42 = vadd.f32 %v7121_v10, %v1640_v53  ;;  %v1761_v8 = vadd.f32 %v7122_v13, %v1741_v6  ;;  %v1522_v46 = vadd.f32 %v1514_v32, %v1502_v39  ;;  %v1658_v31 = vadd.f32 %v1650_v18, %v1638_v22  ;;  %v7127_v6 = vld [vmem:[#allocation158_spill] sm:$0xff] }
 0x1aa   :  { %v1540_v44 = vadd.f32 %v1532_v48, %v1520_v37  ;;  %v1541_v57 = vadd.f32 %v1533_v38, %v1521_v29  ;;  %v1553_v61 = vmul.f32 %v7102_v9, %v5236_v14  ;;  %v1554_v33 = vmul.f32 %v7102_v9, %v5238_v21  ;;  %v7126_v38 = vld [vmem:[#allocation170_spill] sm:$0xff] }
 0x1ab   :  { %v1680_v51 = vadd.f32 %v7123_v58, %v1660_v42  ;;  %v1811_v49 = vadd.f32 %v7124_v35, %v1761_v8  ;;  %v1542_v19 = vadd.f32 %v1534_v15, %v1522_v46  ;;  %v1583_v36 = vadd.f32 %v7125_v11, %v1563_v3  ;;  %v5351_v37 = vld [vmem:[#allocation2 + $0x32] sm:$0xff]  ;;  %v7135_v11 = vld [vmem:[#allocation144_spill] sm:$0xff] }
 0x1ac   :  { %v1560_v4 = vadd.f32 %v1552_v28, %v1540_v44  ;;  %v1561_v34 = vadd.f32 %v1553_v61, %v1541_v57  ;;  %v1572_v22 = vmul.f32 %v6910_v16, %v5236_v14  ;;  %v1659_v48 = vadd.f32 %v1651_v45, %v1639_v41  ;;  %v5347_v45 = vld [vmem:[#allocation2 + $0x63] sm:$0xff] }
 0x1ad   :  { %v1700_v32 = vadd.f32 %v5011_v26, %v1680_v51  ;;  %v1831_v18 = vadd.f32 %v7126_v38, %v1811_v49  ;;  %v1562_v17 = vadd.f32 %v1554_v33, %v1542_v19  ;;  %v1573_v53 = vmul.f32 %v6910_v16, %v5238_v21  ;;  %v7128_v26 = vld [vmem:[#allocation200_spill] sm:$0xff]  ;;  %v7129_v16 = vld [vmem:[#allocation207_spill] sm:$0xff]  ;;  %v7134_v51 = vld [vmem:[#allocation142_spill] sm:$0xff] }
 0x1ae   :  { %v1580_v5 = vadd.f32 %v1572_v22, %v1560_v4  ;;  %v1592_v9 = vmul.f32 %v6916_v25, %v5238_v21  ;;  %v5344_v28 = vmul.f32 %v5165_v55, %v5184_v24  ;;  %v1678_v3 = vadd.f32 %v1670_v50, %v1658_v31  ;;  %v7130_v24 = vld [vmem:[#allocation281_spill] sm:$0xff]  ;;  %v7131_v50 = vld [vmem:[#allocation135_spill] sm:$0xff]  ;;  %v7132_v31 = vld [vmem:[#allocation130_spill] sm:$0xff] }
 0x1af   :  { %v1720_v14 = vadd.f32 %v7127_v6, %v1700_v32  ;;  %v1851_v39 = vadd.f32 %v7128_v26, %v1831_v18  ;;  %v1582_v1 = vadd.f32 %v5036_v27, %v1562_v17  ;;  %v1603_v29 = vadd.f32 %v7129_v16, %v1583_v36  ;;  %v7133_v61 = vld [vmem:[#allocation140_spill] sm:$0xff]  ;;  %v7137_v22 = vld [vmem:[#allocation250_spill] sm:$0xff]  ;;  %v7138_v32 = vld [vmem:[#allocation169_spill] sm:$0xff] }
 0x1b0   :  { %v1763_v25 = vmax.f32 %v5281_v20, %v5279_v30  ;;  %v1581_v21 = vadd.f32 %v1573_v53, %v1561_v34  ;;  %v1600_v15 = vadd.f32 %v1592_v9, %v1580_v5  ;;  %v1679_v41 = vadd.f32 %v7130_v24, %v1659_v48  ;;  %v5389_v18 = vld [vmem:[#allocation2 + $0x53] sm:$0xff]  ;;  %v7139_v17 = vld [vmem:[#allocation164_spill] sm:$0xff]  ;;  %v7141_v16 = vld [vmem:[#allocation251_spill] sm:$0xff] }
 0x1b1   :  { %v1740_v10 = vadd.f32 %v7131_v50, %v1720_v14  ;;  %v1871_v42 = vadd.f32 %v5032_v0, %v1851_v39  ;;  %v1602_v13 = vadd.f32 %v5046_v54, %v1582_v1  ;;  %v1802_v27 = vmul.f32 %v7030_v63, %v5347_v45  ;;  %v7143_v24 = vld [vmem:[#allocation116_spill] sm:$0xff] }
 0x1b2   :  { %v1601_v8 = vadd.f32 %v5042_v7, %v1581_v21  ;;  %v1629_v46 = vmul.f32 %v6885_v59, %v5351_v37  ;;  %v1634_v44 = vadd.f32 %v7132_v31, %v1600_v15  ;;  %v1698_v57 = vadd.f32 %v5003_v2, %v1678_v3  ;;  %v7140_v3 = vld [vmem:[#allocation148_spill] sm:$0xff]  ;;  %v7142_v21 = vld [vmem:[#allocation211_spill] sm:$0xff] }
 0x1b3   :  { %v1760_v58 = vadd.f32 %v7133_v61, %v1740_v10  ;;  %v1891_v35 = vadd.f32 %v7134_v51, %v1871_v42  ;;  %v1636_v0 = vadd.f32 %v5053_v40, %v1602_v13  ;;  %v1648_v19 = vmul.f32 %v4488_v60, %v5351_v37  ;;  %v7144_v50 = vld [vmem:[#allocation284_spill] sm:$0xff] }
 0x1b4   :  { %v1635_v54 = vadd.f32 %v5049_v23, %v1601_v8  ;;  %v1637_v49 = vadd.f32 %v1629_v46, %v1603_v29  ;;  %v1649_v7 = vmul.f32 %v4488_v60, %v5279_v30  ;;  %v1699_v59 = vadd.f32 %v5007_v43, %v1679_v41  ;;  %v7145_v8 = vld [vmem:[#allocation310_spill] sm:$0xff]  ;;  %v7147_v51 = vld [vmem:[#allocation152_spill] sm:$0xff] }
 0x1b5   :  { %v1810_v33 = vadd.f32 %v1802_v27, %v1760_v58  ;;  %v5377_v2 = vadd.f32 %v7135_v11, %v1891_v35  ;;  %v1654_v36 = vadd.f32 %v5056_v52, %v1634_v44  ;;  %v1656_v40 = vadd.f32 %v1648_v19, %v1636_v0  ;;  %v7149_v19 = vld [vmem:[#allocation143_spill] sm:$0xff]  ;;  %v7151_v11 = vld [vmem:[#allocation121_spill] sm:$0xff] }
 0x1b6   :  { %v1655_v4 = vadd.f32 %v5060_v62, %v1635_v54  ;;  %v1657_v34 = vadd.f32 %v1649_v7, %v1637_v49  ;;  %v1667_v23 = vmul.f32 %v7019_v12, %v5351_v37  ;;  %v1718_v48 = vadd.f32 %v7137_v22, %v1698_v57  ;;  %v7146_v57 = vld [vmem:[#allocation117_spill] sm:$0xff]  ;;  %v7148_v54 = vld [vmem:[#allocation214_spill] sm:$0xff] }
 0x1b7   :  { %7136 = vst [vmem:[#allocation259_spill] sm:$0xff] %v5377_v2  ;;  %v1830_v38 = vadd.f32 %v7138_v32, %v1810_v33  ;;  %v1668_v60 = vmul.f32 %v7019_v12, %v5279_v30  ;;  %v1669_v43 = vmul.f32 %v7019_v12, %v5281_v20  ;;  %v1674_v52 = vadd.f32 %v5064_v56, %v1654_v36  ;;  %v7153_v22 = vld [vmem:[#allocation253_spill] sm:$0xff]  ;;  %v7154_v32 = vld [vmem:[#allocation254_spill] sm:$0xff] }
 0x1b8   :  { %v1675_v62 = vadd.f32 %v1667_v23, %v1655_v4  ;;  %v1686_v53 = vmul.f32 %v7139_v17, %v5351_v37  ;;  %v1687_v5 = vmul.f32 %v7139_v17, %v5279_v30  ;;  %v5397_v9 = vmax.f32 %v1763_v25, %v5389_v18  ;;  %v7152_v4 = vld [vmem:[#allocation213_spill] sm:$0xff] }
 0x1b9   :  { %v1850_v6 = vadd.f32 %v7140_v3, %v1830_v38  ;;  %v1676_v14 = vadd.f32 %v1668_v60, %v1656_v40  ;;  %v1677_v26 = vadd.f32 %v1669_v43, %v1657_v34  ;;  %v1688_v12 = vmul.f32 %v7139_v17, %v5281_v20  ;;  %v5436_v60 = vld [vmem:[#allocation2 + $0x33] sm:$0xff]  ;;  %v5438_v43 = vld [vmem:[#allocation2 + $0x43] sm:$0xff] }
 0x1ba   :  { %v1689_v56 = vmul.f32 %v7139_v17, %v5289_v47  ;;  %v1694_v39 = vadd.f32 %v1686_v53, %v1674_v52  ;;  %v1695_v1 = vadd.f32 %v1687_v5, %v1675_v62  ;;  %v1719_v29 = vadd.f32 %v7141_v16, %v1699_v59  ;;  %v5424_v59 = vld [vmem:[#allocation2 + $0x54] sm:$0xff] }
 0x1bb   :  { %v1870_v15 = vadd.f32 %v7142_v21, %v1850_v6  ;;  %v1706_v25 = vmul.f32 %v7143_v24, %v5279_v30  ;;  %v1707_v41 = vmul.f32 %v7143_v24, %v5281_v20  ;;  %v1738_v10 = vadd.f32 %v7144_v50, %v1718_v48  ;;  %7150 = vst [vmem:[#allocation278_spill] sm:$0xff] %v5424_v59  ;;  %v7155_v52 = vld [vmem:[#allocation285_spill] sm:$0xff]  ;;  %v7156_v17 = vld [vmem:[#allocation286_spill] sm:$0xff] }
 0x1bc   :  { %v1696_v42 = vadd.f32 %v1688_v12, %v1676_v14  ;;  %v1697_v13 = vadd.f32 %v1689_v56, %v1677_v26  ;;  %v1708_v27 = vmul.f32 %v7143_v24, %v5289_v47  ;;  %v1726_v61 = vmul.f32 %v7146_v57, %v5281_v20  ;;  %v7157_v5 = vld [vmem:[#allocation145_spill] sm:$0xff]  ;;  %v7159_v14 = vld [vmem:[#allocation255_spill] sm:$0xff] }
 0x1bd   :  { %v1890_v46 = vadd.f32 %v7145_v8, %v1870_v15  ;;  %v1714_v31 = vadd.f32 %v1706_v25, %v1694_v39  ;;  %v1715_v44 = vadd.f32 %v1707_v41, %v1695_v1  ;;  %v1727_v0 = vmul.f32 %v7146_v57, %v5289_v47  ;;  %v7160_v12 = vld [vmem:[#allocation159_spill] sm:$0xff]  ;;  %v7161_v39 = vld [vmem:[#allocation288_spill] sm:$0xff]  ;;  %v7162_v16 = vld [vmem:[#allocation185_spill] sm:$0xff] }
 0x1be   :  { %v1716_v58 = vadd.f32 %v1708_v27, %v1696_v42  ;;  %v1717_v35 = vadd.f32 %v7147_v51, %v1697_v13  ;;  %v5421_v49 = vmul.f32 %v5165_v55, %v7148_v54  ;;  %v1746_v36 = vmul.f32 %v7151_v11, %v5289_v47  ;;  %v7163_v24 = vld [vmem:[#allocation289_spill] sm:$0xff]  ;;  %v7166_v13 = vld [vmem:[#allocation171_spill] sm:$0xff]  ;;  %v7167_v57 = vld [vmem:[#allocation316_spill] sm:$0xff] }
 0x1bf   :  { %v1910_v7 = vadd.f32 %v7149_v19, %v1890_v46  ;;  %v1734_v33 = vadd.f32 %v1726_v61, %v1714_v31  ;;  %v5430_v40 = vmul.f32 %v7152_v4, %v7148_v54  ;;  %v1933_v34 = vmax.f32 %v5397_v9, %v5424_v59  ;;  %v7164_v41 = vld [vmem:[#allocation113_spill] sm:$0xff]  ;;  %v7189_v9 = vld [vmem:[#allocation215_spill] sm:$0xff] }
 0x1c0   :  { %v1735_v23 = vadd.f32 %v1727_v0, %v1715_v44  ;;  %v1736_v48 = vadd.f32 %v7153_v22, %v1716_v58  ;;  %v1737_v38 = vadd.f32 %v7154_v32, %v1717_v35  ;;  %v1739_v62 = vadd.f32 %v7155_v52, %v1719_v29  ;;  %v7168_v58 = vld [vmem:[#allocation174_spill] sm:$0xff]  ;;  %v7169_v35 = vld [vmem:[#allocation317_spill] sm:$0xff] }
 0x1c1   :  { %v1758_v53 = vadd.f32 %v7156_v17, %v1738_v10  ;;  %v5443_v3 = vadd.f32 %v7157_v5, %v1910_v7  ;;  %v1754_v6 = vadd.f32 %v1746_v36, %v1734_v33  ;;  %v1762_v21 = vmax.f32 %v7162_v16, %v5351_v37  ;;  %v7165_v10 = vld [vmem:[#allocation291_spill] sm:$0xff]  ;;  %v7170_v22 = vld [vmem:[#allocation318_spill] sm:$0xff] }
 0x1c2   :  { %v1755_v26 = vadd.f32 %v7159_v14, %v1735_v23  ;;  %v1756_v56 = vadd.f32 %v7160_v12, %v1736_v48  ;;  %v1757_v1 = vadd.f32 %v7161_v39, %v1737_v38  ;;  %v1799_v15 = vmul.f32 %v7030_v63, %v5436_v60  ;;  %v7171_v52 = vld [vmem:[#allocation298_spill] sm:$0xff] }
 0x1c3   :  { %7158 = vst [vmem:[#allocation160_spill] sm:$0xff] %v5443_v3  ;;  %v1800_v29 = vmul.f32 %v7030_v63, %v5438_v43  ;;  %v1804_v25 = vadd.f32 %v7163_v24, %v1754_v6  ;;  %v1818_v50 = vmul.f32 %v7164_v41, %v5436_v60  ;;  %v1819_v8 = vmul.f32 %v7164_v41, %v5438_v43  ;;  %v7172_v39 = vld [vmem:[#allocation122_spill] sm:$0xff] }
 0x1c4   :  { %v1805_v42 = vadd.f32 %v7165_v10, %v1755_v26  ;;  %v1806_v27 = vadd.f32 %v7166_v13, %v1756_v56  ;;  %v1820_v46 = vmul.f32 %v7164_v41, %v5389_v18  ;;  %v1807_v31 = vadd.f32 %v1799_v15, %v1757_v1  ;;  %v7173_v15 = vld [vmem:[#allocation139_spill] sm:$0xff] }
 0x1c5   :  { %v1808_v44 = vadd.f32 %v1800_v29, %v1758_v53  ;;  %v1824_v61 = vadd.f32 %v7167_v57, %v1804_v25  ;;  %v1837_v51 = vmul.f32 %v7168_v58, %v5436_v60  ;;  %v1838_v7 = vmul.f32 %v7168_v58, %v5438_v43  ;;  %v7174_v13 = vld [vmem:[#allocation127_spill] sm:$0xff] }
 0x1c6   :  { %v1825_v0 = vadd.f32 %v7169_v35, %v1805_v42  ;;  %v1826_v19 = vadd.f32 %v1818_v50, %v1806_v27  ;;  %v1839_v33 = vmul.f32 %v7168_v58, %v5389_v18  ;;  %v1827_v11 = vadd.f32 %v1819_v8, %v1807_v31  ;;  %v7175_v31 = vld [vmem:[#allocation201_spill] sm:$0xff] }
 0x1c7   :  { %v1828_v36 = vadd.f32 %v1820_v46, %v1808_v44  ;;  %v1840_v23 = vmul.f32 %v7168_v58, %v5347_v45  ;;  %v1844_v48 = vadd.f32 %v7170_v22, %v1824_v61  ;;  %v1856_v17 = vmul.f32 %v7171_v52, %v5436_v60 }
 0x1c8   :  { %v1845_v32 = vadd.f32 %v1837_v51, %v1825_v0  ;;  %v1846_v38 = vadd.f32 %v1838_v7, %v1826_v19  ;;  %v1857_v53 = vmul.f32 %v7171_v52, %v5438_v43  ;;  %v1847_v5 = vadd.f32 %v1839_v33, %v1827_v11  ;;  %v7177_v0 = vld [vmem:[#allocation131_spill] sm:$0xff]  ;;  %v5500_v7 = vld [vmem:[#allocation2 + $0x34] sm:$0xff] }
 0x1c9   :  { %v1848_v6 = vadd.f32 %v1840_v23, %v1828_v36  ;;  %v1858_v14 = vmul.f32 %v7171_v52, %v5389_v18  ;;  %v1859_v26 = vmul.f32 %v7171_v52, %v5347_v45  ;;  %v1864_v12 = vadd.f32 %v1856_v17, %v1844_v48  ;;  %v7178_v11 = vld [vmem:[#allocation118_spill] sm:$0xff]  ;;  %v7179_v23 = vld [vmem:[#allocation153_spill] sm:$0xff]  ;;  %v7181_v48 = vld [vmem:[#allocation147_spill] sm:$0xff] }
 0x1ca   :  { %v1865_v56 = vadd.f32 %v1857_v53, %v1845_v32  ;;  %v1876_v1 = vmul.f32 %v7172_v39, %v5438_v43  ;;  %v1877_v16 = vmul.f32 %v7172_v39, %v5389_v18  ;;  %v1759_v29 = vadd.f32 %v7173_v15, %v1739_v62  ;;  %v7176_v62 = vld [vmem:[#allocation256_spill] sm:$0xff]  ;;  %v7182_v53 = vld [vmem:[#allocation302_spill] sm:$0xff] }
 0x1cb   :  { %v1866_v24 = vadd.f32 %v1858_v14, %v1846_v38  ;;  %v1867_v25 = vadd.f32 %v1859_v26, %v1847_v5  ;;  %v1878_v50 = vmul.f32 %v7172_v39, %v5347_v45  ;;  %v1896_v27 = vmul.f32 %v7174_v13, %v5389_v18  ;;  %v2134_v38 = vld [vmem:[#allocation2 + $0x5] sm:$0xff]  ;;  %v7184_v26 = vld [vmem:[#allocation186_spill] sm:$0xff] }
 0x1cc   :  { %v1884_v10 = vadd.f32 %v1876_v1, %v1864_v12  ;;  %v1885_v42 = vadd.f32 %v1877_v16, %v1865_v56  ;;  %v1897_v8 = vmul.f32 %v7174_v13, %v5347_v45  ;;  %v1801_v46 = vmul.f32 %v7030_v63, %v5389_v18  ;;  %v7180_v63 = vld [vmem:[#allocation154_spill] sm:$0xff]  ;;  %v7185_v56 = vld [vmem:[#allocation187_spill] sm:$0xff]  ;;  %v7186_v1 = vld [vmem:[#allocation229_spill] sm:$0xff] }
 0x1cd   :  { %v1868_v44 = vadd.f32 %v7175_v31, %v1848_v6  ;;  %v1886_v57 = vadd.f32 %v1878_v50, %v1866_v24  ;;  %v1887_v61 = vadd.f32 %v7176_v62, %v1867_v25  ;;  %v1770_v58 = vmax.f32 %v1762_v21, %v5279_v30  ;;  %v7183_v6 = vld [vmem:[#allocation240_spill] sm:$0xff]  ;;  %v7192_v62 = vld [vmem:[#allocation165_spill] sm:$0xff] }
 0x1ce   :  { %v1904_v51 = vadd.f32 %v1896_v27, %v1884_v10  ;;  %v1905_v35 = vadd.f32 %v1897_v8, %v1885_v42  ;;  %v1916_v19 = vmul.f32 %v7177_v0, %v5347_v45  ;;  %v1809_v33 = vadd.f32 %v1801_v46, %v1759_v29  ;;  %v7187_v15 = vld [vmem:[#allocation212_spill] sm:$0xff]  ;;  %v7191_v42 = vld [vmem:[#allocation257_spill] sm:$0xff] }
 0x1cf   :  { %v1906_v36 = vadd.f32 %v7178_v11, %v1886_v57  ;;  %v1907_v22 = vadd.f32 %v7179_v23, %v1887_v61  ;;  %v5506_v32 = vmul.f32 %v7181_v48, %v7180_v63  ;;  %v1821_v21 = vmul.f32 %v7164_v41, %v5347_v45  ;;  %v5521_v41 = vld [vmem:[#allocation2 + $0x44] sm:$0xff] }
 0x1d0   :  { %v1941_v52 = vmax.f32 %v1933_v34, %v5351_v37  ;;  %v1924_v17 = vadd.f32 %v1916_v19, %v1904_v51  ;;  %v1925_v5 = vadd.f32 %v7182_v53, %v1905_v35  ;;  %v1888_v14 = vadd.f32 %v7183_v6, %v1868_v44  ;;  %v7188_v24 = vld [vmem:[#allocation180_spill] sm:$0xff]  ;;  %v7190_v34 = vld [vmem:[#allocation137_spill] sm:$0xff] }
 0x1d1   :  { %v1926_v12 = vadd.f32 %v7184_v26, %v1906_v36  ;;  %v1927_v39 = vadd.f32 %v7185_v56, %v1907_v22  ;;  %v1977_v16 = vmul.f32 %v7186_v1, %v5500_v7  ;;  %v1932_v29 = vmax.f32 %v1770_v58, %v7187_v15  ;;  %v7196_v56 = vld [vmem:[#allocation235_spill] sm:$0xff] }
 0x1d2   :  { %v1982_v25 = vadd.f32 %v7188_v24, %v1924_v17  ;;  %v1983_v37 = vadd.f32 %v7189_v9, %v1925_v5  ;;  %v2152_v50 = vmul.f32 %v7190_v34, %v2134_v38  ;;  %v1829_v10 = vadd.f32 %v1821_v21, %v1809_v33  ;;  %v7194_v21 = vld [vmem:[#allocation19_spill] sm:$0xff] }
 0x1d3   :  { %v1984_v13 = vadd.f32 %v7191_v42, %v1926_v12  ;;  %v1985_v27 = vadd.f32 %v1977_v16, %v1927_v39  ;;  %v1996_v8 = vmul.f32 %v5165_v55, %v5500_v7  ;;  %v1949_v46 = vmax.f32 %v1941_v52, %v5436_v60  ;;  %v5548_v17 = vld [vmem:[#allocation2 + $0x64] sm:$0xff] }
 0x1d4   :  { %v2002_v31 = vadd.f32 %v5344_v28, %v1982_v25  ;;  %v2003_v44 = vadd.f32 %v5421_v49, %v1983_v37  ;;  %v2015_v57 = vmul.f32 %v7152_v4, %v5500_v7  ;;  %v1908_v61 = vadd.f32 %v7192_v62, %v1888_v14  ;;  %v7193_v28 = vld [vmem:[#allocation179_spill] sm:$0xff] }
 0x1d5   :  { %v1997_v58 = vmul.f32 %v5165_v55, %v5521_v41  ;;  %v2004_v51 = vadd.f32 %v1996_v8, %v1984_v13  ;;  %v2016_v35 = vmul.f32 %v7152_v4, %v5521_v41  ;;  %v1940_v19 = vmax.f32 %v1932_v29, %v5436_v60  ;;  %v7197_v29 = vld [vmem:[#allocation146_spill] sm:$0xff]  ;;  %v2536_v8 = vld [vmem:[%s6073_s1 + $0x40] sm:$0x7f] }
 0x1d6   :  { %v2022_v33 = vadd.f32 %v5430_v40, %v2002_v31  ;;  %v2023_v11 = vadd.f32 %v2015_v57, %v2003_v44  ;;  %v2034_v49 = vmul.f32 %v7193_v28, %v5500_v7  ;;  %v2035_v22 = vmul.f32 %v7193_v28, %v5521_v41  ;;  %v7195_v40 = vld [vmem:[#allocation132_spill] sm:$0xff]  ;;  %v7199_v44 = vld [vmem:[#allocation210_spill] sm:$0xff] }
 0x1d7   :  { %v2005_v36 = vadd.f32 %v1997_v58, %v1985_v27  ;;  %v2024_v23 = vadd.f32 %v2016_v35, %v2004_v51  ;;  %v2036_v38 = vmul.f32 %v7193_v28, %v5424_v59  ;;  %v1849_v52 = vadd.f32 %v7194_v21, %v1829_v10  ;;  %v5578_v51 = vld [vmem:[#allocation2 + $0x84] sm:$0xff] }
 0x1d8   :  { %v2111_v60 = vmax.f32 %v1949_v46, %v5438_v43  ;;  %v2042_v53 = vadd.f32 %v2034_v49, %v2022_v33  ;;  %v2054_v5 = vmul.f32 %v7195_v40, %v5521_v41  ;;  %v2017_v6 = vmul.f32 %v7152_v4, %v5424_v59  ;;  %v7198_v46 = vld [vmem:[#allocation32_spill] sm:$0xff] }
 0x1d9   :  { %v2043_v14 = vadd.f32 %v2035_v22, %v2023_v11  ;;  %v2044_v26 = vadd.f32 %v2036_v38, %v2024_v23  ;;  %v2055_v12 = vmul.f32 %v7195_v40, %v5424_v59  ;;  %v1928_v39 = vadd.f32 %v7196_v56, %v1908_v61  ;;  %v2537_v11 = vld [vmem:[%s6073_s1 + $0x48] sm:$0x7f]  ;;  %v2538_v38 = vld [vmem:[%s6073_s1 + $0x50] sm:$0x7f] }
 0x1da   :  { %v1948_v16 = vmax.f32 %v1940_v19, %v5438_v43  ;;  %v2062_v15 = vadd.f32 %v2054_v5, %v2042_v53  ;;  %v2074_v24 = vmul.f32 %v7197_v29, %v5424_v59  ;;  %v2025_v25 = vadd.f32 %v2017_v6, %v2005_v36  ;;  %v2539_v53 = vld [vmem:[#allocation2 + $0x15] sm:$0xff] }
 0x1db   :  { %v2056_v9 = vmul.f32 %v7195_v40, %v5548_v17  ;;  %v2063_v37 = vadd.f32 %v2055_v12, %v2043_v14  ;;  %v2075_v10 = vmul.f32 %v7197_v29, %v5548_v17  ;;  %v1978_v42 = vmul.f32 %v7186_v1, %v5521_v41  ;;  %v7200_v14 = vld [vmem:[#allocation252_spill] sm:$0xff]  ;;  %v7202_v12 = vld [vmem:[#allocation258_spill] sm:$0xff] }
 0x1dc   :  { %v2082_v13 = vadd.f32 %v2074_v24, %v2062_v15  ;;  %v2094_v27 = vmul.f32 %v7181_v48, %v5548_v17  ;;  %v5573_v31 = vrot.slane %v2536_v8, %v7198_v46  ;;  %v1869_v57 = vadd.f32 %v7199_v44, %v1849_v52  ;;  %v5595_v52 = vld [vmem:[#allocation2 + $0x35] sm:$0xff]  ;;  %v5624_v44 = vld [vmem:[#allocation2 + $0x65] sm:$0xff] }
 0x1dd   :  { %v2037_v62 = vmul.f32 %v7193_v28, %v5548_v17  ;;  %v2064_v61 = vadd.f32 %v2056_v9, %v2044_v26  ;;  %v2083_v58 = vadd.f32 %v2075_v10, %v2063_v37  ;;  %v2119_v35 = vmax.f32 %v2111_v60, %v5500_v7  ;;  %v5613_v9 = vld [vmem:[#allocation2 + $0x45] sm:$0xff] }
 0x1de   :  { %v1986_v19 = vadd.f32 %v1978_v42, %v1928_v39  ;;  %v2102_v33 = vadd.f32 %v2094_v27, %v2082_v13  ;;  %v5585_v49 = vrot.slane %v2537_v11, %v7198_v46  ;;  %v2110_v22 = vmax.f32 %v1948_v16, %v7148_v54  ;;  %v5622_v27 = vld [vmem:[#allocation2 + $0x55] sm:$0xff] }
 0x1df   :  { %v2045_v36 = vadd.f32 %v2037_v62, %v2025_v25  ;;  %v2103_v23 = vadd.f32 %v5506_v32, %v2083_v58  ;;  %v5593_v21 = vrot.slane %v2538_v38, %v7198_v46  ;;  %v2057_v60 = vmul.f32 %v7195_v40, %v7180_v63  ;;  %v2540_v25 = vld [vmem:[#allocation2 + $0x25] sm:$0xff]  ;;  %v2541_v62 = vld [vmem:[%s6073_s1 + $0x58] sm:$0x7f] }
 0x1e0   :  { %v2153_v5 = vmul.f32 %v2539_v53, %v7190_v34  ;;  %v2160_v6 = vadd.f32 %v2152_v50, %v2102_v33  ;;  %v2172_v32 = vmul.f32 %v2539_v53, %v5573_v31  ;;  %v5602_v54 = vadd.f32 %v7200_v14, %v1869_v57  ;;  %v2542_v58 = vld [vmem:[%s6073_s1 + $0x38] sm:$0x7f]  ;;  %v2288_v53 = vld [vmem:[#allocation2 + $0x6] sm:$0xff] }
 0x1e1   :  { %v1998_v26 = vmul.f32 %v5165_v55, %v5424_v59  ;;  %v2084_v56 = vadd.f32 %v7202_v12, %v2064_v61  ;;  %v2096_v39 = vmul.f32 %v7181_v48, %v5578_v51  ;;  %v5610_v16 = vmax.f32 %v2119_v35, %v5521_v41  ;;  %v2289_v14 = vld [vmem:[#allocation2 + $0x16] sm:$0xff] }
 0x1e2   :  { %7201 = vst [vmem:[#allocation293_spill] sm:$0xff] %v5602_v54  ;;  %v2161_v15 = vadd.f32 %v2153_v5, %v2103_v23  ;;  %v2180_v24 = vadd.f32 %v2172_v32, %v2160_v6  ;;  %v2192_v50 = vmul.f32 %v2540_v25, %v5585_v49  ;;  %v5617_v10 = vadd.f32 %v2057_v60, %v2045_v36  ;;  %v2543_v36 = vld [vmem:[%s6073_s1 + $0x60] sm:$0x7f] }
 0x1e3   :  { %7203 = vst [vmem:[#allocation230_spill] sm:$0xff] %v5610_v16  ;;  %v5615_v37 = vadd.f32 %v1998_v26, %v1986_v19  ;;  %v2118_v42 = vmax.f32 %v2110_v22, %v5500_v7  ;;  %v2212_v13 = vmul.f32 %v5593_v21, %v5595_v52  ;;  %v5630_v61 = vrot.slane %v2541_v62, %v7198_v46  ;;  %v7205_v7 = vld [vmem:[#allocation33_spill] sm:$0xff]  ;;  %v2544_v22 = vld [vmem:[%s6073_s1 + $0x68] sm:$0x7f] }
 0x1e4   :  { %v2200_v57 = vadd.f32 %v2192_v50, %v2180_v24  ;;  %v5636_v35 = vrot.slane %v2542_v58, %v7205_v7  ;;  %v2173_v19 = vmul.f32 %v2540_v25, %v5573_v31  ;;  %v2104_v33 = vadd.f32 %v2096_v39, %v2084_v56  ;;  %v5668_v25 = vld [vmem:[#allocation2 + $0x26] sm:$0xff] }
 0x1e5   :  { %7204 = vst [vmem:[#allocation295_spill] sm:$0xff] %v5615_v37  ;;  %v5643_v23 = vrot.slane %v2543_v36, %v7198_v46  ;;  %v5649_v60 = vrot.slane %v2544_v22, %v7198_v46  ;;  %v5652_v5 = vrot.slane %v2536_v8, %v7205_v7  ;;  %v2232_v32 = vmul.f32 %v5630_v61, %v5613_v9  ;;  %v5732_v16 = vld [vmem:[#allocation2 + $0x85] sm:$0xff]  ;;  %v5745_v37 = vld [vmem:[#allocation2 + $0x76] sm:$0xff] }
 0x1e6   :  { %v2220_v6 = vadd.f32 %v2212_v13, %v2200_v57  ;;  %v2181_v26 = vadd.f32 %v2173_v19, %v2161_v15  ;;  %v2193_v12 = vmul.f32 %v5585_v49, %v5595_v52  ;;  %v5659_v56 = vmax.f32 %v2118_v42, %v5521_v41  ;;  %v5681_v19 = vld [vmem:[#allocation2 + $0x75] sm:$0xff] }
 0x1e7   :  { %v2252_v46 = vmul.f32 %v5643_v23, %v5622_v27  ;;  %v2272_v39 = vmul.f32 %v5649_v60, %v5624_v44  ;;  %v5666_v8 = vrot.slane %v2537_v11, %v7205_v7  ;;  %v2306_v15 = vmul.f32 %v5636_v35, %v2288_v53 }
 0x1e8   :  { %v2240_v24 = vadd.f32 %v2232_v32, %v2220_v6  ;;  %v2201_v50 = vadd.f32 %v2193_v12, %v2181_v26  ;;  %v2213_v13 = vmul.f32 %v5593_v21, %v5613_v9  ;;  %v2326_v42 = vmul.f32 %v5652_v5, %v2289_v14  ;;  %v5683_v32 = vld [vmem:[#allocation2 + $0x36] sm:$0xff] }
 0x1e9   :  { %v5675_v57 = vrot.slane %v2538_v38, %v7205_v7  ;;  %v2233_v58 = vmul.f32 %v5630_v61, %v5622_v27  ;;  %v1764_v11 = vmax.f32 %v5279_v30, %v5281_v20  ;;  %v7206_v26 = vld [vmem:[#allocation149_spill] sm:$0xff]  ;;  %v2174_v2 = vmul.f32 %v5573_v31, %v5595_v52 }
 0x1ea   :  { %v2260_v6 = vadd.f32 %v2252_v46, %v2240_v24  ;;  %v2221_v53 = vadd.f32 %v2213_v13, %v2201_v50  ;;  %v2162_v12 = vadd.f32 %v7206_v26, %v2104_v33  ;;  %v2346_v38 = vmul.f32 %v5666_v8, %v5668_v25  ;;  %v5698_v24 = vld [vmem:[#allocation2 + $0x46] sm:$0xff]  ;;  %v5700_v50 = vld [vmem:[#allocation2 + $0x56] sm:$0xff] }
 0x1eb   :  { %v5691_v3 = vrot.slane %v2541_v62, %v7205_v7  ;;  %v5694_v55 = vrot.slane %v2543_v36, %v7205_v7  ;;  %v2253_v30 = vmul.f32 %v5643_v23, %v5624_v44  ;;  %v5702_v33 = vld [vmem:[#allocation2 + $0x66] sm:$0xff]  ;;  %v2194_v1 = vmul.f32 %v5585_v49, %v5613_v9 }
 0x1ec   :  { %v2280_v46 = vadd.f32 %v2272_v39, %v2260_v6  ;;  %v2241_v13 = vadd.f32 %v2233_v58, %v2221_v53  ;;  %v2182_v26 = vadd.f32 %v2174_v2, %v2162_v12  ;;  %v2366_v62 = vmul.f32 %v5675_v57, %v5683_v32  ;;  %v5723_v12 = vld [vmem:[#allocation2 + $0x94] sm:$0xff] }
 0x1ed   :  { %v5709_v36 = vrot.slane %v2544_v22, %v7205_v7  ;;  %v2273_v39 = vmul.f32 %v5649_v60, %v5681_v19  ;;  %v1772_v6 = vmax.f32 %v1764_v11, %v5289_v47  ;;  %v2214_v2 = vmul.f32 %v5593_v21, %v5622_v27 }
 0x1ee   :  { %v2314_v0 = vadd.f32 %v2306_v15, %v2280_v46  ;;  %v2261_v54 = vadd.f32 %v2253_v30, %v2241_v13  ;;  %v2202_v40 = vadd.f32 %v2194_v1, %v2182_v26  ;;  %v2386_v58 = vmul.f32 %v5691_v3, %v5698_v24 }
 0x1ef   :  { %v2406_v53 = vmul.f32 %v5694_v55, %v5700_v50  ;;  %v2426_v7 = vmul.f32 %v5709_v36, %v5702_v33  ;;  %v2307_v22 = vmul.f32 %v5636_v35, %v2289_v14  ;;  %v2234_v1 = vmul.f32 %v5630_v61, %v5624_v44 }
 0x1f0   :  { %v2334_v11 = vadd.f32 %v2326_v42, %v2314_v0  ;;  %v2281_v15 = vadd.f32 %v2273_v39, %v2261_v54  ;;  %v2222_v30 = vadd.f32 %v2214_v2, %v2202_v40  ;;  %v2327_v46 = vmul.f32 %v5652_v5, %v5668_v25 }
 0x1f1   :  { %v2347_v13 = vmul.f32 %v5666_v8, %v5683_v32  ;;  %v1934_v26 = vmax.f32 %v1772_v6, %v5438_v43  ;;  %v2077_v14 = vmul.f32 %v7197_v29, %v5578_v51  ;;  %v2254_v40 = vmul.f32 %v5643_v23, %v5681_v19 }
 0x1f2   :  { %v2354_v59 = vadd.f32 %v2346_v38, %v2334_v11  ;;  %v2315_v0 = vadd.f32 %v2307_v22, %v2281_v15  ;;  %v2242_v54 = vadd.f32 %v2234_v1, %v2222_v30  ;;  %v2367_v42 = vmul.f32 %v5675_v57, %v5698_v24 }
 0x1f3   :  { %v2387_v39 = vmul.f32 %v5691_v3, %v5700_v50  ;;  %v2085_v2 = vadd.f32 %v2077_v14, %v5617_v10  ;;  %v2097_v43 = vmul.f32 %v7181_v48, %v5723_v12  ;;  %v2274_v11 = vmul.f32 %v5649_v60, %v5732_v16 }
 0x1f4   :  { %v2374_v6 = vadd.f32 %v2366_v62, %v2354_v59  ;;  %v2335_v38 = vadd.f32 %v2327_v46, %v2315_v0  ;;  %v2262_v22 = vadd.f32 %v2254_v40, %v2242_v54  ;;  %v1942_v15 = vmax.f32 %v1934_v26, %v5389_v18 }
 0x1f5   :  { %v1765_v30 = vmax.f32 %v5281_v20, %v5289_v47  ;;  %v2105_v1 = vadd.f32 %v2097_v43, %v2085_v2  ;;  %v2155_v10 = vmul.f32 %v7190_v34, %v5595_v52  ;;  %v2308_v59 = vmul.f32 %v5636_v35, %v5668_v25  ;;  %v5767_v25 = vld [vmem:[%s6074_s2 + $0x1] ss:$0 sm:$0xff]  ;;  %s2586_s2 = smov [#allocation4]  }
 0x1f6   :  { %v2394_v14 = vadd.f32 %v2386_v58, %v2374_v6  ;;  %v2355_v29 = vadd.f32 %v2347_v13, %v2335_v38  ;;  %v2282_v48 = vadd.f32 %v2274_v11, %v2262_v22  ;;  %v2407_v62 = vmul.f32 %v5694_v55, %v5702_v33  ;;  %7207 = vst [vmem:[#allocation296_spill] sm:$0xff] %v5767_v25  ;;  %v5770_v13 = vld [vmem:[#allocation2 + $0x72] sm:$0xff]  ;;  %s2484_s23 = sshll.u32 %s2586_s2, 4  ;;  %s2485_s23 = int_to_ptr.vmem [resolvable:$true] %s2484_s23 }
 0x1f7   :  { %v2427_v46 = vmul.f32 %v5709_v36, %v5745_v37  ;;  %v2163_v26 = vadd.f32 %v2155_v10, %v2105_v1  ;;  %v2175_v20 = vmul.f32 %v5573_v31, %v5613_v9  ;;  %v2328_v52 = vmul.f32 %v5652_v5, %v5683_v32  ;;  %v5784_v10 = vld [vmem:[#allocation2 + $0x86] sm:$0xff]  ;;  %s2560_s24 = scalar_lea.vmem %s2485_s23, 1024  ;;  %p2565_p1 = scmp.lt.s32.totalorder %s2485_s23, %s2485_s23 }
 0x1f8   :  { %v2414_v0 = vadd.f32 %v2406_v53, %v2394_v14  ;;  %v2375_v54 = vadd.f32 %v2367_v42, %v2355_v29  ;;  %v2316_v40 = vadd.f32 %v2308_v59, %v2282_v48  ;;  %v1950_v58 = vmax.f32 %v1942_v15, %v5347_v45  ;;  %p2561_p0 = scmp.ne.s32.totalorder %s2485_s23, %s2560_s24  ;;  %p2566_p2 = scmp.lt.s32.totalorder %s2560_s24, %s2560_s24 }
 0x1f9   :  { %v1773_v2 = vmax.f32 %v1765_v30, %v5770_v13  ;;  %v2183_v43 = vadd.f32 %v2175_v20, %v2163_v26  ;;  %v2195_v53 = vmul.f32 %v5585_v49, %v5622_v27  ;;  %v2348_v6 = vmul.f32 %v5666_v8, %v5698_v24 }
 0x1fa   :  { %v2434_v29 = vadd.f32 %v2426_v7, %v2414_v0  ;;  %v2395_v48 = vadd.f32 %v2387_v39, %v2375_v54  ;;  %v2336_v42 = vadd.f32 %v2328_v52, %v2316_v40  ;;  %v2368_v38 = vmul.f32 %v5675_v57, %v5700_v50  ;;  %v5793_v52 = vld [vmem:[#allocation2 + $0x95] sm:$0xff]  ;;  %p2567_p3 = por %p2566_p2, %p2565_p1 }
 0x1fb   :  { %v2388_v22 = vmul.f32 %v5691_v3, %v5702_v33  ;;  %v2203_v11 = vadd.f32 %v2195_v53, %v2183_v43  ;;  %v2215_v15 = vmul.f32 %v5593_v21, %v5624_v44  ;;  %v2408_v39 = vmul.f32 %v5694_v55, %v5745_v37 }
 0x1fc   :  { %v2447_v30 = vadd.f32 %v5767_v25, %v2434_v29  ;;  %v2415_v1 = vadd.f32 %v2407_v62, %v2395_v48  ;;  %v2356_v7 = vadd.f32 %v2348_v6, %v2336_v42  ;;  %v2112_v14 = vmax.f32 %v1950_v58, %v5521_v41  ;;  %v7209_v48 = vld [vmem:[#allocation278_spill] sm:$0xff]  ;;  %p2568_p4 = pnand %p2567_p3, %p2561_p0 }
 0x1fd   :  { %v1935_v59 = vmax.f32 %v1773_v2, %v5389_v18  ;;  %v2223_v26 = vadd.f32 %v2215_v15, %v2203_v11  ;;  %v2235_v20 = vmul.f32 %v5630_v61, %v5681_v19  ;;  %v2018_v62 = vmul.f32 %v7152_v4, %v5548_v17  ;;  %v7208_v2 = vld [vmem:[#allocation295_spill] sm:$0xff]  ;;  %v7210_v15 = vld [vmem:[#allocation230_spill] sm:$0xff] }
 0x1fe   :  { %v2455_v0 = vadd.f32 %v2447_v30, %v5659_v56  ;;  %v2435_v54 = vadd.f32 %v2427_v46, %v2415_v1  ;;  %v2376_v40 = vadd.f32 %v2368_v38, %v2356_v7  ;;  %v2428_v43 = vmul.f32 %v5709_v36, %v5784_v10  ;;  %v7211_v7 = vld [vmem:[#allocation132_spill] sm:$0xff] }
 0x1ff   :  { %v2243_v53 = vadd.f32 %v2235_v20, %v2223_v26  ;;  %v2255_v18 = vmul.f32 %v5643_v23, %v5732_v16  ;;  %v2038_v41 = vmul.f32 %v7193_v28, %v7180_v63  ;;  %v2026_v29 = vadd.f32 %v2018_v62, %v7208_v2  ;;  %v7213_v20 = vld [vmem:[#allocation293_spill] sm:$0xff] }
 0x200   :  { %v2463_v58 = vmax.f32 %v2455_v0, 0.0  ;;  %v2448_v56 = vadd.f32 %v5767_v25, %v2435_v54  ;;  %v2396_v46 = vadd.f32 %v2388_v22, %v2376_v40  ;;  %v2120_v42 = vmax.f32 %v2112_v14, %v7209_v48  ;;  %v5813_v22 = vld [vmem:[#allocation2 + $0xa4] sm:$0xff] }
 0x201   :  { %v1943_v6 = vmax.f32 %v1935_v59, %v5347_v45  ;;  %v2263_v38 = vadd.f32 %v2255_v18, %v2243_v53  ;;  %v2275_v11 = vmul.f32 %v5649_v60, %v5793_v52  ;;  %v2046_v63 = vadd.f32 %v2038_v41, %v2026_v29  ;;  %7212 = vst [vmem:[#allocation172_spill] sm:$0xff] %v5813_v22  ;;  %v7214_v0 = vld [vmem:[#allocation239_spill] sm:$0xff]  ;;  %v7215_v18 = vld [vmem:[#allocation146_spill] sm:$0xff] }
 0x202   :  { %2471 = vst.msk [vmem:[#allocation4] sm:$0xff] %vm23_vm0, %v2463_v58  ;;  %v2456_v30 = vadd.f32 %v2448_v56, %v7210_v15  ;;  %v2416_v1 = vadd.f32 %v2408_v39, %v2396_v46  ;;  %v2058_v26 = vmul.f32 %v7211_v7, %v5578_v51  ;;  %v1909_v14 = vadd.f32 %v7214_v0, %v7213_v20  ;;  %v5822_v41 = vld [vmem:[#allocation2 + $0x73] sm:$0xff]  ;;  %v7218_v15 = vld [vmem:[#allocation131_spill] sm:$0xff] }
 0x203   :  { %v2283_v54 = vadd.f32 %v2275_v11, %v2263_v38  ;;  %v2309_v59 = vmul.f32 %v5636_v35, %v5683_v32  ;;  %v2078_v58 = vmul.f32 %v7215_v18, %v5723_v12  ;;  %v2128_v39 = vmax.f32 %v2120_v42, %v5548_v17  ;;  %v7216_v38 = vld [vmem:[#allocation147_spill] sm:$0xff]  ;;  %v5833_v42 = vld [vmem:[#allocation2 + $0xb3] sm:$0xff] }
 0x204   :  { %v2464_v40 = vmax.f32 %v2456_v30, 0.0  ;;  %v2436_v62 = vadd.f32 %v2428_v43, %v2416_v1  ;;  %v2066_v53 = vadd.f32 %v2058_v26, %v2046_v63  ;;  %v1951_v56 = vmax.f32 %v1943_v6, %v5822_v41  ;;  %7217 = vst [vmem:[#allocation202_spill] sm:$0xff] %v5833_v42 }
 0x205   :  { %v2317_v46 = vadd.f32 %v2309_v59, %v2283_v54  ;;  %v2329_v2 = vmul.f32 %v5652_v5, %v5698_v24  ;;  %v1766_v43 = vmax.f32 %v5289_v47, %v5770_v13  ;;  %v2098_v11 = vmul.f32 %v7216_v38, %v5813_v22 }
 0x206   :  { %2472 = vst.msk [vmem:[#allocation4 + $0x8] sm:$0xff] %vm23_vm0, %v2464_v40  ;;  %v2449_v32 = vadd.f32 %v5767_v25, %v2436_v62  ;;  %v2086_v29 = vadd.f32 %v2078_v58, %v2066_v53  ;;  %v1921_v6 = vmul.f32 %v5833_v42, %v7218_v15  ;;  %v2349_v1 = vmul.f32 %v5666_v8, %v5700_v50  ;;  %v5844_v62 = vld [vmem:[#allocation2 + $0x82] sm:$0xff] }
 0x207   :  { %v2337_v30 = vadd.f32 %v2329_v2, %v2317_v46  ;;  %v2156_v20 = vmul.f32 %v7190_v34, %v5613_v9  ;;  %v2113_v47 = vmax.f32 %v1951_v56, %v7209_v48  ;;  %v2369_v59 = vmul.f32 %v5675_v57, %v5702_v33  ;;  %v5854_v2 = vld [vmem:[#allocation2 + $0x96] sm:$0xff] }
 0x208   :  { %v2457_v63 = vadd.f32 %v2449_v32, %v2128_v39  ;;  %v2106_v26 = vadd.f32 %v2098_v11, %v2086_v29  ;;  %v1929_v0 = vadd.f32 %v1921_v6, %v1909_v14  ;;  %v1774_v53 = vmax.f32 %v1766_v43, %v5844_v62  ;;  %v7219_v14 = vld [vmem:[#allocation229_spill] sm:$0xff] }
 0x209   :  { %v2357_v54 = vadd.f32 %v2349_v1, %v2337_v30  ;;  %v2176_v39 = vmul.f32 %v5573_v31, %v5622_v27  ;;  %v2389_v9 = vmul.f32 %v5691_v3, %v5745_v37  ;;  %v1979_v56 = vmul.f32 %v7219_v14, %v7209_v48  ;;  %v7220_v30 = vld [vmem:[#allocation224_spill] sm:$0xff] }
 0x20a   :  { %v2465_v40 = vmax.f32 %v2457_v63, 0.0  ;;  %v2164_v58 = vadd.f32 %v2156_v20, %v2106_v26  ;;  %v2196_v29 = vmul.f32 %v5585_v49, %v5624_v44  ;;  %v2409_v11 = vmul.f32 %v5694_v55, %v5784_v10 }
 0x20b   :  { %v2377_v46 = vadd.f32 %v2369_v59, %v2357_v54  ;;  %v1987_v6 = vadd.f32 %v1979_v56, %v1929_v0  ;;  %v1999_v1 = vmul.f32 %v7220_v30, %v5548_v17  ;;  %v2121_v63 = vmax.f32 %v2113_v47, %v5548_v17 }
 0x20c   :  { %2473 = vst.msk [vmem:[#allocation4 + $0x10] sm:$0xff] %vm23_vm0, %v2465_v40  ;;  %v2184_v32 = vadd.f32 %v2176_v39, %v2164_v58  ;;  %v1936_v48 = vmax.f32 %v1774_v53, %v5347_v45  ;;  %v2216_v20 = vmul.f32 %v5593_v21, %v5681_v19  ;;  %v2429_v59 = vmul.f32 %v5709_v36, %v5854_v2  ;;  %v5868_v58 = vld [vmem:[#allocation2 + $0x74] sm:$0xff]  ;;  %v5874_v45 = vld [vmem:[#allocation2 + $0xa5] sm:$0xff] }
 0x20d   :  { %v2397_v43 = vadd.f32 %v2389_v9, %v2377_v46  ;;  %v2007_v40 = vadd.f32 %v1999_v1, %v1987_v6  ;;  %v2019_v0 = vmul.f32 %v5868_v58, %v7152_v4  ;;  %v2236_v47 = vmul.f32 %v5630_v61, %v5732_v16 }
 0x20e   :  { %v2204_v26 = vadd.f32 %v2196_v29, %v2184_v32  ;;  %v2039_v9 = vmul.f32 %v7193_v28, %v5578_v51  ;;  %v1944_v56 = vmax.f32 %v1936_v48, %v5822_v41  ;;  %v2256_v29 = vmul.f32 %v5643_v23, %v5793_v52 }
 0x20f   :  { %v2417_v54 = vadd.f32 %v2409_v11, %v2397_v43  ;;  %v2027_v53 = vadd.f32 %v2019_v0, %v2007_v40  ;;  %v2129_v43 = vmax.f32 %v2121_v63, %v5868_v58  ;;  %v2059_v1 = vmul.f32 %v7211_v7, %v5723_v12  ;;  %v5891_v0 = vld [vmem:[#allocation2 + $0xb4] sm:$0xff] }
 0x210   :  { %v2224_v39 = vadd.f32 %v2216_v20, %v2204_v26  ;;  %v2276_v20 = vmul.f32 %v5649_v60, %v5874_v45  ;;  %v2079_v48 = vmul.f32 %v7215_v18, %v5813_v22  ;;  %v1980_v40 = vmul.f32 %v7219_v14, %v5548_v17 }
 0x211   :  { %v2437_v46 = vadd.f32 %v2429_v59, %v2417_v54  ;;  %v2047_v6 = vadd.f32 %v2039_v9, %v2027_v53  ;;  %v2099_v63 = vmul.f32 %v5891_v0, %v7216_v38  ;;  %v2310_v53 = vmul.f32 %v5636_v35, %v5698_v24 }
 0x212   :  { %v2244_v32 = vadd.f32 %v2236_v47, %v2224_v39  ;;  %v5895_v39 = vld [vmem:[#allocation2 + $0x83] sm:$0xff]  ;;  %v2157_v24 = vmul.f32 %v7190_v34, %v5622_v27  ;;  %v2040_v27 = vmul.f32 %v7193_v28, %v5723_v12 }
 0x213   :  { %v2450_v11 = vadd.f32 %v5767_v25, %v2437_v46  ;;  %v2067_v59 = vadd.f32 %v2059_v1, %v2047_v6  ;;  %v1952_v47 = vmax.f32 %v1944_v56, %v5895_v39  ;;  %v2552_v6 = vld [vmem:[#allocation2 + $0xd3] sm:$0xff]  ;;  %v2330_v25 = vmul.f32 %v5652_v5, %v5700_v50 }
 0x214   :  { %v2264_v26 = vadd.f32 %v2256_v29, %v2244_v32  ;;  %v7221_v29 = vld [vmem:[#allocation160_spill] sm:$0xff]  ;;  %v1923_v1 = vmul.f32 %v2552_v6, %v7218_v15  ;;  %v2350_v15 = vmul.f32 %v5666_v8, %v5702_v33 }
 0x215   :  { %v2458_v54 = vadd.f32 %v2450_v11, %v2129_v43  ;;  %v2087_v32 = vadd.f32 %v2079_v48, %v2067_v59  ;;  %v1988_v43 = vadd.f32 %v1980_v40, %v7221_v29  ;;  %v2000_v11 = vmul.f32 %v5868_v58, %v7220_v30 }
 0x216   :  { %v2284_v46 = vadd.f32 %v2276_v20, %v2264_v26  ;;  %v2020_v20 = vmul.f32 %v7152_v4, %v5578_v51  ;;  %v1767_v48 = vmax.f32 %v5770_v13, %v5844_v62 }
 0x217   :  { %v2466_v9 = vmax.f32 %v2458_v54, 0.0  ;;  %v2107_v56 = vadd.f32 %v2099_v63, %v2087_v32  ;;  %v2008_v26 = vadd.f32 %v2000_v11, %v1988_v43  ;;  %v2114_v54 = vmax.f32 %v1952_v47, %v5548_v17  ;;  %v5925_v47 = vld [vmem:[#allocation2 + $0xa6] sm:$0xff] }
 0x218   :  { %v2318_v42 = vadd.f32 %v2310_v53, %v2284_v46  ;;  %v2177_v63 = vmul.f32 %v5573_v31, %v5624_v44  ;;  %v2080_v53 = vmul.f32 %v5891_v0, %v7215_v18  ;;  %v2197_v32 = vmul.f32 %v5585_v49, %v5681_v19 }
 0x219   :  { %2474 = vst.msk [vmem:[#allocation4 + $0x18] sm:$0xff] %vm23_vm0, %v2466_v9  ;;  %v2165_v40 = vadd.f32 %v2157_v24, %v2107_v56  ;;  %v2028_v46 = vadd.f32 %v2020_v20, %v2008_v26  ;;  %v2553_v9 = vld [vmem:[#allocation2 + $0xc4] sm:$0xff]  ;;  %v2060_v43 = vmul.f32 %v7211_v7, %v5813_v22  ;;  %v2041_v11 = vmul.f32 %v7193_v28, %v5813_v22  ;;  %v5935_v24 = vld [vmem:[#allocation2 + $0x92] sm:$0xff] }
 0x21a   :  { %v2338_v59 = vadd.f32 %v2330_v25, %v2318_v42  ;;  %v2100_v17 = vmul.f32 %v2553_v9, %v7216_v38  ;;  %v2370_v42 = vmul.f32 %v5675_v57, %v5745_v37  ;;  %v2390_v56 = vmul.f32 %v5691_v3, %v5784_v10 }
 0x21b   :  { %v2185_v13 = vadd.f32 %v2177_v63, %v2165_v40  ;;  %v2048_v29 = vadd.f32 %v2040_v27, %v2028_v46  ;;  %v1775_v26 = vmax.f32 %v1767_v48, %v5935_v24  ;;  %v2122_v20 = vmax.f32 %v2114_v54, %v5868_v58  ;;  %v7222_v27 = vld [vmem:[#allocation259_spill] sm:$0xff] }
 0x21c   :  { %v2358_v25 = vadd.f32 %v2350_v15, %v2338_v59  ;;  %v2217_v15 = vmul.f32 %v5593_v21, %v5732_v16  ;;  %v2410_v46 = vmul.f32 %v5694_v55, %v5854_v2  ;;  %v2430_v28 = vmul.f32 %v5709_v36, %v5925_v47 }
 0x21d   :  { %v2205_v59 = vadd.f32 %v2197_v32, %v2185_v13  ;;  %v2068_v40 = vadd.f32 %v2060_v43, %v2048_v29  ;;  %v2237_v54 = vmul.f32 %v5630_v61, %v5793_v52  ;;  %v1981_v13 = vmul.f32 %v5868_v58, %v7219_v14 }
 0x21e   :  { %v2378_v6 = vadd.f32 %v2370_v42, %v2358_v25  ;;  %v1931_v25 = vadd.f32 %v1923_v1, %v7222_v27  ;;  %v5946_v42 = vld [vmem:[#allocation2 + $0xb5] sm:$0xff]  ;;  %v1937_v29 = vmax.f32 %v1775_v26, %v5822_v41  ;;  %v2257_v43 = vmul.f32 %v5643_v23, %v5874_v45 }
 0x21f   :  { %v2225_v22 = vadd.f32 %v2217_v15, %v2205_v59  ;;  %v2088_v48 = vadd.f32 %v2080_v53, %v2068_v40  ;;  %v2001_v59 = vmul.f32 %v7220_v30, %v5578_v51  ;;  %v2277_v53 = vmul.f32 %v5649_v60, %v5946_v42 }
 0x220   :  { %v2398_v63 = vadd.f32 %v2390_v56, %v2378_v6  ;;  %v2158_v6 = vmul.f32 %v7190_v34, %v5624_v44  ;;  %v1989_v27 = vadd.f32 %v1981_v13, %v1931_v25  ;;  %v1768_v14 = vmax.f32 %v5844_v62, %v5935_v24 }
 0x221   :  { %v2245_v1 = vadd.f32 %v2237_v54, %v2225_v22  ;;  %v2108_v56 = vadd.f32 %v2100_v17, %v2088_v48  ;;  %v2178_v41 = vmul.f32 %v5573_v31, %v5681_v19  ;;  %v2021_v44 = vmul.f32 %v7152_v4, %v5723_v12  ;;  %v7223_v17 = vld [vmem:[#allocation296_spill] sm:$0xff] }
 0x222   :  { %v2418_v32 = vadd.f32 %v2410_v46, %v2398_v63  ;;  %v2009_v63 = vadd.f32 %v2001_v59, %v1989_v27  ;;  %v2130_v22 = vmax.f32 %v2122_v20, %v5578_v51  ;;  %v1945_v46 = vmax.f32 %v1937_v29, %v5895_v39  ;;  %v2555_v20 = vld [vmem:[#allocation2 + $0xa2] sm:$0xff]  ;;  %v5981_v59 = vld [vmem:[#allocation2 + $0x93] sm:$0xff] }
 0x223   :  { %v2265_v26 = vadd.f32 %v2257_v43, %v2245_v1  ;;  %v2166_v40 = vadd.f32 %v2158_v6, %v2108_v56  ;;  %v2198_v54 = vmul.f32 %v5585_v49, %v5732_v16  ;;  %v2061_v13 = vmul.f32 %v5891_v0, %v7211_v7 }
 0x224   :  { %v2438_v15 = vadd.f32 %v2430_v28, %v2418_v32  ;;  %v2311_v28 = vmul.f32 %v5636_v35, %v5700_v50  ;;  %v2029_v48 = vadd.f32 %v2021_v44, %v2009_v63  ;;  %v2331_v4 = vmul.f32 %v5652_v5, %v5702_v33  ;;  %v2557_v63 = vld [vmem:[#allocation2 + $0xd4] sm:$0xff] }
 0x225   :  { %v2285_v25 = vadd.f32 %v2277_v53, %v2265_v26  ;;  %v2186_v62 = vadd.f32 %v2178_v41, %v2166_v40  ;;  %v1776_v43 = vmax.f32 %v1768_v14, %v2555_v20  ;;  %v2218_v50 = vmul.f32 %v5593_v21, %v5793_v52  ;;  %v2146_v41 = vld [vmem:[#allocation2 + $0xc5] sm:$0xff] }
 0x226   :  { %v2451_v30 = vadd.f32 %v7223_v17, %v2438_v15  ;;  %v2049_v1 = vadd.f32 %v2041_v11, %v2029_v48  ;;  %v2081_v56 = vmul.f32 %v2553_v9, %v7215_v18  ;;  %v1953_v15 = vmax.f32 %v1945_v46, %v5981_v59 }
 0x227   :  { %v2319_v6 = vadd.f32 %v2311_v28, %v2285_v25  ;;  %v2206_v29 = vadd.f32 %v2198_v54, %v2186_v62  ;;  %v2351_v7 = vmul.f32 %v5666_v8, %v5745_v37  ;;  %v2238_v14 = vmul.f32 %v5630_v61, %v5874_v45  ;;  %v5999_v62 = vld [vmem:[#allocation2 + $0xb6] sm:$0xff] }
 0x228   :  { %v2459_v32 = vadd.f32 %v2451_v30, %v2130_v22  ;;  %v2069_v40 = vadd.f32 %v2061_v13, %v2049_v1  ;;  %v2101_v11 = vmul.f32 %v2557_v63, %v7216_v38  ;;  %v2371_v18 = vmul.f32 %v5675_v57, %v5784_v10 }
 0x229   :  { %v2339_v53 = vadd.f32 %v2331_v4, %v2319_v6  ;;  %v2226_v26 = vadd.f32 %v2218_v50, %v2206_v29  ;;  %v1938_v9 = vmax.f32 %v1776_v43, %v5895_v39  ;;  %v2258_v30 = vmul.f32 %v5643_v23, %v5946_v42 }
 0x22a   :  { %v2467_v27 = vmax.f32 %v2459_v32, 0.0  ;;  %v2089_v46 = vadd.f32 %v2081_v56, %v2069_v40  ;;  %v2115_v28 = vmax.f32 %v1953_v15, %v5868_v58  ;;  %v2391_v25 = vmul.f32 %v5691_v3, %v5854_v2 }
 0x22b   :  { %v2359_v44 = vadd.f32 %v2351_v7, %v2339_v53  ;;  %v2246_v22 = vadd.f32 %v2238_v14, %v2226_v26  ;;  %v2278_v38 = vmul.f32 %v5649_v60, %v2146_v41  ;;  %v2159_v39 = vmul.f32 %v7190_v34, %v5681_v19 }
 0x22c   :  { %2475 = vst.msk [vmem:[#allocation4 + $0x20] sm:$0xff] %vm23_vm0, %v2467_v27  ;;  %v2109_v13 = vadd.f32 %v2101_v11, %v2089_v46  ;;  %v2411_v32 = vmul.f32 %v5694_v55, %v5925_v47  ;;  %v1946_v4 = vmax.f32 %v1938_v9, %v5981_v59  ;;  %v2312_v58 = vmul.f32 %v5636_v35, %v5702_v33 }
 0x22d   :  { %v2379_v54 = vadd.f32 %v2371_v18, %v2359_v44  ;;  %v2266_v48 = vadd.f32 %v2258_v30, %v2246_v22  ;;  %v1769_v43 = vmax.f32 %v5935_v24, %v2555_v20  ;;  %v2179_v1 = vmul.f32 %v5573_v31, %v5732_v16  ;;  %v2558_v24 = vld [vmem:[#allocation2 + $0xa3] sm:$0xff]  ;;  %v2559_v31 = vld [vmem:[#allocation2 + $0xb2] sm:$0xff] }
 0x22e   :  { %v2167_v50 = vadd.f32 %v2159_v39, %v2109_v13  ;;  %v2123_v56 = vmax.f32 %v2115_v28, %v5578_v51  ;;  %v2431_v34 = vmul.f32 %v5709_v36, %v5999_v62  ;;  %v2332_v19 = vmul.f32 %v5652_v5, %v5745_v37  ;;  %v2300_v28 = vld [vmem:[#allocation2 + $0xc6] sm:$0xff] }
 0x22f   :  { %v2399_v6 = vadd.f32 %v2391_v25, %v2379_v54  ;;  %v2286_v29 = vadd.f32 %v2278_v38, %v2266_v48  ;;  %v2199_v33 = vmul.f32 %v5585_v49, %v5793_v52  ;;  %v1954_v20 = vmax.f32 %v1946_v4, %v2558_v24 }
 0x230   :  { %v2187_v7 = vadd.f32 %v2179_v1, %v2167_v50  ;;  %v2352_v53 = vmul.f32 %v5666_v8, %v5784_v10  ;;  %v1777_v16 = vmax.f32 %v1769_v43, %v2559_v31  ;;  %v2219_v63 = vmul.f32 %v5593_v21, %v5874_v45  ;;  %v2147_v21 = vld [vmem:[#allocation2 + $0xd5] sm:$0xff] }
 0x231   :  { %v2419_v27 = vadd.f32 %v2411_v32, %v2399_v6  ;;  %v2320_v15 = vadd.f32 %v2312_v58, %v2286_v29  ;;  %v2131_v11 = vmax.f32 %v2123_v56, %v5723_v12  ;;  %v2372_v18 = vmul.f32 %v5675_v57, %v5854_v2  ;;  %v7224_v29 = vld [vmem:[#allocation172_spill] sm:$0xff]  ;;  %v7225_v1 = vld [vmem:[#allocation202_spill] sm:$0xff] }
 0x232   :  { %v2207_v40 = vadd.f32 %v2199_v33, %v2187_v7  ;;  %v2239_v44 = vmul.f32 %v5630_v61, %v5946_v42  ;;  %v2116_v22 = vmax.f32 %v1954_v20, %v5578_v51  ;;  %v2392_v30 = vmul.f32 %v5691_v3, %v5925_v47 }
 0x233   :  { %v2439_v26 = vadd.f32 %v2431_v34, %v2419_v27  ;;  %v2340_v14 = vadd.f32 %v2332_v19, %v2320_v15  ;;  %v1939_v46 = vmax.f32 %v1777_v16, %v5981_v59  ;;  %v2259_v54 = vmul.f32 %v5643_v23, %v2146_v41 }
 0x234   :  { %v2227_v9 = vadd.f32 %v2219_v63, %v2207_v40  ;;  %v2412_v48 = vmul.f32 %v5694_v55, %v5999_v62  ;;  %v2279_v51 = vmul.f32 %v5649_v60, %v2147_v21  ;;  %v2124_v42 = vmax.f32 %v2116_v22, %v5723_v12 }
 0x235   :  { %v2452_v49 = vadd.f32 %v7223_v17, %v2439_v26  ;;  %v2360_v52 = vadd.f32 %v2352_v53, %v2340_v14  ;;  %v2432_v32 = vmul.f32 %v5709_v36, %v2300_v28  ;;  %v1947_v4 = vmax.f32 %v1939_v46, %v2558_v24 }
 0x236   :  { %v2247_v38 = vadd.f32 %v2239_v44, %v2227_v9  ;;  %v2313_v23 = vmul.f32 %v5636_v35, %v5745_v37  ;;  %v2333_v6 = vmul.f32 %v5652_v5, %v5784_v10  ;;  %v2132_v50 = vmax.f32 %v2124_v42, %v7224_v29  ;;  %v2301_v10 = vld [vmem:[#allocation2 + $0xd6] sm:$0xff] }
 0x237   :  { %v2460_v45 = vadd.f32 %v2452_v49, %v2131_v11  ;;  %v2380_v25 = vadd.f32 %v2372_v18, %v2360_v52  ;;  %v1955_v56 = vmax.f32 %v1947_v4, %v7225_v1  ;;  %v2353_v19 = vmul.f32 %v5666_v8, %v5854_v2 }
 0x238   :  { %v2267_v61 = vadd.f32 %v2259_v54, %v2247_v38  ;;  %v2373_v37 = vmul.f32 %v5675_v57, %v5925_v47  ;;  %v2393_v5 = vmul.f32 %v5691_v3, %v5999_v62  ;;  %v2413_v20 = vmul.f32 %v5694_v55, %v2300_v28 }
 0x239   :  { %v2468_v13 = vmax.f32 %v2460_v45, 0.0  ;;  %v2400_v39 = vadd.f32 %v2392_v30, %v2380_v25  ;;  %v2117_v7 = vmax.f32 %v1955_v56, %v5723_v12  ;;  %v2433_v53 = vmul.f32 %v5709_v36, %v2301_v10 }
 0x23a   :  { %v2287_v58 = vadd.f32 %v2279_v51, %v2267_v61 }
 0x23b   :  { %2476 = vst.msk [vmem:[#allocation4 + $0x28] sm:$0xff] %vm23_vm0, %v2468_v13  ;;  %v2420_v59 = vadd.f32 %v2412_v48, %v2400_v39  ;;  %v2125_v8 = vmax.f32 %v2117_v7, %v7224_v29 }
 0x23c   :  { %v2321_v43 = vadd.f32 %v2313_v23, %v2287_v58 }
 0x23d   :  { %v2440_v41 = vadd.f32 %v2432_v32, %v2420_v59  ;;  %v2133_v57 = vmax.f32 %v2125_v8, %v5891_v0 }
 0x23e   :  { %v2341_v34 = vadd.f32 %v2333_v6, %v2321_v43 }
 0x23f   :  { %v2453_v60 = vadd.f32 %v7223_v17, %v2440_v41 }
 0x240   :  { %v2361_v15 = vadd.f32 %v2353_v19, %v2341_v34 }
 0x241   :  { %v2461_v27 = vadd.f32 %v2453_v60, %v2132_v50 }
 0x242   :  { %v2381_v33 = vadd.f32 %v2373_v37, %v2361_v15 }
 0x243   :  { %v2469_v35 = vmax.f32 %v2461_v27, 0.0 }
 0x244   :  { %v2401_v24 = vadd.f32 %v2393_v5, %v2381_v33 }
 0x245   :  { %2477 = vst.msk [vmem:[#allocation4 + $0x30] sm:$0xff] %vm23_vm0, %v2469_v35 }
 0x246   :  { %v2421_v2 = vadd.f32 %v2413_v20, %v2401_v24 }
 0x248   :  { %v2441_v31 = vadd.f32 %v2433_v53, %v2421_v2 }
 0x24a   :  { %v2454_v12 = vadd.f32 %v7223_v17, %v2441_v31 }
 0x24c   :  { %v2462_v47 = vadd.f32 %v2454_v12, %v2133_v57 }
 0x24e   :  { %v2470_v3 = vmax.f32 %v2462_v47, 0.0 }
 0x250   :  { %2478 = vst.msk [vmem:[#allocation4 + $0x38] sm:$0xff] %vm23_vm0, %v2470_v3 }
 0x251   :  { %2571 = shalt.err (!%p2568_p4)
}
 0x252   :  { %s2572_s27 = scalar_lea.hbm %s6075_s3, 1024 }
 0x253   :  { %p2573_p5 = scmp.ne.s32.totalorder %s6075_s3, %s2572_s27  ;;  %p2576_p6 = scmp.lt.u32.totalorder %s2572_s27, %s6075_s3 }
 0x255   :  { %p2578_p7 = pnand %p2576_p6, %p2573_p5 }
 0x257   :  { %2581 = shalt.err (!%p2578_p7)
}
 0x258   :  { %s2587_s5 = smov 128   ;;  %s2588_s6 = smov 8  }
 0x259   :  { %2490 = dma.vmem_to_hbm [thread:$0]  %s2485_s23, 1024, %s6075_s3, [#allocation5], %s2587_s5, %s2587_s5, %s2588_s6  }
 0x25a   :  { %2582 = dma.done.wait [#allocation5], 1024  }
 0x25b   :  { %2583 = vsyncadd [#allocation5], 4294966272 }
 0x25c   :  { %2494 = vsyncpa [#allocation5], 1 }

</bundles_post_ra>
